<compile_context>
chip_gen: v7x
topology: tpu7x:2x2x1
jax: 0.10.0
libtpu: 0.0.40
codegen_flags: <defaults>
</compile_context>

<pallas_src>
import functools

import numpy as np
import jax
import jax.numpy as jnp
from jax.experimental import pallas as pl
from jax.experimental.pallas import tpu as pltpu


HW1_PAD = 1024   # conv1 pooled spatial 30*30 = 900 -> padded lane width
HW2_PAD = 256    # conv2 pooled spatial 13*13 = 169 -> padded lane width


# ------------------------- Pallas kernels -------------------------

def conv_pool_kernel(cols_ref, w_ref, b_ref, o_ref, *, hw_pad):
    # cols_ref: (K, 4*hw_pad) bf16  -- 4 pool taps side by side on lanes
    # w_ref:    (Cout, K)      bf16
    # b_ref:    (Cout, 1)      f32
    # o_ref:    (Cout, hw_pad) bf16 = relu(maxpool(conv(x)) + b)
    acc = jnp.dot(w_ref[...], cols_ref[...],
                  preferred_element_type=jnp.float32)      # (Cout, 4*hw_pad)
    t0 = acc[:, 0 * hw_pad:1 * hw_pad]
    t1 = acc[:, 1 * hw_pad:2 * hw_pad]
    t2 = acc[:, 2 * hw_pad:3 * hw_pad]
    t3 = acc[:, 3 * hw_pad:4 * hw_pad]
    m = jnp.maximum(jnp.maximum(t0, t1), jnp.maximum(t2, t3))   # tree max
    o_ref[...] = jnp.maximum(m + b_ref[...], 0.0).astype(o_ref.dtype)


def fc_head_kernel(x_ref, w1_ref, b1_ref, w2_ref, b2_ref, w3_ref, b3_ref, o_ref):
    # bf16 matmul inputs, f32 accumulation / bias / ReLU throughout.
    h = jnp.dot(x_ref[...], w1_ref[...], preferred_element_type=jnp.float32) + b1_ref[...]
    h = jnp.maximum(h, 0.0).astype(w2_ref.dtype)
    h = jnp.dot(h, w2_ref[...], preferred_element_type=jnp.float32) + b2_ref[...]
    h = jnp.maximum(h, 0.0).astype(w3_ref.dtype)
    o_ref[...] = jnp.dot(h, w3_ref[...], preferred_element_type=jnp.float32) + b3_ref[...]


# ------------------------- wrappers -------------------------

def conv_relu_pool(cols, w_mat, b_col, hw_pad):
    # cols: (N, K, 4*hw_pad) bf16; w_mat: (Cout, K) bf16; b_col: (Cout, 1) f32
    N, K, L = cols.shape
    Cout = w_mat.shape[0]
    kern = functools.partial(conv_pool_kernel, hw_pad=hw_pad)
    return pl.pallas_call(
        kern,
        out_shape=jax.ShapeDtypeStruct((N, Cout, hw_pad), jnp.bfloat16),
        grid=(N,),
        in_specs=[
            pl.BlockSpec((None, K, L), lambda n: (n, 0, 0)),
            pl.BlockSpec((Cout, K), lambda n: (0, 0)),
            pl.BlockSpec((Cout, 1), lambda n: (0, 0)),
        ],
        out_specs=pl.BlockSpec((None, Cout, hw_pad), lambda n: (n, 0, 0)),
        compiler_params=pltpu.CompilerParams(dimension_semantics=("parallel",)),
    )(cols, w_mat, b_col)


def fc_head(x, fp):
    # x: (N, 16*HW2_PAD) bf16; weights pre-transposed/pre-cast in prepare_params.
    N = x.shape[0]
    n_out = fp["fc3_wT"].shape[1]

    def full(shape):
        nd = len(shape)
        return pl.BlockSpec(shape, lambda i, nd=nd: (0,) * nd)

    return pl.pallas_call(
        fc_head_kernel,
        out_shape=jax.ShapeDtypeStruct((N, n_out), jnp.float32),
        grid=(1,),
        in_specs=[
            full(x.shape),
            full(fp["fc1_wT"].shape), full(fp["fc1_b"].shape),
            full(fp["fc2_wT"].shape), full(fp["fc2_b"].shape),
            full(fp["fc3_wT"].shape), full(fp["fc3_b"].shape),
        ],
        out_specs=full((N, n_out)),
    )(x, fp["fc1_wT"], fp["fc1_b"], fp["fc2_wT"], fp["fc2_b"],
      fp["fc3_wT"], fp["fc3_b"])


# ------------------------- plain-JAX glue (im2col) -------------------------

def im2col_taps_padded(x, ksize, pool, hw_pad):
    # x: (N, C, H, W) bf16 -> cols (N, C*ksize*ksize, pool*pool*hw_pad) bf16.
    # K ordering is (C, KH, KW) to match PyTorch weight.reshape(Cout, -1);
    # the pool*pool taps are laid out contiguously along the padded lane axis.
    N, C, H, W = x.shape
    Ho, Wo = H - ksize + 1, W - ksize + 1
    assert Ho % pool == 0 and Wo % pool == 0, "conv output not divisible by pool"
    Hp, Wp = Ho // pool, Wo // pool
    HW = Hp * Wp
    K = C * ksize * ksize
    taps = []
    for ph in range(pool):
        for pw in range(pool):
            offs = []
            for kh in range(ksize):
                for kw in range(ksize):
                    s = jax.lax.slice(
                        x,
                        (0, 0, ph + kh, pw + kw),
                        (N, C, ph + kh + pool * (Hp - 1) + 1,
                         pw + kw + pool * (Wp - 1) + 1),
                        (1, 1, pool, pool))                 # (N, C, Hp, Wp)
                    offs.append(s.reshape(N, C, 1, HW))
            tap = jnp.concatenate(offs, axis=2).reshape(N, K, HW)
            tap = jnp.pad(tap, ((0, 0), (0, 0), (0, hw_pad - HW)))
            taps.append(tap)
    cols = jnp.concatenate(taps, axis=-1)                   # (N, K, pool*pool*hw_pad)
    return cols, Hp, Wp


# ------------------------- parameter prep (once, outside the hot path) ------

def prepare_params(p):
    f = {}
    f["w1"] = p["conv1_w"].reshape(6, -1).astype(jnp.bfloat16)       # (6, 75)
    f["b1"] = p["conv1_b"].reshape(6, 1).astype(jnp.float32)
    f["w2"] = p["conv2_w"].reshape(16, -1).astype(jnp.bfloat16)      # (16, 150)
    f["b2"] = p["conv2_b"].reshape(16, 1).astype(jnp.float32)
    # fc1 columns are (c, h, w) ordered; zero-pad each channel's 169 spatial
    # columns to HW2_PAD so the padded conv2 output flattens for free.
    w = p["fc1_w"].reshape(120, 16, 13 * 13)
    w = jnp.pad(w, ((0, 0), (0, 0), (0, HW2_PAD - 13 * 13)))
    f["fc1_wT"] = w.reshape(120, 16 * HW2_PAD).T.astype(jnp.bfloat16)  # (4096, 120)
    f["fc1_b"] = p["fc1_b"].reshape(1, -1).astype(jnp.float32)
    f["fc2_wT"] = p["fc2_w"].T.astype(jnp.bfloat16)                    # (120, 84)
    f["fc2_b"] = p["fc2_b"].reshape(1, -1).astype(jnp.float32)
    f["fc3_wT"] = p["fc3_w"].T.astype(jnp.bfloat16)                    # (84, 2)
    f["fc3_b"] = p["fc3_b"].reshape(1, -1).astype(jnp.float32)
    return f


# ------------------------- forward -------------------------

@jax.jit
def lenet_forward(x, fp):
    N = x.shape[0]
    xb = x.astype(jnp.bfloat16)

    # conv1 -> relu -> pool
    cols1, Hp1, Wp1 = im2col_taps_padded(xb, 5, 2, HW1_PAD)     # (N, 75, 4096)
    y1 = conv_relu_pool(cols1, fp["w1"], fp["b1"], HW1_PAD)     # (N, 6, 1024) bf16
    y1 = y1[:, :, :Hp1 * Wp1].reshape(N, 6, Hp1, Wp1)           # (N, 6, 30, 30)

    # conv2 -> relu -> pool
    cols2, Hp2, Wp2 = im2col_taps_padded(y1, 5, 2, HW2_PAD)     # (N, 150, 1024)
    y2 = conv_relu_pool(cols2, fp["w2"], fp["b2"], HW2_PAD)     # (N, 16, 256) bf16

    # flatten (c, hw_pad) matches the zero-padded fc1 rows -> fused FC head
    flat = y2.reshape(N, 16 * HW2_PAD)                          # free reshape
    return fc_head(flat, fp)


# ------------------------- reference & params -------------------------

def lenet_ref(x, p):
    def conv(z, w, b):
        y = jax.lax.conv_general_dilated(
            z, w, window_strides=(1, 1), padding="VALID",
            dimension_numbers=("NCHW", "OIHW", "NCHW"))
        return y + b[None, :, None, None]

    def pool(z):
        return jax.lax.reduce_window(z, -jnp.inf, jax.lax.max,
                                     (1, 1, 2, 2), (1, 1, 2, 2), "VALID")

    y = pool(jax.nn.relu(conv(x, p["conv1_w"], p["conv1_b"])))
    y = pool(jax.nn.relu(conv(y, p["conv2_w"], p["conv2_b"])))
    y = y.reshape(y.shape[0], -1)
    y = jax.nn.relu(y @ p["fc1_w"].T + p["fc1_b"])
    y = jax.nn.relu(y @ p["fc2_w"].T + p["fc2_b"])
    return y @ p["fc3_w"].T + p["fc3_b"]


def init_params(key):
    ks = jax.random.split(key, 10)

    def u(k, shape, fan_in):
        bound = 1.0 / float(np.sqrt(fan_in))
        return jax.random.uniform(k, shape, jnp.float32, -bound, bound)

    return {
        "conv1_w": u(ks[0], (6, 3, 5, 5), 3 * 25),
        "conv1_b": u(ks[1], (6,), 3 * 25),
        "conv2_w": u(ks[2], (16, 6, 5, 5), 6 * 25),
        "conv2_b": u(ks[3], (16,), 6 * 25),
        "fc1_w": u(ks[4], (120, 16 * 13 * 13), 16 * 13 * 13),
        "fc1_b": u(ks[5], (120,), 16 * 13 * 13),
        "fc2_w": u(ks[6], (84, 120), 120),
        "fc2_b": u(ks[7], (84,), 120),
        "fc3_w": u(ks[8], (2, 84), 84),
        "fc3_b": u(ks[9], (2,), 84),
    }


if __name__ == "__main__":
    key = jax.random.PRNGKey(0)
    kx, kp = jax.random.split(key)
    # Spatial 64x64 is dictated by fc1 = Linear(16*13*13, 120); batch kept small.
    x = jax.random.normal(kx, (2, 3, 64, 64), jnp.float32)
    params = init_params(kp)
    fused_params = prepare_params(params)   # one-time pre-transpose / pre-cast

    out = lenet_forward(x, fused_params)
    out = jax.block_until_ready(out)
    assert out.shape == (2, 2), out.shape

    ref = lenet_ref(x, params)
    np.testing.assert_allclose(np.asarray(out), np.asarray(ref), rtol=2e-2, atol=2e-2)

    print("KERNEL_OK")
</pallas_src>

<mosaic_0001>
module attributes {stable_mosaic.version = 11 : i64} {
  func.func @conv_pool_kernel(%arg0: i32, %arg1: memref<1x75x4096xbf16, #tpu.memory_space<vmem>>, %arg2: memref<6x75xbf16, #tpu.memory_space<vmem>>, %arg3: memref<6x1xf32, #tpu.memory_space<vmem>>, %arg4: memref<1x6x1024xbf16, #tpu.memory_space<vmem>>) attributes {dimension_semantics = [#tpu.dimension_semantics<parallel>], iteration_bounds = array<i64: 2>, scalar_prefetch = 0 : i64, scratch_operands = 0 : i64, tpu.core_type = #tpu.core_type<tc>, window_params = [{transform_indices = @transform_0, window_bounds = array<i64: 1, 75, 4096>}, {pipeline_mode = #tpu.pipeline_mode<synchronous>, transform_indices = @transform_1, window_bounds = array<i64: 6, 75>}, {pipeline_mode = #tpu.pipeline_mode<synchronous>, transform_indices = @transform_2, window_bounds = array<i64: 6, 1>}, {transform_indices = @transform_3, window_bounds = array<i64: 1, 6, 1024>}]} {
    %c0 = arith.constant 0 : index
    %c0_0 = arith.constant 0 : index
    %0 = vector.load %arg2[%c0, %c0_0] : memref<6x75xbf16, #tpu.memory_space<vmem>>, vector<6x75xbf16>
    %c0_1 = arith.constant 0 : index
    %c0_2 = arith.constant 0 : index
    %c0_3 = arith.constant 0 : index
    %1 = vector.load %arg1[%c0_1, %c0_2, %c0_3] : memref<1x75x4096xbf16, #tpu.memory_space<vmem>>, vector<1x75x4096xbf16>
    %2 = vector.shape_cast %1 : vector<1x75x4096xbf16> to vector<75x4096xbf16>
    %cst = arith.constant dense<0.000000e+00> : vector<6x4096xf32>
    %3 = tpu.matmul %0, %2, %cst {dimension_numbers = #tpu.dot_dimension_numbers<[1], [0], [0], [1], [0, 0, 1, 1], [], []>} : vector<6x75xbf16>, vector<75x4096xbf16>, vector<6x4096xf32> -> vector<6x4096xf32>
    %4 = vector.extract_strided_slice %3 {offsets = [0, 0], sizes = [6, 1024], strides = [1, 1]} : vector<6x4096xf32> to vector<6x1024xf32>
    %5 = vector.extract_strided_slice %3 {offsets = [0, 1024], sizes = [6, 1024], strides = [1, 1]} : vector<6x4096xf32> to vector<6x1024xf32>
    %6 = vector.extract_strided_slice %3 {offsets = [0, 2048], sizes = [6, 1024], strides = [1, 1]} : vector<6x4096xf32> to vector<6x1024xf32>
    %7 = vector.extract_strided_slice %3 {offsets = [0, 3072], sizes = [6, 1024], strides = [1, 1]} : vector<6x4096xf32> to vector<6x1024xf32>
    %8 = arith.maximumf %4, %5 : vector<6x1024xf32>
    %9 = arith.maximumf %6, %7 : vector<6x1024xf32>
    %10 = arith.maximumf %8, %9 : vector<6x1024xf32>
    %c0_4 = arith.constant 0 : index
    %c0_5 = arith.constant 0 : index
    %11 = vector.load %arg3[%c0_4, %c0_5] : memref<6x1xf32, #tpu.memory_space<vmem>>, vector<6x1xf32>
    %12 = vector.broadcast %11 : vector<6x1xf32> to vector<6x1024xf32>
    %13 = arith.addf %10, %12 : vector<6x1024xf32>
    %cst_6 = arith.constant 0.000000e+00 : f32
    %14 = vector.broadcast %cst_6 : f32 to vector<6x1024xf32>
    %15 = arith.maximumf %13, %14 : vector<6x1024xf32>
    %16 = arith.truncf %15 : vector<6x1024xf32> to vector<6x1024xbf16>
    %c0_7 = arith.constant 0 : index
    %c0_8 = arith.constant 0 : index
    %c0_9 = arith.constant 0 : index
    %17 = vector.load %arg4[%c0_7, %c0_8, %c0_9] : memref<1x6x1024xbf16, #tpu.memory_space<vmem>>, vector<1x6x1024xbf16>
    %18 = vector.shape_cast %17 : vector<1x6x1024xbf16> to vector<6x1024xbf16>
    %19 = vector.shape_cast %16 : vector<6x1024xbf16> to vector<1x6x1024xbf16>
    tpu.vector_store %arg4[%c0_7, %c0_8, %c0_9], %19 {strides = array<i32>} : memref<1x6x1024xbf16, #tpu.memory_space<vmem>>, vector<1x6x1024xbf16>,
    return
  }
  func.func @transform_0(%arg0: i32) -> (i32, i32, i32) {
    %c0_i32 = arith.constant 0 : i32
    %c0_i32_0 = arith.constant 0 : i32
    %c0_i32_1 = arith.constant 0 : i32
    return %arg0, %c0_i32, %c0_i32_0 : i32, i32, i32
  }
  func.func @transform_1(%arg0: i32) -> (i32, i32) {
    %c0_i32 = arith.constant 0 : i32
    %c0_i32_0 = arith.constant 0 : i32
    %c0_i32_1 = arith.constant 0 : i32
    return %c0_i32, %c0_i32_0 : i32, i32
  }
  func.func @transform_2(%arg0: i32) -> (i32, i32) {
    %c0_i32 = arith.constant 0 : i32
    %c0_i32_0 = arith.constant 0 : i32
    %c0_i32_1 = arith.constant 0 : i32
    return %c0_i32, %c0_i32_0 : i32, i32
  }
  func.func @transform_3(%arg0: i32) -> (i32, i32, i32) {
    %c0_i32 = arith.constant 0 : i32
    %c0_i32_0 = arith.constant 0 : i32
    %c0_i32_1 = arith.constant 0 : i32
    return %arg0, %c0_i32, %c0_i32_0 : i32, i32, i32
  }
}

module attributes {stable_mosaic.version = 11 : i64} {
  func.func @conv_pool_kernel(%arg0: i32, %arg1: memref<1x150x1024xbf16, #tpu.memory_space<vmem>>, %arg2: memref<16x150xbf16, #tpu.memory_space<vmem>>, %arg3: memref<16x1xf32, #tpu.memory_space<vmem>>, %arg4: memref<1x16x256xbf16, #tpu.memory_space<vmem>>) attributes {dimension_semantics = [#tpu.dimension_semantics<parallel>], iteration_bounds = array<i64: 2>, scalar_prefetch = 0 : i64, scratch_operands = 0 : i64, tpu.core_type = #tpu.core_type<tc>, window_params = [{transform_indices = @transform_0, window_bounds = array<i64: 1, 150, 1024>}, {pipeline_mode = #tpu.pipeline_mode<synchronous>, transform_indices = @transform_1, window_bounds = array<i64: 16, 150>}, {pipeline_mode = #tpu.pipeline_mode<synchronous>, transform_indices = @transform_2, window_bounds = array<i64: 16, 1>}, {transform_indices = @transform_3, window_bounds = array<i64: 1, 16, 256>}]} {
    %c0 = arith.constant 0 : index
    %c0_0 = arith.constant 0 : index
    %0 = vector.load %arg2[%c0, %c0_0] : memref<16x150xbf16, #tpu.memory_space<vmem>>, vector<16x150xbf16>
    %c0_1 = arith.constant 0 : index
    %c0_2 = arith.constant 0 : index
    %c0_3 = arith.constant 0 : index
    %1 = vector.load %arg1[%c0_1, %c0_2, %c0_3] : memref<1x150x1024xbf16, #tpu.memory_space<vmem>>, vector<1x150x1024xbf16>
    %2 = vector.shape_cast %1 : vector<1x150x1024xbf16> to vector<150x1024xbf16>
    %cst = arith.constant dense<0.000000e+00> : vector<16x1024xf32>
    %3 = tpu.matmul %0, %2, %cst {dimension_numbers = #tpu.dot_dimension_numbers<[1], [0], [0], [1], [0, 0, 1, 1], [], []>} : vector<16x150xbf16>, vector<150x1024xbf16>, vector<16x1024xf32> -> vector<16x1024xf32>
    %4 = vector.extract_strided_slice %3 {offsets = [0, 0], sizes = [16, 256], strides = [1, 1]} : vector<16x1024xf32> to vector<16x256xf32>
    %5 = vector.extract_strided_slice %3 {offsets = [0, 256], sizes = [16, 256], strides = [1, 1]} : vector<16x1024xf32> to vector<16x256xf32>
    %6 = vector.extract_strided_slice %3 {offsets = [0, 512], sizes = [16, 256], strides = [1, 1]} : vector<16x1024xf32> to vector<16x256xf32>
    %7 = vector.extract_strided_slice %3 {offsets = [0, 768], sizes = [16, 256], strides = [1, 1]} : vector<16x1024xf32> to vector<16x256xf32>
    %8 = arith.maximumf %4, %5 : vector<16x256xf32>
    %9 = arith.maximumf %6, %7 : vector<16x256xf32>
    %10 = arith.maximumf %8, %9 : vector<16x256xf32>
    %c0_4 = arith.constant 0 : index
    %c0_5 = arith.constant 0 : index
    %11 = vector.load %arg3[%c0_4, %c0_5] : memref<16x1xf32, #tpu.memory_space<vmem>>, vector<16x1xf32>
    %12 = vector.broadcast %11 : vector<16x1xf32> to vector<16x256xf32>
    %13 = arith.addf %10, %12 : vector<16x256xf32>
    %cst_6 = arith.constant 0.000000e+00 : f32
    %14 = vector.broadcast %cst_6 : f32 to vector<16x256xf32>
    %15 = arith.maximumf %13, %14 : vector<16x256xf32>
    %16 = arith.truncf %15 : vector<16x256xf32> to vector<16x256xbf16>
    %c0_7 = arith.constant 0 : index
    %c0_8 = arith.constant 0 : index
    %c0_9 = arith.constant 0 : index
    %17 = vector.load %arg4[%c0_7, %c0_8, %c0_9] : memref<1x16x256xbf16, #tpu.memory_space<vmem>>, vector<1x16x256xbf16>
    %18 = vector.shape_cast %17 : vector<1x16x256xbf16> to vector<16x256xbf16>
    %19 = vector.shape_cast %16 : vector<16x256xbf16> to vector<1x16x256xbf16>
    tpu.vector_store %arg4[%c0_7, %c0_8, %c0_9], %19 {strides = array<i32>} : memref<1x16x256xbf16, #tpu.memory_space<vmem>>, vector<1x16x256xbf16>,
    return
  }
  func.func @transform_0(%arg0: i32) -> (i32, i32, i32) {
    %c0_i32 = arith.constant 0 : i32
    %c0_i32_0 = arith.constant 0 : i32
    %c0_i32_1 = arith.constant 0 : i32
    return %arg0, %c0_i32, %c0_i32_0 : i32, i32, i32
  }
  func.func @transform_1(%arg0: i32) -> (i32, i32) {
    %c0_i32 = arith.constant 0 : i32
    %c0_i32_0 = arith.constant 0 : i32
    %c0_i32_1 = arith.constant 0 : i32
    return %c0_i32, %c0_i32_0 : i32, i32
  }
  func.func @transform_2(%arg0: i32) -> (i32, i32) {
    %c0_i32 = arith.constant 0 : i32
    %c0_i32_0 = arith.constant 0 : i32
    %c0_i32_1 = arith.constant 0 : i32
    return %c0_i32, %c0_i32_0 : i32, i32
  }
  func.func @transform_3(%arg0: i32) -> (i32, i32, i32) {
    %c0_i32 = arith.constant 0 : i32
    %c0_i32_0 = arith.constant 0 : i32
    %c0_i32_1 = arith.constant 0 : i32
    return %arg0, %c0_i32, %c0_i32_0 : i32, i32, i32
  }
}

module attributes {stable_mosaic.version = 11 : i64} {
  func.func @fc_head_kernel(%arg0: i32, %arg1: memref<2x4096xbf16, #tpu.memory_space<vmem>>, %arg2: memref<4096x120xbf16, #tpu.memory_space<vmem>>, %arg3: memref<1x120xf32, #tpu.memory_space<vmem>>, %arg4: memref<120x84xbf16, #tpu.memory_space<vmem>>, %arg5: memref<1x84xf32, #tpu.memory_space<vmem>>, %arg6: memref<84x2xbf16, #tpu.memory_space<vmem>>, %arg7: memref<1x2xf32, #tpu.memory_space<vmem>>, %arg8: memref<2x2xf32, #tpu.memory_space<vmem>>) attributes {dimension_semantics = [#tpu.dimension_semantics<arbitrary>], iteration_bounds = array<i64: 1>, scalar_prefetch = 0 : i64, scratch_operands = 0 : i64, tpu.core_type = #tpu.core_type<tc>, window_params = [{pipeline_mode = #tpu.pipeline_mode<synchronous>, transform_indices = @transform_0, window_bounds = array<i64: 2, 4096>}, {pipeline_mode = #tpu.pipeline_mode<synchronous>, transform_indices = @transform_1, window_bounds = array<i64: 4096, 120>}, {pipeline_mode = #tpu.pipeline_mode<synchronous>, transform_indices = @transform_2, window_bounds = array<i64: 1, 120>}, {pipeline_mode = #tpu.pipeline_mode<synchronous>, transform_indices = @transform_3, window_bounds = array<i64: 120, 84>}, {pipeline_mode = #tpu.pipeline_mode<synchronous>, transform_indices = @transform_4, window_bounds = array<i64: 1, 84>}, {pipeline_mode = #tpu.pipeline_mode<synchronous>, transform_indices = @transform_5, window_bounds = array<i64: 84, 2>}, {pipeline_mode = #tpu.pipeline_mode<synchronous>, transform_indices = @transform_6, window_bounds = array<i64: 1, 2>}, {pipeline_mode = #tpu.pipeline_mode<synchronous>, transform_indices = @transform_7, window_bounds = array<i64: 2, 2>}]} {
    %c0 = arith.constant 0 : index
    %c0_0 = arith.constant 0 : index
    %0 = vector.load %arg1[%c0, %c0_0] : memref<2x4096xbf16, #tpu.memory_space<vmem>>, vector<2x4096xbf16>
    %c0_1 = arith.constant 0 : index
    %c0_2 = arith.constant 0 : index
    %1 = vector.load %arg2[%c0_1, %c0_2] : memref<4096x120xbf16, #tpu.memory_space<vmem>>, vector<4096x120xbf16>
    %cst = arith.constant dense<0.000000e+00> : vector<2x120xf32>
    %2 = tpu.matmul %0, %1, %cst {dimension_numbers = #tpu.dot_dimension_numbers<[1], [0], [0], [1], [0, 0, 1, 1], [], []>} : vector<2x4096xbf16>, vector<4096x120xbf16>, vector<2x120xf32> -> vector<2x120xf32>
    %c0_3 = arith.constant 0 : index
    %c0_4 = arith.constant 0 : index
    %3 = vector.load %arg3[%c0_3, %c0_4] : memref<1x120xf32, #tpu.memory_space<vmem>>, vector<1x120xf32>
    %4 = vector.broadcast %3 : vector<1x120xf32> to vector<2x120xf32>
    %5 = arith.addf %2, %4 : vector<2x120xf32>
    %cst_5 = arith.constant 0.000000e+00 : f32
    %6 = vector.broadcast %cst_5 : f32 to vector<2x120xf32>
    %7 = arith.maximumf %5, %6 : vector<2x120xf32>
    %8 = arith.truncf %7 : vector<2x120xf32> to vector<2x120xbf16>
    %c0_6 = arith.constant 0 : index
    %c0_7 = arith.constant 0 : index
    %9 = vector.load %arg4[%c0_6, %c0_7] : memref<120x84xbf16, #tpu.memory_space<vmem>>, vector<120x84xbf16>
    %cst_8 = arith.constant dense<0.000000e+00> : vector<2x84xf32>
    %10 = tpu.matmul %8, %9, %cst_8 {dimension_numbers = #tpu.dot_dimension_numbers<[1], [0], [0], [1], [0, 0, 1, 1], [], []>} : vector<2x120xbf16>, vector<120x84xbf16>, vector<2x84xf32> -> vector<2x84xf32>
    %c0_9 = arith.constant 0 : index
    %c0_10 = arith.constant 0 : index
    %11 = vector.load %arg5[%c0_9, %c0_10] : memref<1x84xf32, #tpu.memory_space<vmem>>, vector<1x84xf32>
    %12 = vector.broadcast %11 : vector<1x84xf32> to vector<2x84xf32>
    %13 = arith.addf %10, %12 : vector<2x84xf32>
    %cst_11 = arith.constant 0.000000e+00 : f32
    %14 = vector.broadcast %cst_11 : f32 to vector<2x84xf32>
    %15 = arith.maximumf %13, %14 : vector<2x84xf32>
    %16 = arith.truncf %15 : vector<2x84xf32> to vector<2x84xbf16>
    %c0_12 = arith.constant 0 : index
    %c0_13 = arith.constant 0 : index
    %17 = vector.load %arg6[%c0_12, %c0_13] : memref<84x2xbf16, #tpu.memory_space<vmem>>, vector<84x2xbf16>
    %cst_14 = arith.constant dense<0.000000e+00> : vector<2x2xf32>
    %18 = tpu.matmul %16, %17, %cst_14 {dimension_numbers = #tpu.dot_dimension_numbers<[1], [0], [0], [1], [0, 0, 1, 1], [], []>} : vector<2x84xbf16>, vector<84x2xbf16>, vector<2x2xf32> -> vector<2x2xf32>
    %c0_15 = arith.constant 0 : index
    %c0_16 = arith.constant 0 : index
    %19 = vector.load %arg7[%c0_15, %c0_16] : memref<1x2xf32, #tpu.memory_space<vmem>>, vector<1x2xf32>
    %20 = vector.broadcast %19 : vector<1x2xf32> to vector<2x2xf32>
    %21 = arith.addf %18, %20 : vector<2x2xf32>
    %c0_17 = arith.constant 0 : index
    %c0_18 = arith.constant 0 : index
    %22 = vector.load %arg8[%c0_17, %c0_18] : memref<2x2xf32, #tpu.memory_space<vmem>>, vector<2x2xf32>
    tpu.vector_store %arg8[%c0_17, %c0_18], %21 {strides = array<i32>} : memref<2x2xf32, #tpu.memory_space<vmem>>, vector<2x2xf32>,
    return
  }
  func.func @transform_0(%arg0: i32) -> (i32, i32) {
    %c0_i32 = arith.constant 0 : i32
    %c0_i32_0 = arith.constant 0 : i32
    %c0_i32_1 = arith.constant 0 : i32
    return %c0_i32, %c0_i32_0 : i32, i32
  }
  func.func @transform_1(%arg0: i32) -> (i32, i32) {
    %c0_i32 = arith.constant 0 : i32
    %c0_i32_0 = arith.constant 0 : i32
    %c0_i32_1 = arith.constant 0 : i32
    return %c0_i32, %c0_i32_0 : i32, i32
  }
  func.func @transform_2(%arg0: i32) -> (i32, i32) {
    %c0_i32 = arith.constant 0 : i32
    %c0_i32_0 = arith.constant 0 : i32
    %c0_i32_1 = arith.constant 0 : i32
    return %c0_i32, %c0_i32_0 : i32, i32
  }
  func.func @transform_3(%arg0: i32) -> (i32, i32) {
    %c0_i32 = arith.constant 0 : i32
    %c0_i32_0 = arith.constant 0 : i32
    %c0_i32_1 = arith.constant 0 : i32
    return %c0_i32, %c0_i32_0 : i32, i32
  }
  func.func @transform_4(%arg0: i32) -> (i32, i32) {
    %c0_i32 = arith.constant 0 : i32
    %c0_i32_0 = arith.constant 0 : i32
    %c0_i32_1 = arith.constant 0 : i32
    return %c0_i32, %c0_i32_0 : i32, i32
  }
  func.func @transform_5(%arg0: i32) -> (i32, i32) {
    %c0_i32 = arith.constant 0 : i32
    %c0_i32_0 = arith.constant 0 : i32
    %c0_i32_1 = arith.constant 0 : i32
    return %c0_i32, %c0_i32_0 : i32, i32
  }
  func.func @transform_6(%arg0: i32) -> (i32, i32) {
    %c0_i32 = arith.constant 0 : i32
    %c0_i32_0 = arith.constant 0 : i32
    %c0_i32_1 = arith.constant 0 : i32
    return %c0_i32, %c0_i32_0 : i32, i32
  }
  func.func @transform_7(%arg0: i32) -> (i32, i32) {
    %c0_i32 = arith.constant 0 : i32
    %c0_i32_0 = arith.constant 0 : i32
    %c0_i32_1 = arith.constant 0 : i32
    return %c0_i32, %c0_i32_0 : i32, i32
  }
}

</mosaic_0001>

<bundles_post_ra>
// kernel: lenet_forward.3
= control target key start
LH: loop header
LB: loop body
LE: loop exit
PB: predicated region body
PF: predicated region fallthrough
CT: control target
= control target key end

     0   :  { %s2235_s12 = smov 0   ;;  %s2638_s0 = inlined_call_operand.vmem [shape: bf16[2,75,4096], index: 0, kind: input, shape index: {}]   ;;  %s2639_s1 = inlined_call_operand.vmem [shape: bf16[6,75], index: 1, kind: input, shape index: {}]   ;;  %s2640_s2 = inlined_call_operand.vmem [shape: f32[6,1], index: 2, kind: input, shape index: {}]   ;;  %s2641_s3 = inlined_call_operand.vmem [shape: bf16[2,6,1024], index: 3, kind: output, shape index: {}]  }
   0x1 LB: > { %s1998_s13 = sadd.s32 4294967295, %s2211_s12   ;;  %p2002_p0 = scmp.ge.s32.totalorder %s2211_s12, 1  ;;  %s2211_s12 = sphi %s2235_s12, %s13_s12  }
   0x2   : > { %p137_p1 = scmp.lt.s32.totalorder %s2211_s12, 3 }
   0x4   : > { %p138_p2 = pnand %p2002_p0, %p137_p1 }
   0x5   : > { %p161_p3 = scmp.lt.s32.totalorder (!%p138_p2), %s1998_s13, 1  ;;  %v2213_v0 = vmov (!%p138_p2), 0   ;;  %vm1105_vm0 = vcmask (!%p138_p2), 1044480   ;;  %vm1106_vm1 = vcmask (!%p138_p2), 1045504   ;;  %v2214_v29 = vmov (!%p138_p2), 65535  }
   0x6   : > { %141 = sbr.rel (%p138_p2) target bundleno = 405 (0x195), region = 32  ;;  %1237 = vmatprep.mubr.bf16.mxu0 (!%p138_p2), %v2213_v0  ;;  %1278 = vmatprep.mubr.bf16.mxu1 (!%p138_p2), %v2213_v0  ;;  %v1107_v30 = vsel (!%p138_p2), %vm1105_vm0, 4294967295, %v2214_v29  ;;  %v2291_v58 = vld [vmem:[%s2639_s1] sm:$0x7] (!%p138_p2)  ;;  %vm1101_vm2 = vcmask (!%p138_p2), 613376  }
   0x7   : > { %2204 = vset.pattern.permute.xlu0 (!%p138_p2), %v2213_v0  ;;  %v2274_v38 = vsel (!%p138_p2), %vm1106_vm1, %v1107_v30, 0 }
   0xd   : > { %s2643_s13 = smov (!%p161_p3, %s1998_s13), 1 }
   0xe   : > { %s2193_s14 = smul.u32 1280, %s2643_s13  ;;  %s2188_s22 = sshll.u32 %s2643_s13, 5 }
   0xf   : > { %s2617_s25 = scalar_lea.vmem %s2641_s3, %s2188_s22 }
  0x10   : > { %s2252_s17 = scalar_lea.vmem %s2638_s0, %s2193_s14 }
  0x11   : > { %v173_v1 = vld [vmem:[%s2252_s17] sm:$0xff]  ;;  %v174_v3 = vld [vmem:[%s2252_s17 + $0x8] sm:$0xff]  ;;  %v175_v46 = vld [vmem:[%s2252_s17 + $0x10] sm:$0xff] }
  0x12   : > { %v189_v2 = vld [vmem:[%s2252_s17 + $0x80] sm:$0xff]  ;;  %v190_v5 = vld [vmem:[%s2252_s17 + $0x88] sm:$0xff]  ;;  %v191_v47 = vld [vmem:[%s2252_s17 + $0x90] sm:$0xff] }
  0x13   : > { %v2007_v4 = vcombine.high %v173_v1, %v189_v2  ;;  %v2006_v6 = vcombine.low %v173_v1, %v189_v2  ;;  %v205_v7 = vld [vmem:[%s2252_s17 + $0x100] sm:$0xff]  ;;  %v2009_v9 = vcombine.high %v174_v3, %v190_v5  ;;  %v2008_v10 = vcombine.low %v174_v3, %v190_v5  ;;  %v206_v12 = vld [vmem:[%s2252_s17 + $0x108] sm:$0xff]  ;;  %v176_v48 = vld [vmem:[%s2252_s17 + $0x18] sm:$0xff] }
  0x14   : > { %v221_v8 = vld [vmem:[%s2252_s17 + $0x180] sm:$0xff]  ;;  %v222_v13 = vld [vmem:[%s2252_s17 + $0x188] sm:$0xff]  ;;  %v192_v49 = vld [vmem:[%s2252_s17 + $0x98] sm:$0xff]  ;;  %v2011_v52 = vcombine.high %v175_v46, %v191_v47  ;;  %v2010_v59 = vcombine.low %v175_v46, %v191_v47 }
  0x15   : > { %v2039_v11 = vcombine.high %v205_v7, %v221_v8  ;;  %v237_v14 = vld [vmem:[%s2252_s17 + $0x200] sm:$0xff]  ;;  %1205 = vmatprep.subr.bf16.mxu0 %v2007_v4  ;;  %v2041_v15 = vcombine.high %v206_v12, %v222_v13  ;;  %v238_v17 = vld [vmem:[%s2252_s17 + $0x208] sm:$0xff]  ;;  %1246 = vmatprep.subr.bf16.mxu1 %v2009_v9  ;;  %v2038_v19 = vcombine.low %v205_v7, %v221_v8  ;;  %v207_v54 = vld [vmem:[%s2252_s17 + $0x110] sm:$0xff] }
  0x16   : > { %v253_v16 = vld [vmem:[%s2252_s17 + $0x280] sm:$0xff]  ;;  %v254_v18 = vld [vmem:[%s2252_s17 + $0x288] sm:$0xff]  ;;  %1206 = vmatpush1.bf16.msra.mxu0 %v2006_v6  ;;  %1247 = vmatpush1.bf16.msra.mxu1 %v2008_v10  ;;  %v2040_v20 = vcombine.low %v206_v12, %v222_v13  ;;  %v2013_v53 = vcombine.high %v176_v48, %v192_v49  ;;  %v223_v55 = vld [vmem:[%s2252_s17 + $0x190] sm:$0xff]  ;;  %v2012_v60 = vcombine.low %v176_v48, %v192_v49 }
  0x17   : > { %1207 = vmatprep.subr.bf16.mxu0 %v2039_v11  ;;  %v2071_v21 = vcombine.high %v237_v14, %v253_v16  ;;  %v269_v22 = vld [vmem:[%s2252_s17 + $0x300] sm:$0xff]  ;;  %1248 = vmatprep.subr.bf16.mxu1 %v2041_v15  ;;  %v2073_v24 = vcombine.high %v238_v17, %v254_v18  ;;  %v270_v25 = vld [vmem:[%s2252_s17 + $0x308] sm:$0xff]  ;;  %v2070_v33 = vcombine.low %v237_v14, %v253_v16  ;;  %v208_v56 = vld [vmem:[%s2252_s17 + $0x118] sm:$0xff] }
  0x18   : > { %v285_v23 = vld [vmem:[%s2252_s17 + $0x380] sm:$0xff]  ;;  %v286_v28 = vld [vmem:[%s2252_s17 + $0x388] sm:$0xff]  ;;  %v2072_v34 = vcombine.low %v238_v17, %v254_v18  ;;  %v224_v57 = vld [vmem:[%s2252_s17 + $0x198] sm:$0xff]  ;;  %v2043_v61 = vcombine.high %v207_v54, %v223_v55  ;;  %v2042_v4 = vcombine.low %v207_v54, %v223_v55 }
  0x19   : > { %v301_v26 = vld [vmem:[%s2252_s17 + $0x400] sm:$0xff]  ;;  %v302_v31 = vld [vmem:[%s2252_s17 + $0x408] sm:$0xff]  ;;  %v2103_v35 = vcombine.high %v269_v22, %v285_v23  ;;  %v2105_v37 = vcombine.high %v270_v25, %v286_v28  ;;  %v2102_v40 = vcombine.low %v269_v22, %v285_v23  ;;  %v2104_v42 = vcombine.low %v270_v25, %v286_v28  ;;  %v239_v63 = vld [vmem:[%s2252_s17 + $0x210] sm:$0xff] }
  0x1a   : > { %v317_v27 = vld [vmem:[%s2252_s17 + $0x480] sm:$0x33]  ;;  %v318_v32 = vld [vmem:[%s2252_s17 + $0x488] sm:$0x33]  ;;  %1208 = vmatpush1.bf16.msra.mxu0 %v2038_v19  ;;  %1249 = vmatpush1.bf16.msra.mxu1 %v2040_v20  ;;  %v2045_v62 = vcombine.high %v208_v56, %v224_v57  ;;  %v255_v1 = vld [vmem:[%s2252_s17 + $0x290] sm:$0xff]  ;;  %v2044_v6 = vcombine.low %v208_v56, %v224_v57 }
  0x1b   : > { %1209 = vmatprep.subr.bf16.mxu0 %v2071_v21  ;;  %v2135_v36 = vcombine.high %v301_v26, %v317_v27  ;;  %1250 = vmatprep.subr.bf16.mxu1 %v2073_v24  ;;  %v2137_v39 = vcombine.high %v302_v31, %v318_v32  ;;  %v2134_v41 = vcombine.low %v301_v26, %v317_v27  ;;  %v240_v2 = vld [vmem:[%s2252_s17 + $0x218] sm:$0xff]  ;;  %v271_v5 = vld [vmem:[%s2252_s17 + $0x310] sm:$0xff]  ;;  %v309_v29 = vld [vmem:[%s2252_s17 + $0x440] sm:$0xff] }
  0x1c   : > { %v2136_v44 = vcombine.low %v302_v31, %v318_v32  ;;  %v256_v3 = vld [vmem:[%s2252_s17 + $0x298] sm:$0xff]  ;;  %v2075_v7 = vcombine.high %v239_v63, %v255_v1  ;;  %v287_v8 = vld [vmem:[%s2252_s17 + $0x390] sm:$0xff]  ;;  %v2074_v19 = vcombine.low %v239_v63, %v255_v1  ;;  %v325_v30 = vld [vmem:[%s2252_s17 + $0x4c0] sm:$0x33] }
  0x1d   : > { %v1113_v43 = vand.u32 %v2135_v36, %v2274_v38  ;;  %v1119_v45 = vand.u32 %v2137_v39, %v2274_v38  ;;  %v1110_v50 = vand.u32 %v2134_v41, %v2274_v38  ;;  %v272_v9 = vld [vmem:[%s2252_s17 + $0x318] sm:$0xff]  ;;  %v303_v10 = vld [vmem:[%s2252_s17 + $0x410] sm:$0xff]  ;;  %v2077_v11 = vcombine.high %v240_v2, %v256_v3  ;;  %v310_v31 = vld [vmem:[%s2252_s17 + $0x448] sm:$0xff] }
  0x1e   : > { %1210 = vmatpush1.bf16.msra.mxu0 %v2070_v33  ;;  %1251 = vmatpush1.bf16.msra.mxu1 %v2072_v34  ;;  %v1116_v51 = vand.u32 %v2136_v44, %v2274_v38  ;;  %v319_v12 = vld [vmem:[%s2252_s17 + $0x490] sm:$0x33]  ;;  %v2308_v13 = vld [vmem:[%s2252_s17 + $0x438] sm:$0xff]  ;;  %v2076_v20 = vcombine.low %v240_v2, %v256_v3  ;;  %v2107_v21 = vcombine.high %v271_v5, %v287_v8  ;;  %v193_v39 = vld [vmem:[%s2252_s17 + $0xa0] sm:$0xff] }
  0x1f   : > { %1211 = vmatprep.subr.bf16.mxu0 %v2103_v35  ;;  %1252 = vmatprep.subr.bf16.mxu1 %v2105_v37  ;;  %v2311_v14 = vld [vmem:[%s2252_s17 + $0x4b8] sm:$0x33]  ;;  %v2139_v22 = vcombine.high %v303_v10, %v319_v12  ;;  %v2106_v26 = vcombine.low %v271_v5, %v287_v8  ;;  %v2138_v28 = vcombine.low %v303_v10, %v319_v12  ;;  %v326_v35 = vld [vmem:[%s2252_s17 + $0x4c8] sm:$0x33]  ;;  %v177_v37 = vld [vmem:[%s2252_s17 + $0x20] sm:$0xff] }
  0x20   : > { %v288_v15 = vld [vmem:[%s2252_s17 + $0x398] sm:$0xff]  ;;  %v2148_v18 = vcombine.low %v2308_v13, %v2311_v14  ;;  %v2150_v34 = vcombine.low %v309_v29, %v325_v30  ;;  %v2152_v41 = vcombine.low %v310_v31, %v326_v35  ;;  %v194_v44 = vld [vmem:[%s2252_s17 + $0xa8] sm:$0xff]  ;;  %v311_v57 = vld [vmem:[%s2252_s17 + $0x450] sm:$0xff] }
  0x21   : > { %v304_v16 = vld [vmem:[%s2252_s17 + $0x418] sm:$0xff]  ;;  %v2109_v24 = vcombine.high %v272_v9, %v288_v15  ;;  %v2108_v27 = vcombine.low %v272_v9, %v288_v15  ;;  %v1125_v32 = vand.u32 %v2139_v22, %v2274_v38  ;;  %v1122_v46 = vand.u32 %v2138_v28, %v2274_v38  ;;  %v210_v55 = vld [vmem:[%s2252_s17 + $0x128] sm:$0xff]  ;;  %v257_v8 = vld [vmem:[%s2252_s17 + $0x2a0] sm:$0xff] }
  0x22   : > { %1212 = vmatpush1.bf16.msra.mxu0 %v2102_v40  ;;  %1253 = vmatpush1.bf16.msra.mxu1 %v2104_v42  ;;  %v320_v17 = vld [vmem:[%s2252_s17 + $0x498] sm:$0x33]  ;;  %v2320_v23 = vand.u32 %v2148_v18, %v2274_v38  ;;  %v2151_v40 = vcombine.high %v309_v29, %v325_v30  ;;  %v2153_v42 = vcombine.high %v310_v31, %v326_v35  ;;  %v226_v56 = vld [vmem:[%s2252_s17 + $0x1a8] sm:$0xff]  ;;  %v2376_v18 = vld [vmem:[%s2252_s17 + $0x3a0] sm:$0xff] }
  0x23   : > { %1213 = vmatprep.subr.bf16.mxu0 %v1113_v43  ;;  %1254 = vmatprep.subr.bf16.mxu1 %v1119_v45  ;;  %v2141_v25 = vcombine.high %v304_v16, %v320_v17  ;;  %v2140_v33 = vcombine.low %v304_v16, %v320_v17  ;;  %v178_v43 = vld [vmem:[%s2252_s17 + $0x28] sm:$0xff]  ;;  %v2333_v45 = vand.u32 %v2150_v34, %v2274_v38  ;;  %v2373_v17 = vld [vmem:[%s2252_s17 + $0x320] sm:$0xff] }
  0x24   : > { %v2337_v47 = vand.u32 %v2151_v40, %v2274_v38  ;;  %v2340_v48 = vand.u32 %v2153_v42, %v2274_v38  ;;  %v2343_v49 = vand.u32 %v2152_v41, %v2274_v38  ;;  %v2017_v54 = vcombine.high %v178_v43, %v194_v44  ;;  %v242_v9 = vld [vmem:[%s2252_s17 + $0x228] sm:$0xff]  ;;  %v329_v28 = vld [vmem:[%s2252_s17 + $0x4e0] sm:$0x33] }
  0x25   : > { %v1131_v36 = vand.u32 %v2141_v25, %v2274_v38  ;;  %v258_v16 = vld [vmem:[%s2252_s17 + $0x2a8] sm:$0xff]  ;;  %v2111_v40 = vcombine.high %v2373_v17, %v2376_v18 }
  0x26   : > { %1214 = vmatpush1.bf16.msra.mxu0 %v1110_v50  ;;  %1255 = vmatpush1.bf16.msra.mxu1 %v1116_v51  ;;  %v1128_v50 = vand.u32 %v2140_v33, %v2274_v38  ;;  %v2015_v51 = vcombine.high %v177_v37, %v193_v39  ;;  %v2385_v22 = vld [vmem:[%s2252_s17 + $0x428] sm:$0xff]  ;;  %v2081_v30 = vcombine.high %v242_v9, %v258_v16 }
  0x27   : > { %1287 = vmatprep.subr.bf16.mxu0 %v2011_v52  ;;  %1328 = vmatprep.subr.bf16.mxu1 %v2013_v53  ;;  %v209_v52 = vld [vmem:[%s2252_s17 + $0x120] sm:$0xff]  ;;  %v314_v31 = vld [vmem:[%s2252_s17 + $0x468] sm:$0xff]  ;;  %v2080_v33 = vcombine.low %v242_v9, %v258_v16  ;;  %v196_v9 = vld [vmem:[%s2252_s17 + $0xb8] sm:$0xff] }
  0x28   : > { %v225_v53 = vld [vmem:[%s2252_s17 + $0x1a0] sm:$0xff]  ;;  %v274_v34 = vld [vmem:[%s2252_s17 + $0x328] sm:$0xff] }
  0x29   : > { %2166 = vmatmul.mubr.msk.bf16.vlgmr.msra.gmra.mrb[0].mxu0 %vm1101_vm2, %v2291_v58  ;;  %2167 = vmatmul.mubr.msk.bf16.vlgmr.msra.gmra.mrb[0].mxu1 %vm1101_vm2, %v2291_v58  ;;  %v2047_v5 = vcombine.high %v209_v52, %v225_v53  ;;  %v290_v35 = vld [vmem:[%s2252_s17 + $0x3a8] sm:$0xff] }
  0x2a   : > { %1288 = vmatpush1.bf16.msra.mxu0 %v2010_v59  ;;  %1329 = vmatpush1.bf16.msra.mxu1 %v2012_v60  ;;  %v2014_v59 = vcombine.low %v177_v37, %v193_v39  ;;  %v327_v60 = vld [vmem:[%s2252_s17 + $0x4d0] sm:$0x33] }
  0x2b   : > { %1289 = vmatprep.subr.bf16.mxu0 %v2043_v61  ;;  %1330 = vmatprep.subr.bf16.mxu1 %v2045_v62  ;;  %v312_v61 = vld [vmem:[%s2252_s17 + $0x458] sm:$0xff]  ;;  %v2154_v63 = vcombine.low %v311_v57, %v327_v60  ;;  %v2155_v1 = vcombine.high %v311_v57, %v327_v60  ;;  %v315_v57 = vld [vmem:[%s2252_s17 + $0x470] sm:$0xff] }
  0x2c   : > { %1319 = vmatprep.mubr.bf16.mxu0 %v2213_v0  ;;  %1360 = vmatprep.mubr.bf16.mxu1 %v2213_v0  ;;  %v328_v62 = vld [vmem:[%s2252_s17 + $0x4d8] sm:$0x33] }
  0x2d   : > { %v2156_v2 = vcombine.low %v312_v61, %v328_v62  ;;  %v2157_v3 = vcombine.high %v312_v61, %v328_v62  ;;  %v2358_v10 = vand.u32 %v2155_v1, %v2274_v38  ;;  %v2364_v12 = vand.u32 %v2154_v63, %v2274_v38  ;;  %v316_v60 = vld [vmem:[%s2252_s17 + $0x478] sm:$0xff] }
  0x2e   : > { %1290 = vmatpush1.bf16.msra.mxu0 %v2042_v4  ;;  %1331 = vmatpush1.bf16.msra.mxu1 %v2044_v6  ;;  %v2016_v4 = vcombine.low %v178_v43, %v194_v44  ;;  %v2049_v6 = vcombine.high %v210_v55, %v226_v56  ;;  %v332_v1 = vld [vmem:[%s2252_s17 + $0x4f8] sm:$0x33] }
  0x2f   : > { %1291 = vmatprep.subr.bf16.mxu0 %v2075_v7  ;;  %1332 = vmatprep.subr.bf16.mxu1 %v2077_v11  ;;  %v241_v7 = vld [vmem:[%s2252_s17 + $0x220] sm:$0xff]  ;;  %v2361_v11 = vand.u32 %v2157_v3, %v2274_v38  ;;  %v2367_v15 = vand.u32 %v2156_v2, %v2274_v38  ;;  %v179_v3 = vld [vmem:[%s2252_s17 + $0x30] sm:$0xff] }
  0x30   : > { %v2079_v25 = vcombine.high %v241_v7, %v257_v8  ;;  %v2078_v29 = vcombine.low %v241_v7, %v257_v8  ;;  %v1885_v2 = vld [vmem:[%s2640_s2] sm:$0x3f]  ;;  %v2165_v7 = vcombine.high %v316_v60, %v332_v1  ;;  %v180_v8 = vld [vmem:[%s2252_s17 + $0x38] sm:$0xff] }
  0x31   : > { %1888 = vperm.xlu0 %2204, %v1885_v2  }
  0x32   : > { %1292 = vmatpush1.bf16.msra.mxu0 %v2074_v19  ;;  %1333 = vmatpush1.bf16.msra.mxu1 %v2076_v20  ;;  %v2046_v19 = vcombine.low %v209_v52, %v225_v53  ;;  %v2381_v20 = vld [vmem:[%s2252_s17 + $0x420] sm:$0xff]  ;;  %v2110_v53 = vcombine.low %v2373_v17, %v2376_v18 }
  0x33   : > { %1293 = vmatprep.subr.bf16.mxu0 %v2107_v21  ;;  %1334 = vmatprep.subr.bf16.mxu1 %v2109_v24  ;;  %v321_v21 = vld [vmem:[%s2252_s17 + $0x4a0] sm:$0x33]  ;;  %v2048_v24 = vcombine.low %v210_v55, %v226_v56 }
  0x34   : > { %v2143_v41 = vcombine.high %v2381_v20, %v321_v21  ;;  %v2142_v55 = vcombine.low %v2381_v20, %v321_v21 }
  0x36   : > { %1294 = vmatpush1.bf16.msra.mxu0 %v2106_v26  ;;  %1335 = vmatpush1.bf16.msra.mxu1 %v2108_v27  ;;  %v322_v26 = vld [vmem:[%s2252_s17 + $0x4a8] sm:$0x33]  ;;  %v313_v27 = vld [vmem:[%s2252_s17 + $0x460] sm:$0xff]  ;;  %v1137_v61 = vand.u32 %v2143_v41, %v2274_v38  ;;  %v1134_v17 = vand.u32 %v2142_v55, %v2274_v38  ;;  %v275_v41 = vld [vmem:[%s2252_s17 + $0x330] sm:$0xff] }
  0x37   : > { %1295 = vmatprep.subr.bf16.mxu0 %v1125_v32  ;;  %1336 = vmatprep.subr.bf16.mxu1 %v1131_v36  ;;  %v330_v32 = vld [vmem:[%s2252_s17 + $0x4e8] sm:$0x33]  ;;  %v2158_v36 = vcombine.low %v313_v27, %v329_v28  ;;  %v2159_v37 = vcombine.high %v313_v27, %v329_v28  ;;  %v2145_v42 = vcombine.high %v2385_v22, %v322_v26  ;;  %v212_v27 = vld [vmem:[%s2252_s17 + $0x138] sm:$0xff] }
  0x38   : > { %v2160_v39 = vcombine.low %v314_v31, %v330_v32  ;;  %v2161_v43 = vcombine.high %v314_v31, %v330_v32  ;;  %v2144_v56 = vcombine.low %v2385_v22, %v322_v26  ;;  %v227_v26 = vld [vmem:[%s2252_s17 + $0x1b0] sm:$0xff]  ;;  %v228_v28 = vld [vmem:[%s2252_s17 + $0x1b8] sm:$0xff] }
  0x39   : > { %v2401_v44 = vand.u32 %v2159_v37, %v2274_v38  ;;  %v1143_v62 = vand.u32 %v2145_v42, %v2274_v38  ;;  %v2053_v32 = vcombine.high %v212_v27, %v228_v28  ;;  %v292_v55 = vld [vmem:[%s2252_s17 + $0x3b8] sm:$0xff] }
  0x3a   : > { %1296 = vmatpush1.bf16.msra.mxu0 %v1122_v46  ;;  %1337 = vmatpush1.bf16.msra.mxu1 %v1128_v50  ;;  %v2404_v46 = vand.u32 %v2158_v36, %v2274_v38  ;;  %v2407_v50 = vand.u32 %v2160_v39, %v2274_v38  ;;  %v2410_v52 = vand.u32 %v2161_v43, %v2274_v38  ;;  %v260_v36 = vld [vmem:[%s2252_s17 + $0x2b8] sm:$0xff]  ;;  %v291_v43 = vld [vmem:[%s2252_s17 + $0x3b0] sm:$0xff] }
  0x3b   : > { %1369 = vmatprep.subr.bf16.mxu0 %v2015_v51  ;;  %1410 = vmatprep.subr.bf16.mxu1 %v2017_v54  ;;  %v2113_v51 = vcombine.high %v274_v34, %v290_v35  ;;  %v2112_v54 = vcombine.low %v274_v34, %v290_v35  ;;  %v1140_v21 = vand.u32 %v2144_v56, %v2274_v38  ;;  %v259_v34 = vld [vmem:[%s2252_s17 + $0x2b0] sm:$0xff]  ;;  %v244_v35 = vld [vmem:[%s2252_s17 + $0x238] sm:$0xff] }
  0x3c   : > { %v2052_v39 = vcombine.low %v212_v27, %v228_v28  ;;  %v2085_v42 = vcombine.high %v244_v35, %v260_v36  ;;  %v245_v28 = vld [vmem:[%s2252_s17 + $0x240] sm:$0xff] }
  0x3d   : > { %2168 = vmatmul.mubr.msk.bf16.vlgmr.msra.gmra.mrb[4].mxu0 %vm1101_vm2, %v2291_v58  ;;  %2169 = vmatmul.mubr.msk.bf16.vlgmr.msra.gmra.mrb[4].mxu1 %vm1101_vm2, %v2291_v58 }
  0x3e   : > { %1370 = vmatpush1.bf16.msra.mxu0 %v2014_v59  ;;  %1411 = vmatpush1.bf16.msra.mxu1 %v2016_v4  ;;  %v331_v59 = vld [vmem:[%s2252_s17 + $0x4f0] sm:$0x33] }
  0x3f   : > { %1371 = vmatprep.subr.bf16.mxu0 %v2047_v5  ;;  %1412 = vmatprep.subr.bf16.mxu1 %v2049_v6  ;;  %v2162_v63 = vcombine.low %v315_v57, %v331_v59  ;;  %v195_v4 = vld [vmem:[%s2252_s17 + $0xb0] sm:$0xff]  ;;  %v2163_v5 = vcombine.high %v315_v57, %v331_v59  ;;  %v2164_v6 = vcombine.low %v316_v60, %v332_v1 }
  0x40   : > { %1401 = vmatprep.mubr.bf16.mxu0 %v2213_v0  ;;  %1442 = vmatprep.mubr.bf16.mxu1 %v2213_v0  ;;  %v2019_v22 = vcombine.high %v179_v3, %v195_v4  ;;  %v2084_v57 = vcombine.low %v244_v35, %v260_v36  ;;  %v2115_v59 = vcombine.high %v275_v41, %v291_v43  ;;  %v277_v35 = vld [vmem:[%s2252_s17 + $0x340] sm:$0xff] }
  0x41   : > { %v2430_v16 = vand.u32 %v2162_v63, %v2274_v38  ;;  %v2434_v18 = vand.u32 %v2163_v5, %v2274_v38  ;;  %v2440_v20 = vand.u32 %v2164_v6, %v2274_v38  ;;  %v2114_v63 = vcombine.low %v275_v41, %v291_v43  ;;  %v181_v5 = vld [vmem:[%s2252_s17 + $0x40] sm:$0xff] }
  0x42   : > { %1372 = vmatpush1.bf16.msra.mxu0 %v2046_v19  ;;  %1413 = vmatpush1.bf16.msra.mxu1 %v2048_v24  ;;  %v2437_v19 = vand.u32 %v2165_v7, %v2274_v38  ;;  %v2021_v24 = vcombine.high %v180_v8, %v196_v9  ;;  %v197_v6 = vld [vmem:[%s2252_s17 + $0xc0] sm:$0xff]  ;;  %v182_v7 = vld [vmem:[%s2252_s17 + $0x48] sm:$0xff] }
  0x43   : > { %1373 = vmatprep.subr.bf16.mxu0 %v2079_v25  ;;  %1414 = vmatprep.subr.bf16.mxu1 %v2081_v30  ;;  %v211_v25 = vld [vmem:[%s2252_s17 + $0x130] sm:$0xff]  ;;  %v2020_v30 = vcombine.low %v180_v8, %v196_v9  ;;  %v198_v8 = vld [vmem:[%s2252_s17 + $0xc8] sm:$0xff]  ;;  %v293_v36 = vld [vmem:[%s2252_s17 + $0x3c0] sm:$0xff] }
  0x44   : > { %v2051_v31 = vcombine.high %v211_v25, %v227_v26  ;;  %v2050_v37 = vcombine.low %v211_v25, %v227_v26  ;;  %v2025_v9 = vcombine.high %v182_v7, %v198_v8  ;;  %v2022_v25 = vcombine.low %v181_v5, %v197_v6 }
  0x45   : > { %v2024_v26 = vcombine.low %v182_v7, %v198_v8  ;;  %v264_v7 = vld [vmem:[%s2252_s17 + $0x2d8] sm:$0xff] }
  0x46   : > { %1374 = vmatpush1.bf16.msra.mxu0 %v2078_v29  ;;  %1415 = vmatpush1.bf16.msra.mxu1 %v2080_v33  ;;  %v2018_v29 = vcombine.low %v179_v3, %v195_v4  ;;  %v243_v33 = vld [vmem:[%s2252_s17 + $0x230] sm:$0xff] }
  0x47   : > { %1375 = vmatprep.subr.bf16.mxu0 %v2111_v40  ;;  %1416 = vmatprep.subr.bf16.mxu1 %v2113_v51  ;;  %v2083_v40 = vcombine.high %v243_v33, %v259_v34  ;;  %v307_v51 = vld [vmem:[%s2252_s17 + $0x430] sm:$0xff]  ;;  %v2082_v56 = vcombine.low %v243_v33, %v259_v34 }
  0x4a   : > { %1376 = vmatpush1.bf16.msra.mxu0 %v2110_v53  ;;  %1417 = vmatpush1.bf16.msra.mxu1 %v2112_v54  ;;  %v323_v53 = vld [vmem:[%s2252_s17 + $0x4b0] sm:$0x33]  ;;  %v276_v54 = vld [vmem:[%s2252_s17 + $0x338] sm:$0xff] }
  0x4b   : > { %1377 = vmatprep.subr.bf16.mxu0 %v1137_v61  ;;  %1418 = vmatprep.subr.bf16.mxu1 %v1143_v62  ;;  %v2147_v60 = vcombine.high %v307_v51, %v323_v53  ;;  %v2117_v61 = vcombine.high %v276_v54, %v292_v55  ;;  %v2149_v62 = vcombine.high %v2308_v13, %v2311_v14 }
  0x4c   : > { %v2146_v1 = vcombine.low %v307_v51, %v323_v53  ;;  %v2116_v2 = vcombine.low %v276_v54, %v292_v55  ;;  %v2023_v14 = vcombine.high %v181_v5, %v197_v6  ;;  %v2118_v51 = vcombine.low %v277_v35, %v293_v36  ;;  %v183_v54 = vld [vmem:[%s2252_s17 + $0x50] sm:$0xff]  ;;  %v248_v6 = vld [vmem:[%s2252_s17 + $0x258] sm:$0xff] }
  0x4d   : > { %v1149_v3 = vand.u32 %v2147_v60, %v2274_v38  ;;  %v1155_v4 = vand.u32 %v2149_v62, %v2274_v38  ;;  %v199_v55 = vld [vmem:[%s2252_s17 + $0xd0] sm:$0xff] }
  0x4e   : > { %1378 = vmatpush1.bf16.msra.mxu0 %v1134_v17  ;;  %1419 = vmatpush1.bf16.msra.mxu1 %v1140_v21  ;;  %v1146_v13 = vand.u32 %v2146_v1, %v2274_v38  ;;  %v213_v17 = vld [vmem:[%s2252_s17 + $0x140] sm:$0xff]  ;;  %v231_v62 = vld [vmem:[%s2252_s17 + $0x1d0] sm:$0xff]  ;;  %v232_v1 = vld [vmem:[%s2252_s17 + $0x1d8] sm:$0xff] }
  0x4f   : > { %1451 = vmatprep.subr.bf16.mxu0 %v2019_v22  ;;  %1492 = vmatprep.subr.bf16.mxu1 %v2021_v24  ;;  %v229_v21 = vld [vmem:[%s2252_s17 + $0x1c0] sm:$0xff]  ;;  %v214_v22 = vld [vmem:[%s2252_s17 + $0x148] sm:$0xff]  ;;  %v263_v5 = vld [vmem:[%s2252_s17 + $0x2d0] sm:$0xff] }
  0x50   : > { %v230_v24 = vld [vmem:[%s2252_s17 + $0x1c8] sm:$0xff]  ;;  %v2055_v38 = vcombine.high %v213_v17, %v229_v21 }
  0x51   : > { %2170 = vmatmul.mubr.msk.bf16.vlgmr.msra.gmra.mrb[8].mxu0 %vm1101_vm2, %v2291_v58  ;;  %2171 = vmatmul.mubr.msk.bf16.vlgmr.msra.gmra.mrb[8].mxu1 %vm1101_vm2, %v2291_v58  ;;  %v2057_v27 = vcombine.high %v214_v22, %v230_v24 }
  0x52   : > { %1452 = vmatpush1.bf16.msra.mxu0 %v2018_v29  ;;  %1493 = vmatpush1.bf16.msra.mxu1 %v2020_v30  ;;  %v261_v29 = vld [vmem:[%s2252_s17 + $0x2c0] sm:$0xff]  ;;  %v246_v30 = vld [vmem:[%s2252_s17 + $0x248] sm:$0xff] }
  0x53   : > { %1453 = vmatprep.subr.bf16.mxu0 %v2051_v31  ;;  %1494 = vmatprep.subr.bf16.mxu1 %v2053_v32  ;;  %v262_v31 = vld [vmem:[%s2252_s17 + $0x2c8] sm:$0xff]  ;;  %v2056_v32 = vcombine.low %v214_v22, %v230_v24  ;;  %v2087_v33 = vcombine.high %v245_v28, %v261_v29  ;;  %v2092_v24 = vcombine.low %v248_v6, %v264_v7 }
  0x54   : > { %1483 = vmatprep.mubr.bf16.mxu0 %v2213_v0  ;;  %1524 = vmatprep.mubr.bf16.mxu1 %v2213_v0  ;;  %v2089_v34 = vcombine.high %v246_v30, %v262_v31  ;;  %v2088_v41 = vcombine.low %v246_v30, %v262_v31  ;;  %v186_v30 = vld [vmem:[%s2252_s17 + $0x68] sm:$0xff] }
  0x55   : > { %v202_v31 = vld [vmem:[%s2252_s17 + $0xe8] sm:$0xff] }
  0x56   : > { %1454 = vmatpush1.bf16.msra.mxu0 %v2050_v37  ;;  %1495 = vmatpush1.bf16.msra.mxu1 %v2052_v39  ;;  %v278_v37 = vld [vmem:[%s2252_s17 + $0x348] sm:$0xff] }
  0x57   : > { %1455 = vmatprep.subr.bf16.mxu0 %v2083_v40  ;;  %1496 = vmatprep.subr.bf16.mxu1 %v2085_v42  ;;  %v294_v39 = vld [vmem:[%s2252_s17 + $0x3c8] sm:$0xff]  ;;  %v2086_v40 = vcombine.low %v245_v28, %v261_v29  ;;  %v2119_v42 = vcombine.high %v277_v35, %v293_v36  ;;  %v185_v28 = vld [vmem:[%s2252_s17 + $0x60] sm:$0xff] }
  0x58   : > { %v2121_v43 = vcombine.high %v278_v37, %v294_v39  ;;  %v2120_v53 = vcombine.low %v278_v37, %v294_v39  ;;  %v201_v29 = vld [vmem:[%s2252_s17 + $0xe0] sm:$0xff]  ;;  %v218_v35 = vld [vmem:[%s2252_s17 + $0x168] sm:$0xff]  ;;  %v2032_v39 = vcombine.low %v186_v30, %v202_v31 }
  0x59   : > { %v234_v36 = vld [vmem:[%s2252_s17 + $0x1e8] sm:$0xff]  ;;  %v2030_v37 = vcombine.low %v185_v28, %v201_v29 }
  0x5a   : > { %1456 = vmatpush1.bf16.msra.mxu0 %v2082_v56  ;;  %1497 = vmatpush1.bf16.msra.mxu1 %v2084_v57  ;;  %v184_v56 = vld [vmem:[%s2252_s17 + $0x58] sm:$0xff] }
  0x5b   : > { %1457 = vmatprep.subr.bf16.mxu0 %v2115_v59  ;;  %1498 = vmatprep.subr.bf16.mxu1 %v2117_v61  ;;  %v200_v57 = vld [vmem:[%s2252_s17 + $0xd8] sm:$0xff]  ;;  %v2027_v59 = vcombine.high %v183_v54, %v199_v55  ;;  %v215_v61 = vld [vmem:[%s2252_s17 + $0x150] sm:$0xff] }
  0x5c   : > { %v2029_v60 = vcombine.high %v184_v56, %v200_v57 }
  0x5e   : > { %1458 = vmatpush1.bf16.msra.mxu0 %v2114_v63  ;;  %1499 = vmatpush1.bf16.msra.mxu1 %v2116_v2  ;;  %v216_v63 = vld [vmem:[%s2252_s17 + $0x158] sm:$0xff]  ;;  %v2026_v2 = vcombine.low %v183_v54, %v199_v55  ;;  %v281_v54 = vld [vmem:[%s2252_s17 + $0x360] sm:$0xff] }
  0x5f   : > { %1459 = vmatprep.subr.bf16.mxu0 %v1149_v3  ;;  %1500 = vmatprep.subr.bf16.mxu1 %v1155_v4  ;;  %v2028_v3 = vcombine.low %v184_v56, %v200_v57  ;;  %v2061_v4 = vcombine.high %v216_v63, %v232_v1  ;;  %v297_v55 = vld [vmem:[%s2252_s17 + $0x3e0] sm:$0xff]  ;;  %v282_v56 = vld [vmem:[%s2252_s17 + $0x368] sm:$0xff] }
  0x60   : > { %v298_v57 = vld [vmem:[%s2252_s17 + $0x3e8] sm:$0xff] }
  0x62   : > { %1460 = vmatpush1.bf16.msra.mxu0 %v1146_v13  ;;  %1501 = vmatpush1.bf16.msra.mxu1 %v2320_v23  ;;  %v2054_v23 = vcombine.low %v213_v17, %v229_v21  ;;  %v2093_v13 = vcombine.high %v248_v6, %v264_v7  ;;  %v280_v17 = vld [vmem:[%s2252_s17 + $0x358] sm:$0xff]  ;;  %v219_v6 = vld [vmem:[%s2252_s17 + $0x170] sm:$0xff] }
  0x63   : > { %1533 = vmatprep.subr.bf16.mxu0 %v2023_v14  ;;  %1574 = vmatprep.subr.bf16.mxu1 %v2025_v9  ;;  %v279_v14 = vld [vmem:[%s2252_s17 + $0x350] sm:$0xff]  ;;  %v296_v21 = vld [vmem:[%s2252_s17 + $0x3d8] sm:$0xff] }
  0x64   : > { %v295_v9 = vld [vmem:[%s2252_s17 + $0x3d0] sm:$0xff] }
  0x65   : > { %2172 = vmatmul.mubr.msk.bf16.vlgmr.msra.gmra.mrb[12].mxu0 %vm1101_vm2, %v2291_v58  ;;  %2173 = vmatmul.mubr.msk.bf16.vlgmr.msra.gmra.mrb[12].mxu1 %vm1101_vm2, %v2291_v58  ;;  %v235_v7 = vld [vmem:[%s2252_s17 + $0x1f0] sm:$0xff] }
  0x66   : > { %1534 = vmatpush1.bf16.msra.mxu0 %v2022_v25  ;;  %1575 = vmatpush1.bf16.msra.mxu1 %v2024_v26  ;;  %v2123_v25 = vcombine.high %v279_v14, %v295_v9  ;;  %v2125_v26 = vcombine.high %v280_v17, %v296_v21 }
  0x67   : > { %1535 = vmatprep.subr.bf16.mxu0 %v2055_v38  ;;  %1576 = vmatprep.subr.bf16.mxu1 %v2057_v27  ;;  %v2122_v38 = vcombine.low %v279_v14, %v295_v9  ;;  %v2124_v27 = vcombine.low %v280_v17, %v296_v21  ;;  %v267_v9 = vld [vmem:[%s2252_s17 + $0x2f0] sm:$0xff]  ;;  %v252_v17 = vld [vmem:[%s2252_s17 + $0x278] sm:$0xff] }
  0x68   : > { %1565 = vmatprep.mubr.bf16.mxu0 %v2213_v0  ;;  %1606 = vmatprep.mubr.bf16.mxu1 %v2213_v0  ;;  %v268_v21 = vld [vmem:[%s2252_s17 + $0x2f8] sm:$0xff] }
  0x6a   : > { %1536 = vmatpush1.bf16.msra.mxu0 %v2054_v23  ;;  %1577 = vmatpush1.bf16.msra.mxu1 %v2056_v32  ;;  %v2031_v23 = vcombine.high %v185_v28, %v201_v29  ;;  %v2033_v32 = vcombine.high %v186_v30, %v202_v31  ;;  %v2100_v29 = vcombine.low %v252_v17, %v268_v21 }
  0x6b   : > { %1537 = vmatprep.subr.bf16.mxu0 %v2087_v33  ;;  %1578 = vmatprep.subr.bf16.mxu1 %v2089_v34  ;;  %v217_v33 = vld [vmem:[%s2252_s17 + $0x160] sm:$0xff] }
  0x6c   : > { %v233_v34 = vld [vmem:[%s2252_s17 + $0x1e0] sm:$0xff] }
  0x6e   : > { %1538 = vmatpush1.bf16.msra.mxu0 %v2086_v40  ;;  %1579 = vmatpush1.bf16.msra.mxu1 %v2088_v41  ;;  %v2065_v40 = vcombine.high %v218_v35, %v234_v36  ;;  %v265_v41 = vld [vmem:[%s2252_s17 + $0x2e0] sm:$0xff] }
  0x6f   : > { %1539 = vmatprep.subr.bf16.mxu0 %v2119_v42  ;;  %1580 = vmatprep.subr.bf16.mxu1 %v2121_v43  ;;  %v250_v42 = vld [vmem:[%s2252_s17 + $0x268] sm:$0xff] }
  0x70   : > { %v266_v43 = vld [vmem:[%s2252_s17 + $0x2e8] sm:$0xff] }
  0x72   : > { %1540 = vmatpush1.bf16.msra.mxu0 %v2118_v51  ;;  %1581 = vmatpush1.bf16.msra.mxu1 %v2120_v53  ;;  %v2097_v53 = vcombine.high %v250_v42, %v266_v43 }
  0x73   : > { %1541 = vmatprep.subr.bf16.mxu0 %v2337_v47  ;;  %1582 = vmatprep.subr.bf16.mxu1 %v2340_v48  ;;  %v2059_v47 = vcombine.high %v215_v61, %v231_v62  ;;  %v247_v48 = vld [vmem:[%s2252_s17 + $0x250] sm:$0xff] }
  0x74   : > { %v2091_v8 = vcombine.high %v247_v48, %v263_v5  ;;  %v2090_v22 = vcombine.low %v247_v48, %v263_v5 }
  0x76   : > { %1542 = vmatpush1.bf16.msra.mxu0 %v2333_v45  ;;  %1583 = vmatpush1.bf16.msra.mxu1 %v2343_v49  ;;  %v2058_v45 = vcombine.low %v215_v61, %v231_v62  ;;  %v2060_v49 = vcombine.low %v216_v63, %v232_v1  ;;  %v2127_v61 = vcombine.high %v281_v54, %v297_v55 }
  0x77   : > { %1615 = vmatprep.subr.bf16.mxu0 %v2027_v59  ;;  %1656 = vmatprep.subr.bf16.mxu1 %v2029_v60  ;;  %v2096_v60 = vcombine.low %v250_v42, %v266_v43  ;;  %v2129_v62 = vcombine.high %v282_v56, %v298_v57  ;;  %v2126_v63 = vcombine.low %v281_v54, %v297_v55 }
  0x78   : > { %v2128_v1 = vcombine.low %v282_v56, %v298_v57 }
  0x79   : > { %2174 = vmatmul.mubr.msk.bf16.vlgmr.msra.gmra.mrb[16].mxu0 %vm1101_vm2, %v2291_v58  ;;  %2175 = vmatmul.mubr.msk.bf16.vlgmr.msra.gmra.mrb[16].mxu1 %vm1101_vm2, %v2291_v58 }
  0x7a   : > { %1616 = vmatpush1.bf16.msra.mxu0 %v2026_v2  ;;  %1657 = vmatpush1.bf16.msra.mxu1 %v2028_v3  ;;  %v187_v2 = vld [vmem:[%s2252_s17 + $0x70] sm:$0xff] }
  0x7b   : > { %1617 = vmatprep.subr.bf16.mxu0 %v2059_v47  ;;  %1658 = vmatprep.subr.bf16.mxu1 %v2061_v4  ;;  %v203_v3 = vld [vmem:[%s2252_s17 + $0xf0] sm:$0xff]  ;;  %v188_v47 = vld [vmem:[%s2252_s17 + $0x78] sm:$0xff] }
  0x7c   : > { %1647 = vmatprep.mubr.bf16.mxu0 %v2213_v0  ;;  %1688 = vmatprep.mubr.bf16.mxu1 %v2213_v0  ;;  %v204_v4 = vld [vmem:[%s2252_s17 + $0xf8] sm:$0xff]  ;;  %v2035_v48 = vcombine.high %v187_v2, %v203_v3 }
  0x7d   : > { %v2037_v5 = vcombine.high %v188_v47, %v204_v4 }
  0x7e   : > { %1618 = vmatpush1.bf16.msra.mxu0 %v2058_v45  ;;  %1659 = vmatpush1.bf16.msra.mxu1 %v2060_v49  ;;  %v220_v45 = vld [vmem:[%s2252_s17 + $0x178] sm:$0xff] }
  0x7f   : > { %1619 = vmatprep.subr.bf16.mxu0 %v2091_v8  ;;  %1660 = vmatprep.subr.bf16.mxu1 %v2093_v13  ;;  %v236_v49 = vld [vmem:[%s2252_s17 + $0x1f8] sm:$0xff]  ;;  %v2034_v8 = vcombine.low %v187_v2, %v203_v3  ;;  %v2036_v13 = vcombine.low %v188_v47, %v204_v4 }
  0x80   : > { %v2069_v14 = vcombine.high %v220_v45, %v236_v49 }
  0x82   : > { %1620 = vmatpush1.bf16.msra.mxu0 %v2090_v22  ;;  %1661 = vmatpush1.bf16.msra.mxu1 %v2092_v24  ;;  %v2101_v24 = vcombine.high %v252_v17, %v268_v21 }
  0x83   : > { %1621 = vmatprep.subr.bf16.mxu0 %v2123_v25  ;;  %1662 = vmatprep.subr.bf16.mxu1 %v2125_v26  ;;  %v283_v25 = vld [vmem:[%s2252_s17 + $0x370] sm:$0xff] }
  0x84   : > { %v299_v26 = vld [vmem:[%s2252_s17 + $0x3f0] sm:$0xff] }
  0x85   : > { %v2131_v30 = vcombine.high %v283_v25, %v299_v26 }
  0x86   : > { %1622 = vmatpush1.bf16.msra.mxu0 %v2122_v38  ;;  %1663 = vmatpush1.bf16.msra.mxu1 %v2124_v27  ;;  %v284_v38 = vld [vmem:[%s2252_s17 + $0x378] sm:$0xff] }
  0x87   : > { %1623 = vmatprep.subr.bf16.mxu0 %v2358_v10  ;;  %1664 = vmatprep.subr.bf16.mxu1 %v2361_v11  ;;  %v2063_v10 = vcombine.high %v217_v33, %v233_v34  ;;  %v249_v11 = vld [vmem:[%s2252_s17 + $0x260] sm:$0xff]  ;;  %v300_v27 = vld [vmem:[%s2252_s17 + $0x3f8] sm:$0xff] }
  0x88   : > { %v2095_v51 = vcombine.high %v249_v11, %v265_v41  ;;  %v2094_v59 = vcombine.low %v249_v11, %v265_v41  ;;  %v2133_v31 = vcombine.high %v284_v38, %v300_v27 }
  0x8a   : > { %1624 = vmatpush1.bf16.msra.mxu0 %v2364_v12  ;;  %1665 = vmatpush1.bf16.msra.mxu1 %v2367_v15  ;;  %v2062_v12 = vcombine.low %v217_v33, %v233_v34  ;;  %v2064_v15 = vcombine.low %v218_v35, %v234_v36 }
  0x8b   : > { %1697 = vmatprep.subr.bf16.mxu0 %v2031_v23  ;;  %1738 = vmatprep.subr.bf16.mxu1 %v2033_v32  ;;  %v2130_v23 = vcombine.low %v283_v25, %v299_v26  ;;  %v2132_v32 = vcombine.low %v284_v38, %v300_v27 }
  0x8d   : > { %2176 = vmatmul.mubr.msk.bf16.vlgmr.msra.gmra.mrb[20].mxu0 %vm1101_vm2, %v2291_v58  ;;  %2177 = vmatmul.mubr.msk.bf16.vlgmr.msra.gmra.mrb[20].mxu1 %vm1101_vm2, %v2291_v58 }
  0x8e   : > { %1698 = vmatpush1.bf16.msra.mxu0 %v2030_v37  ;;  %1739 = vmatpush1.bf16.msra.mxu1 %v2032_v39 }
  0x8f   : > { %1699 = vmatprep.subr.bf16.mxu0 %v2063_v10  ;;  %1740 = vmatprep.subr.bf16.mxu1 %v2065_v40 }
  0x90   : > { %1729 = vmatprep.mubr.bf16.mxu0 %v2213_v0  ;;  %1770 = vmatprep.mubr.bf16.mxu1 %v2213_v0 }
  0x92   : > { %1700 = vmatpush1.bf16.msra.mxu0 %v2062_v12  ;;  %1741 = vmatpush1.bf16.msra.mxu1 %v2064_v15 }
  0x93   : > { %1701 = vmatprep.subr.bf16.mxu0 %v2095_v51  ;;  %1742 = vmatprep.subr.bf16.mxu1 %v2097_v53 }
  0x96   : > { %1702 = vmatpush1.bf16.msra.mxu0 %v2094_v59  ;;  %1743 = vmatpush1.bf16.msra.mxu1 %v2096_v60 }
  0x97   : > { %1703 = vmatprep.subr.bf16.mxu0 %v2127_v61  ;;  %1744 = vmatprep.subr.bf16.mxu1 %v2129_v62 }
  0x9a   : > { %1704 = vmatpush1.bf16.msra.mxu0 %v2126_v63  ;;  %1745 = vmatpush1.bf16.msra.mxu1 %v2128_v1 }
  0x9b   : > { %1705 = vmatprep.subr.bf16.mxu0 %v2401_v44  ;;  %1746 = vmatprep.subr.bf16.mxu1 %v2410_v52  ;;  %v2067_v44 = vcombine.high %v219_v6, %v235_v7  ;;  %v251_v52 = vld [vmem:[%s2252_s17 + $0x270] sm:$0xff] }
  0x9c   : > { %v2099_v22 = vcombine.high %v251_v52, %v267_v9  ;;  %v2098_v28 = vcombine.low %v251_v52, %v267_v9 }
  0x9e   : > { %1706 = vmatpush1.bf16.msra.mxu0 %v2404_v46  ;;  %1747 = vmatpush1.bf16.msra.mxu1 %v2407_v50  ;;  %v2066_v46 = vcombine.low %v219_v6, %v235_v7  ;;  %v2068_v50 = vcombine.low %v220_v45, %v236_v49 }
  0x9f   : > { %1779 = vmatprep.subr.bf16.mxu0 %v2035_v48  ;;  %1820 = vmatprep.subr.bf16.mxu1 %v2037_v5 }
  0xa1   : > { %2178 = vmatmul.mubr.msk.bf16.vlgmr.msra.gmra.mrb[24].mxu0 %vm1101_vm2, %v2291_v58  ;;  %2179 = vmatmul.mubr.msk.bf16.vlgmr.msra.gmra.mrb[24].mxu1 %vm1101_vm2, %v2291_v58 }
  0xa2   : > { %1780 = vmatpush1.bf16.msra.mxu0 %v2034_v8  ;;  %1821 = vmatpush1.bf16.msra.mxu1 %v2036_v13 }
  0xa3   : > { %1781 = vmatprep.subr.bf16.mxu0 %v2067_v44  ;;  %1822 = vmatprep.subr.bf16.mxu1 %v2069_v14 }
  0xa4   : > { %1811 = vmatprep.mubr.bf16.mxu0 %v2213_v0  ;;  %1852 = vmatprep.mubr.bf16.mxu1 %v2213_v0 }
  0xa6   : > { %1782 = vmatpush1.bf16.msra.mxu0 %v2066_v46  ;;  %1823 = vmatpush1.bf16.msra.mxu1 %v2068_v50 }
  0xa7   : > { %1783 = vmatprep.subr.bf16.mxu0 %v2099_v22  ;;  %1824 = vmatprep.subr.bf16.mxu1 %v2101_v24 }
  0xaa   : > { %1784 = vmatpush1.bf16.msra.mxu0 %v2098_v28  ;;  %1825 = vmatpush1.bf16.msra.mxu1 %v2100_v29 }
  0xab   : > { %1785 = vmatprep.subr.bf16.mxu0 %v2131_v30  ;;  %1826 = vmatprep.subr.bf16.mxu1 %v2133_v31 }
  0xae   : > { %1786 = vmatpush1.bf16.msra.mxu0 %v2130_v23  ;;  %1827 = vmatpush1.bf16.msra.mxu1 %v2132_v32 }
  0xaf   : > { %1787 = vmatprep.subr.bf16.mxu0 %v2434_v18  ;;  %1828 = vmatprep.subr.bf16.mxu1 %v2437_v19 }
  0xb0   : > { %v1889_v27 = vpop.permute.xlu0 %1888 }
  0xb2   : > { %1788 = vmatpush1.bf16.msra.mxu0 %v2430_v16  ;;  %1829 = vmatpush1.bf16.msra.mxu1 %v2440_v20 }
  0xb5   : > { %2180 = vmatmul.mubr.msk.bf16.vlgmr.msra.gmra.mrb[28].mxu0 %vm1101_vm2, %v2291_v58  ;;  %2181 = vmatmul.mubr.msk.bf16.vlgmr.msra.gmra.mrb[28].mxu1 %vm1101_vm2, %v2291_v58 }
  0xfc   : > { %v2577_v0 = vpop.f32.mrb[0].mxu0  ;;  %v2579_v33 = vpop.f32.mrb[0].mxu1 }
  0xfd   : > { %v2581_v34 = vpop.f32.mrb[1].mxu0  ;;  %v2583_v35 = vpop.f32.mrb[1].mxu1 }
  0xfe   : > { %v1243_v18 = vpop.f32.mrb[2].mxu0  ;;  %v1284_v19 = vpop.f32.mrb[2].mxu1 }
  0xff   : > { %v1244_v36 = vpop.f32.mrb[3].mxu0  ;;  %v1285_v16 = vpop.f32.mrb[3].mxu1 }
 0x110   : > { %v2585_v37 = vpop.f32.mrb[4].mxu0  ;;  %v2587_v20 = vpop.f32.mrb[4].mxu1 }
 0x111   : > { %v2589_v39 = vpop.f32.mrb[5].mxu0  ;;  %v2591_v10 = vpop.f32.mrb[5].mxu1 }
 0x112   : > { %v1325_v58 = vpop.f32.mrb[6].mxu0  ;;  %v1366_v40 = vpop.f32.mrb[6].mxu1 }
 0x113   : > { %v1326_v11 = vpop.f32.mrb[7].mxu0  ;;  %v1367_v41 = vpop.f32.mrb[7].mxu1 }
 0x124   : > { %v1403_v42 = vpop.f32.mrb[8].mxu0  ;;  %v1444_v12 = vpop.f32.mrb[8].mxu1 }
 0x125   : > { %v1861_v43 = vmax.f32 %v2577_v0, %v1403_v42  ;;  %v1405_v15 = vpop.f32.mrb[9].mxu0  ;;  %v1863_v51 = vmax.f32 %v2579_v33, %v1444_v12  ;;  %v1446_v54 = vpop.f32.mrb[9].mxu1 }
 0x126   : > { %v1862_v53 = vmax.f32 %v2581_v34, %v1405_v15  ;;  %v1407_v55 = vpop.f32.mrb[10].mxu0  ;;  %v1864_v56 = vmax.f32 %v2583_v35, %v1446_v54  ;;  %v1448_v57 = vpop.f32.mrb[10].mxu1 }
 0x127   : > { %v1408_v59 = vpop.f32.mrb[11].mxu0  ;;  %v1449_v60 = vpop.f32.mrb[11].mxu1 }
 0x138   : > { %v2597_v61 = vpop.f32.mrb[12].mxu0  ;;  %v2601_v63 = vpop.f32.mrb[12].mxu1 }
 0x139   : > { %v1865_v62 = vmax.f32 %v2585_v37, %v2597_v61  ;;  %v2603_v1 = vpop.f32.mrb[13].mxu0  ;;  %v1867_v2 = vmax.f32 %v2587_v20, %v2601_v63  ;;  %v2609_v47 = vpop.f32.mrb[13].mxu1 }
 0x13a   : > { %v1866_v3 = vmax.f32 %v2589_v39, %v2603_v1  ;;  %v1489_v4 = vpop.f32.mrb[14].mxu0  ;;  %v1868_v48 = vmax.f32 %v2591_v10, %v2609_v47  ;;  %v1530_v5 = vpop.f32.mrb[14].mxu1 }
 0x13b   : > { %v1490_v6 = vpop.f32.mrb[15].mxu0  ;;  %v1531_v7 = vpop.f32.mrb[15].mxu1 }
 0x14c   : > { %v1567_v45 = vpop.f32.mrb[16].mxu0  ;;  %v1608_v49 = vpop.f32.mrb[16].mxu1 }
 0x14d   : > { %v1569_v8 = vpop.f32.mrb[17].mxu0  ;;  %v1610_v13 = vpop.f32.mrb[17].mxu1 }
 0x14e   : > { %v1571_v44 = vpop.f32.mrb[18].mxu0  ;;  %v1612_v14 = vpop.f32.mrb[18].mxu1 }
 0x14f   : > { %v1572_v52 = vpop.f32.mrb[19].mxu0  ;;  %v1613_v9 = vpop.f32.mrb[19].mxu1 }
 0x160   : > { %v1649_v17 = vpop.f32.mrb[20].mxu0  ;;  %v1690_v21 = vpop.f32.mrb[20].mxu1 }
 0x161   : > { %v1651_v46 = vpop.f32.mrb[21].mxu0  ;;  %v1692_v50 = vpop.f32.mrb[21].mxu1 }
 0x162   : > { %v1653_v22 = vpop.f32.mrb[22].mxu0  ;;  %v1694_v24 = vpop.f32.mrb[22].mxu1 }
 0x163   : > { %v1654_v25 = vpop.f32.mrb[23].mxu0  ;;  %v1695_v26 = vpop.f32.mrb[23].mxu1 }
 0x174   : > { %v1731_v38 = vpop.f32.mrb[24].mxu0  ;;  %v1772_v29 = vpop.f32.mrb[24].mxu1 }
 0x175   : > { %v1869_v28 = vmax.f32 %v1567_v45, %v1731_v38  ;;  %v1733_v30 = vpop.f32.mrb[25].mxu0  ;;  %v1871_v31 = vmax.f32 %v1608_v49, %v1772_v29  ;;  %v1774_v32 = vpop.f32.mrb[25].mxu1 }
 0x176   : > { %v1870_v23 = vmax.f32 %v1569_v8, %v1733_v30  ;;  %v1735_v0 = vpop.f32.mrb[26].mxu0  ;;  %v1872_v34 = vmax.f32 %v1610_v13, %v1774_v32  ;;  %v1776_v35 = vpop.f32.mrb[26].mxu1 }
 0x177   : > { %v1877_v33 = vmax.f32 %v1861_v43, %v1869_v28  ;;  %v1736_v18 = vpop.f32.mrb[27].mxu0  ;;  %v1879_v19 = vmax.f32 %v1863_v51, %v1871_v31  ;;  %v1777_v16 = vpop.f32.mrb[27].mxu1 }
 0x178   : > { %v1878_v36 = vmax.f32 %v1862_v53, %v1870_v23  ;;  %v1880_v58 = vmax.f32 %v1864_v56, %v1872_v34 }
 0x179   : > { %v1891_v40 = vadd.f32 %v1889_v27, %v1877_v33  ;;  %v1893_v41 = vadd.f32 %v1889_v27, %v1879_v19 }
 0x17a   : > { %v1892_v11 = vadd.f32 %v1889_v27, %v1878_v36  ;;  %v1894_v42 = vadd.f32 %v1889_v27, %v1880_v58 }
 0x17b   : > { %v1899_v12 = vmax.f32 %v1891_v40, 0.0  ;;  %v1901_v54 = vmax.f32 %v1893_v41, 0.0 }
 0x17c   : > { %v1900_v15 = vmax.f32 %v1892_v11, 0.0  ;;  %v1902_v55 = vmax.f32 %v1894_v42, 0.0 }
 0x17e   : > { %v2189_v43 = vpack.c.bf16 %v1900_v15, %v1899_v12  ;;  %v2190_v51 = vpack.c.bf16 %v1902_v55, %v1901_v54 }
 0x180   : > { %1939 = vst [vmem:[%s2617_s25] sm:$0x77] %v2189_v43  ;;  %1940 = vst [vmem:[%s2617_s25 + $0x8] sm:$0x77] %v2190_v51 }
 0x188   : > { %v1813_v53 = vpop.f32.mrb[28].mxu0  ;;  %v1854_v57 = vpop.f32.mrb[28].mxu1 }
 0x189   : > { %v1873_v56 = vmax.f32 %v1649_v17, %v1813_v53  ;;  %v1815_v59 = vpop.f32.mrb[29].mxu0  ;;  %v1875_v60 = vmax.f32 %v1690_v21, %v1854_v57  ;;  %v1856_v5 = vpop.f32.mrb[29].mxu1 }
 0x18a   : > { %v1874_v4 = vmax.f32 %v1651_v46, %v1815_v59  ;;  %v1817_v6 = vpop.f32.mrb[30].mxu0  ;;  %v1876_v45 = vmax.f32 %v1692_v50, %v1856_v5  ;;  %v1858_v49 = vpop.f32.mrb[30].mxu1 }
 0x18b   : > { %v1881_v7 = vmax.f32 %v1865_v62, %v1873_v56  ;;  %v1818_v8 = vpop.f32.mrb[31].mxu0  ;;  %v1883_v13 = vmax.f32 %v1867_v2, %v1875_v60  ;;  %v1859_v14 = vpop.f32.mrb[31].mxu1 }
 0x18c   : > { %v1882_v44 = vmax.f32 %v1866_v3, %v1874_v4  ;;  %v1884_v37 = vmax.f32 %v1868_v48, %v1876_v45 }
 0x18d   : > { %v1895_v52 = vadd.f32 %v1889_v27, %v1881_v7  ;;  %v1897_v61 = vadd.f32 %v1889_v27, %v1883_v13 }
 0x18e   : > { %v1896_v62 = vadd.f32 %v1889_v27, %v1882_v44  ;;  %v1898_v17 = vadd.f32 %v1889_v27, %v1884_v37 }
 0x18f   : > { %v1903_v9 = vmax.f32 %v1895_v52, 0.0  ;;  %v1905_v21 = vmax.f32 %v1897_v61, 0.0 }
 0x190   : > { %v1904_v46 = vmax.f32 %v1896_v62, 0.0  ;;  %v1906_v50 = vmax.f32 %v1898_v17, 0.0 }
 0x192   : > { %v2191_v20 = vpack.c.bf16 %v1904_v46, %v1903_v9  ;;  %v2192_v63 = vpack.c.bf16 %v1906_v50, %v1905_v21 }
 0x194   : > { %1941 = vst [vmem:[%s2617_s25 + $0x10] sm:$0x77] %v2191_v20  ;;  %1942 = vst [vmem:[%s2617_s25 + $0x18] sm:$0x77] %v2192_v63 }
 0x195 PF: > { %s13_s12 = sadd.s32 1, %s2211_s12  }
 0x196   : > { %p10_p4 = scmp.ge.s32.totalorder %s13_s12, 4  }
 0x198   :  { %12 = sbr.rel (!%p10_p4) target bundleno = 1 (0x1), region = 62 }

// kernel: lenet_forward.4
= control target key start
LH: loop header
LB: loop body
LE: loop exit
PB: predicated region body
PF: predicated region fallthrough
CT: control target
= control target key end

     0   :  { %s1097_s12 = smov 0   ;;  %s1232_s0 = inlined_call_operand.vmem [shape: bf16[2,150,1024], index: 0, kind: input, shape index: {}]   ;;  %s1233_s1 = inlined_call_operand.vmem [shape: bf16[16,150], index: 1, kind: input, shape index: {}]   ;;  %s1234_s2 = inlined_call_operand.vmem [shape: f32[16,1], index: 2, kind: input, shape index: {}]   ;;  %s1235_s3 = inlined_call_operand.vmem [shape: bf16[2,16,256], index: 3, kind: output, shape index: {}]  }
   0x1 LB: > { %s941_s13 = sadd.s32 4294967295, %s1074_s12   ;;  %p945_p0 = scmp.ge.s32.totalorder %s1074_s12, 1  ;;  %s1074_s12 = sphi %s1097_s12, %s13_s12  }
   0x2   : > { %p137_p1 = scmp.lt.s32.totalorder %s1074_s12, 3 }
   0x4   : > { %p138_p2 = pnand %p945_p0, %p137_p1 }
   0x5   : > { %p161_p3 = scmp.lt.s32.totalorder (!%p138_p2), %s941_s13, 1  ;;  %v1108_v0 = vld [vmem:[%s1233_s1 + $0x4] ss:$8 sps:$4 sm:$0xff] (!%p138_p2)   ;;  %vm639_vm0 = vcmask (!%p138_p2), 179200   ;;  %v1076_v2 = vmov (!%p138_p2), 0   ;;  %vm643_vm1 = vcmask (!%p138_p2), 1042432  }
   0x6   : > { %141 = sbr.rel (%p138_p2) target bundleno = 327 (0x147), region = 32  ;;  %v852_v1 = vld [vmem:[%s1234_s2] sm:$0xff] (!%p138_p2)  ;;  %1032 = vmatprep.mubr.msk.bf16.mxu0 (!%p138_p2), %vm639_vm0, %v1108_v0  ;;  %1034 = vmatprep.mubr.msk.bf16.mxu1 (!%p138_p2), %vm639_vm0, %v1108_v0  ;;  %v853_v3 = vld [vmem:[%s1234_s2 + $0x8] sm:$0xff] (!%p138_p2) }
   0x7   : > { %1056 = vset.pattern.permute.xlu0 (!%p138_p2), %v1076_v2 }
   0x8   : > { %856 = vperm.xlu0 (!%p138_p2), %1056, %v852_v1  }
   0xc   : > { %861 = vperm.xlu0 (!%p138_p2), %1056, %v853_v3  }
   0xd   : > { %s1237_s13 = smov (!%p161_p3, %s941_s13), 1 }
   0xe   : > { %s1046_s18 = smul.u32 608, %s1237_s13  ;;  %s1043_s26 = sshll.u32 %s1237_s13, 4 }
   0xf   : > { %s170_s29 = scalar_lea.vmem %s1235_s3, %s1043_s26 }
  0x10   : > { %s1126_s23 = scalar_lea.vmem %s1232_s0, %s1046_s18 }
  0x11   : > { %v174_v4 = vld [vmem:[%s1126_s23] sm:$0xff]  ;;  %v175_v6 = vld [vmem:[%s1126_s23 + $0x8] sm:$0xff] }
  0x12   : > { %v178_v5 = vld [vmem:[%s1126_s23 + $0x20] sm:$0xff]  ;;  %v179_v8 = vld [vmem:[%s1126_s23 + $0x28] sm:$0xff] }
  0x13   : > { %v952_v7 = vcombine.high %v174_v4, %v178_v5  ;;  %v951_v9 = vcombine.low %v174_v4, %v178_v5  ;;  %v182_v10 = vld [vmem:[%s1126_s23 + $0x40] sm:$0xff]  ;;  %v954_v12 = vcombine.high %v175_v6, %v179_v8  ;;  %v953_v13 = vcombine.low %v175_v6, %v179_v8  ;;  %v183_v15 = vld [vmem:[%s1126_s23 + $0x48] sm:$0xff] }
  0x14   : > { %v186_v11 = vld [vmem:[%s1126_s23 + $0x60] sm:$0xff]  ;;  %v187_v16 = vld [vmem:[%s1126_s23 + $0x68] sm:$0xff] }
  0x15   : > { %v960_v14 = vcombine.high %v182_v10, %v186_v11  ;;  %v190_v17 = vld [vmem:[%s1126_s23 + $0x80] sm:$0xff]  ;;  %668 = vmatprep.subr.bf16.mxu0 %v952_v7  ;;  %v962_v18 = vcombine.high %v183_v15, %v187_v16  ;;  %v191_v20 = vld [vmem:[%s1126_s23 + $0x88] sm:$0xff]  ;;  %711 = vmatprep.subr.bf16.mxu1 %v954_v12  ;;  %v959_v22 = vcombine.low %v182_v10, %v186_v11 }
  0x16   : > { %v194_v19 = vld [vmem:[%s1126_s23 + $0xa0] sm:$0xff]  ;;  %v195_v21 = vld [vmem:[%s1126_s23 + $0xa8] sm:$0xff]  ;;  %669 = vmatpush1.bf16.msra.mxu0 %v951_v9  ;;  %712 = vmatpush1.bf16.msra.mxu1 %v953_v13  ;;  %v961_v23 = vcombine.low %v183_v15, %v187_v16 }
  0x17   : > { %670 = vmatprep.subr.bf16.mxu0 %v960_v14  ;;  %v968_v24 = vcombine.high %v190_v17, %v194_v19  ;;  %713 = vmatprep.subr.bf16.mxu1 %v962_v18  ;;  %v970_v25 = vcombine.high %v191_v20, %v195_v21  ;;  %v198_v26 = vld [vmem:[%s1126_s23 + $0xc0] sm:$0xff]  ;;  %v199_v28 = vld [vmem:[%s1126_s23 + $0xc8] sm:$0xff]  ;;  %v967_v30 = vcombine.low %v190_v17, %v194_v19  ;;  %v176_v19 = vld [vmem:[%s1126_s23 + $0x10] sm:$0xff] }
  0x18   : > { %v202_v27 = vld [vmem:[%s1126_s23 + $0xe0] sm:$0xff]  ;;  %v203_v29 = vld [vmem:[%s1126_s23 + $0xe8] sm:$0xff]  ;;  %v969_v31 = vcombine.low %v191_v20, %v195_v21  ;;  %v180_v20 = vld [vmem:[%s1126_s23 + $0x30] sm:$0xff] }
  0x19   : > { %v976_v32 = vcombine.high %v198_v26, %v202_v27  ;;  %v978_v33 = vcombine.high %v199_v28, %v203_v29  ;;  %v206_v34 = vld [vmem:[%s1126_s23 + $0x100] sm:$0xff]  ;;  %v207_v36 = vld [vmem:[%s1126_s23 + $0x108] sm:$0xff]  ;;  %v975_v38 = vcombine.low %v198_v26, %v202_v27  ;;  %v977_v39 = vcombine.low %v199_v28, %v203_v29  ;;  %v177_v21 = vld [vmem:[%s1126_s23 + $0x18] sm:$0xff] }
  0x1a   : > { %671 = vmatpush1.bf16.msra.mxu0 %v959_v22  ;;  %714 = vmatpush1.bf16.msra.mxu1 %v961_v23  ;;  %v210_v35 = vld [vmem:[%s1126_s23 + $0x120] sm:$0xff]  ;;  %v211_v37 = vld [vmem:[%s1126_s23 + $0x128] sm:$0xff]  ;;  %v181_v22 = vld [vmem:[%s1126_s23 + $0x38] sm:$0xff] }
  0x1b   : > { %672 = vmatprep.subr.bf16.mxu0 %v968_v24  ;;  %715 = vmatprep.subr.bf16.mxu1 %v970_v25  ;;  %v984_v40 = vcombine.high %v206_v34, %v210_v35  ;;  %v986_v41 = vcombine.high %v207_v36, %v211_v37  ;;  %v214_v42 = vld [vmem:[%s1126_s23 + $0x140] sm:$0xff]  ;;  %v215_v44 = vld [vmem:[%s1126_s23 + $0x148] sm:$0xff]  ;;  %v983_v46 = vcombine.low %v206_v34, %v210_v35  ;;  %v184_v27 = vld [vmem:[%s1126_s23 + $0x50] sm:$0xff] }
  0x1c   : > { %v218_v43 = vld [vmem:[%s1126_s23 + $0x160] sm:$0xff]  ;;  %v219_v45 = vld [vmem:[%s1126_s23 + $0x168] sm:$0xff]  ;;  %v985_v47 = vcombine.low %v207_v36, %v211_v37  ;;  %v956_v24 = vcombine.high %v176_v19, %v180_v20  ;;  %v958_v26 = vcombine.high %v177_v21, %v181_v22  ;;  %v188_v28 = vld [vmem:[%s1126_s23 + $0x70] sm:$0xff] }
  0x1d   : > { %v992_v48 = vcombine.high %v214_v42, %v218_v43  ;;  %v994_v49 = vcombine.high %v215_v44, %v219_v45  ;;  %v222_v50 = vld [vmem:[%s1126_s23 + $0x180] sm:$0xff]  ;;  %v223_v52 = vld [vmem:[%s1126_s23 + $0x188] sm:$0xff]  ;;  %v991_v54 = vcombine.low %v214_v42, %v218_v43  ;;  %v993_v55 = vcombine.low %v215_v44, %v219_v45  ;;  %v192_v36 = vld [vmem:[%s1126_s23 + $0x90] sm:$0xff] }
  0x1e   : > { %673 = vmatpush1.bf16.msra.mxu0 %v967_v30  ;;  %716 = vmatpush1.bf16.msra.mxu1 %v969_v31  ;;  %v226_v51 = vld [vmem:[%s1126_s23 + $0x1a0] sm:$0xff]  ;;  %v227_v53 = vld [vmem:[%s1126_s23 + $0x1a8] sm:$0xff]  ;;  %v185_v30 = vld [vmem:[%s1126_s23 + $0x58] sm:$0xff]  ;;  %v964_v34 = vcombine.high %v184_v27, %v188_v28 }
  0x1f   : > { %674 = vmatprep.subr.bf16.mxu0 %v976_v32  ;;  %717 = vmatprep.subr.bf16.mxu1 %v978_v33  ;;  %v1000_v56 = vcombine.high %v222_v50, %v226_v51  ;;  %v1002_v57 = vcombine.high %v223_v52, %v227_v53  ;;  %v230_v58 = vld [vmem:[%s1126_s23 + $0x1c0] sm:$0xff]  ;;  %v231_v60 = vld [vmem:[%s1126_s23 + $0x1c8] sm:$0xff]  ;;  %v999_v62 = vcombine.low %v222_v50, %v226_v51  ;;  %v189_v31 = vld [vmem:[%s1126_s23 + $0x78] sm:$0xff] }
  0x20   : > { %v234_v59 = vld [vmem:[%s1126_s23 + $0x1e0] sm:$0xff]  ;;  %v235_v61 = vld [vmem:[%s1126_s23 + $0x1e8] sm:$0xff]  ;;  %v1001_v63 = vcombine.low %v223_v52, %v227_v53  ;;  %v955_v32 = vcombine.low %v176_v19, %v180_v20  ;;  %v957_v33 = vcombine.low %v177_v21, %v181_v22  ;;  %v966_v35 = vcombine.high %v185_v30, %v189_v31  ;;  %v196_v37 = vld [vmem:[%s1126_s23 + $0xb0] sm:$0xff] }
  0x21   : > { %v1008_v1 = vcombine.high %v230_v58, %v234_v59  ;;  %v1010_v2 = vcombine.high %v231_v60, %v235_v61  ;;  %v238_v3 = vld [vmem:[%s1126_s23 + $0x200] sm:$0xff]  ;;  %v239_v5 = vld [vmem:[%s1126_s23 + $0x208] sm:$0xff]  ;;  %v1007_v7 = vcombine.low %v230_v58, %v234_v59  ;;  %v1009_v8 = vcombine.low %v231_v60, %v235_v61  ;;  %v200_v44 = vld [vmem:[%s1126_s23 + $0xd0] sm:$0xff] }
  0x22   : > { %675 = vmatpush1.bf16.msra.mxu0 %v975_v38  ;;  %718 = vmatpush1.bf16.msra.mxu1 %v977_v39  ;;  %v242_v4 = vld [vmem:[%s1126_s23 + $0x220] sm:$0xff]  ;;  %v243_v6 = vld [vmem:[%s1126_s23 + $0x228] sm:$0xff]  ;;  %v193_v38 = vld [vmem:[%s1126_s23 + $0x98] sm:$0xff]  ;;  %v972_v42 = vcombine.high %v192_v36, %v196_v37 }
  0x23   : > { %676 = vmatprep.subr.bf16.mxu0 %v984_v40  ;;  %719 = vmatprep.subr.bf16.mxu1 %v986_v41  ;;  %v1016_v9 = vcombine.high %v238_v3, %v242_v4  ;;  %v1018_v10 = vcombine.high %v239_v5, %v243_v6  ;;  %v246_v11 = vld [vmem:[%s1126_s23 + $0x240] sm:$0x77]  ;;  %v247_v12 = vld [vmem:[%s1126_s23 + $0x248] sm:$0x77]  ;;  %v1015_v13 = vcombine.low %v238_v3, %v242_v4  ;;  %v197_v39 = vld [vmem:[%s1126_s23 + $0xb8] sm:$0xff] }
  0x24   : > { %v1017_v14 = vcombine.low %v239_v5, %v243_v6  ;;  %v1024_v15 = vcombine.high %v246_v11, %v246_v11  ;;  %v1023_v16 = vcombine.low %v246_v11, %v246_v11  ;;  %v1026_v17 = vcombine.high %v247_v12, %v247_v12  ;;  %v1179_v29 = vld [vmem:[%s1233_s1] ss:$8 sps:$4 sm:$0xff]   ;;  %v204_v45 = vld [vmem:[%s1126_s23 + $0xf0] sm:$0xff]  ;;  %v217_v61 = vld [vmem:[%s1126_s23 + $0x158] sm:$0xff] }
  0x25   : > { %v1025_v18 = vcombine.low %v247_v12, %v247_v12  ;;  %v963_v40 = vcombine.low %v184_v27, %v188_v28  ;;  %v965_v41 = vcombine.low %v185_v30, %v189_v31  ;;  %v974_v43 = vcombine.high %v193_v38, %v197_v39  ;;  %v208_v52 = vld [vmem:[%s1126_s23 + $0x110] sm:$0xff]  ;;  %v225_v6 = vld [vmem:[%s1126_s23 + $0x198] sm:$0xff] }
  0x26   : > { %677 = vmatpush1.bf16.msra.mxu0 %v983_v46  ;;  %720 = vmatpush1.bf16.msra.mxu1 %v985_v47  ;;  %v645_v23 = vsel %vm643_vm1, %v1023_v16, 0  ;;  %v201_v46 = vld [vmem:[%s1126_s23 + $0xd8] sm:$0xff]  ;;  %v980_v50 = vcombine.high %v200_v44, %v204_v45  ;;  %v212_v53 = vld [vmem:[%s1126_s23 + $0x130] sm:$0xff] }
  0x27   : > { %678 = vmatprep.subr.bf16.mxu0 %v992_v48  ;;  %721 = vmatprep.subr.bf16.mxu1 %v994_v49  ;;  %v651_v25 = vsel %vm643_vm1, %v1025_v18, 0  ;;  %v205_v47 = vld [vmem:[%s1126_s23 + $0xf8] sm:$0xff]  ;;  %v971_v48 = vcombine.low %v192_v36, %v196_v37  ;;  %v973_v49 = vcombine.low %v193_v38, %v197_v39  ;;  %v216_v59 = vld [vmem:[%s1126_s23 + $0x150] sm:$0xff] }
  0x28   : > { %v982_v51 = vcombine.high %v201_v46, %v205_v47  ;;  %v220_v60 = vld [vmem:[%s1126_s23 + $0x170] sm:$0xff]  ;;  %v241_v22 = vld [vmem:[%s1126_s23 + $0x218] sm:$0xff] }
  0x29   : > { %v224_v4 = vld [vmem:[%s1126_s23 + $0x190] sm:$0xff]  ;;  %v249_v30 = vld [vmem:[%s1126_s23 + $0x258] sm:$0x77] }
  0x2a   : > { %679 = vmatpush1.bf16.msra.mxu0 %v991_v54  ;;  %722 = vmatpush1.bf16.msra.mxu1 %v993_v55  ;;  %v209_v54 = vld [vmem:[%s1126_s23 + $0x118] sm:$0xff]  ;;  %v228_v5 = vld [vmem:[%s1126_s23 + $0x1b0] sm:$0xff]  ;;  %v1029_v36 = vcombine.low %v249_v30, %v249_v30 }
  0x2b   : > { %680 = vmatprep.subr.bf16.mxu0 %v1000_v56  ;;  %723 = vmatprep.subr.bf16.mxu1 %v1002_v57  ;;  %v213_v55 = vld [vmem:[%s1126_s23 + $0x138] sm:$0xff]  ;;  %v979_v56 = vcombine.low %v200_v44, %v204_v45  ;;  %v988_v57 = vcombine.high %v208_v52, %v212_v53  ;;  %v232_v12 = vld [vmem:[%s1126_s23 + $0x1d0] sm:$0xff]  ;;  %v1003_v16 = vcombine.low %v224_v4, %v228_v5 }
  0x2c   : > { %v990_v58 = vcombine.high %v209_v54, %v213_v55  ;;  %v240_v20 = vld [vmem:[%s1126_s23 + $0x210] sm:$0xff]  ;;  %v663_v38 = vsel %vm643_vm1, %v1029_v36, 0 }
  0x2d   : > { %v244_v21 = vld [vmem:[%s1126_s23 + $0x230] sm:$0xff] }
  0x2e   : > { %681 = vmatpush1.bf16.msra.mxu0 %v999_v62  ;;  %724 = vmatpush1.bf16.msra.mxu1 %v1001_v63  ;;  %v221_v62 = vld [vmem:[%s1126_s23 + $0x178] sm:$0xff]  ;;  %v987_v63 = vcombine.low %v208_v52, %v212_v53  ;;  %v248_v28 = vld [vmem:[%s1126_s23 + $0x250] sm:$0x77]  ;;  %v1019_v31 = vcombine.low %v240_v20, %v244_v21 }
  0x2f   : > { %682 = vmatprep.subr.bf16.mxu0 %v1008_v1  ;;  %725 = vmatprep.subr.bf16.mxu1 %v1010_v2  ;;  %v989_v1 = vcombine.low %v209_v54, %v213_v55  ;;  %v996_v2 = vcombine.high %v216_v59, %v220_v60  ;;  %v998_v3 = vcombine.high %v217_v61, %v221_v62 }
  0x32   : > { %683 = vmatpush1.bf16.msra.mxu0 %v1007_v7  ;;  %726 = vmatpush1.bf16.msra.mxu1 %v1009_v8  ;;  %v229_v7 = vld [vmem:[%s1126_s23 + $0x1b8] sm:$0xff]  ;;  %v995_v8 = vcombine.low %v216_v59, %v220_v60 }
  0x33   : > { %684 = vmatprep.subr.bf16.mxu0 %v1016_v9  ;;  %727 = vmatprep.subr.bf16.mxu1 %v1018_v10  ;;  %v997_v9 = vcombine.low %v217_v61, %v221_v62  ;;  %v1004_v10 = vcombine.high %v224_v4, %v228_v5  ;;  %v1006_v11 = vcombine.high %v225_v6, %v229_v7 }
  0x36   : > { %685 = vmatpush1.bf16.msra.mxu0 %v1015_v13  ;;  %728 = vmatpush1.bf16.msra.mxu1 %v1017_v14  ;;  %v236_v13 = vld [vmem:[%s1126_s23 + $0x1f0] sm:$0xff]  ;;  %v233_v14 = vld [vmem:[%s1126_s23 + $0x1d8] sm:$0xff] }
  0x37   : > { %1031 = vmatprep.subr.msk.bf16.mxu0 %vm643_vm1, %v1024_v15  ;;  %1033 = vmatprep.subr.msk.bf16.mxu1 %vm643_vm1, %v1026_v17  ;;  %v237_v15 = vld [vmem:[%s1126_s23 + $0x1f8] sm:$0xff]  ;;  %v1005_v17 = vcombine.low %v225_v6, %v229_v7  ;;  %v1012_v18 = vcombine.high %v232_v12, %v236_v13 }
  0x38   : > { %v1014_v19 = vcombine.high %v233_v14, %v237_v15 }
  0x3a   : > { %687 = vmatpush1.bf16.msra.mxu0 %v645_v23  ;;  %730 = vmatpush1.bf16.msra.mxu1 %v651_v25  ;;  %v245_v23 = vld [vmem:[%s1126_s23 + $0x238] sm:$0xff]  ;;  %v1013_v25 = vcombine.low %v233_v14, %v237_v15 }
  0x3b   : > { %754 = vmatprep.subr.bf16.mxu0 %v956_v24  ;;  %797 = vmatprep.subr.bf16.mxu1 %v958_v26  ;;  %v1011_v24 = vcombine.low %v232_v12, %v236_v13  ;;  %v1020_v26 = vcombine.high %v240_v20, %v244_v21  ;;  %v1022_v27 = vcombine.high %v241_v22, %v245_v23 }
  0x3d   : > { %701 = vmatmul.mubr.bf16.vlgmr.msra.gmra.mrb[0].mxu0 %v1179_v29  ;;  %744 = vmatmul.mubr.bf16.vlgmr.msra.gmra.mrb[0].mxu1 %v1179_v29 }
  0x3e   : > { %755 = vmatpush1.bf16.msra.mxu0 %v955_v32  ;;  %798 = vmatpush1.bf16.msra.mxu1 %v957_v33  ;;  %v1021_v32 = vcombine.low %v241_v22, %v245_v23  ;;  %v1028_v33 = vcombine.high %v248_v28, %v248_v28 }
  0x3f   : > { %756 = vmatprep.subr.bf16.mxu0 %v964_v34  ;;  %799 = vmatprep.subr.bf16.mxu1 %v966_v35  ;;  %v1027_v34 = vcombine.low %v248_v28, %v248_v28  ;;  %v1030_v35 = vcombine.high %v249_v30, %v249_v30 }
  0x40   : > { %1036 = vmatprep.mubr.msk.bf16.mxu0 %vm639_vm0, %v1108_v0  ;;  %1038 = vmatprep.mubr.msk.bf16.mxu1 %vm639_vm0, %v1108_v0  ;;  %v981_v0 = vcombine.low %v201_v46, %v205_v47 }
  0x41   : > { %v657_v37 = vsel %vm643_vm1, %v1027_v34, 0 }
  0x42   : > { %757 = vmatpush1.bf16.msra.mxu0 %v963_v40  ;;  %800 = vmatpush1.bf16.msra.mxu1 %v965_v41 }
  0x43   : > { %758 = vmatprep.subr.bf16.mxu0 %v972_v42  ;;  %801 = vmatprep.subr.bf16.mxu1 %v974_v43 }
  0x46   : > { %759 = vmatpush1.bf16.msra.mxu0 %v971_v48  ;;  %802 = vmatpush1.bf16.msra.mxu1 %v973_v49 }
  0x47   : > { %760 = vmatprep.subr.bf16.mxu0 %v980_v50  ;;  %803 = vmatprep.subr.bf16.mxu1 %v982_v51 }
  0x4a   : > { %761 = vmatpush1.bf16.msra.mxu0 %v979_v56  ;;  %804 = vmatpush1.bf16.msra.mxu1 %v981_v0 }
  0x4b   : > { %762 = vmatprep.subr.bf16.mxu0 %v988_v57  ;;  %805 = vmatprep.subr.bf16.mxu1 %v990_v58 }
  0x4e   : > { %763 = vmatpush1.bf16.msra.mxu0 %v987_v63  ;;  %806 = vmatpush1.bf16.msra.mxu1 %v989_v1 }
  0x4f   : > { %764 = vmatprep.subr.bf16.mxu0 %v996_v2  ;;  %807 = vmatprep.subr.bf16.mxu1 %v998_v3 }
  0x52   : > { %765 = vmatpush1.bf16.msra.mxu0 %v995_v8  ;;  %808 = vmatpush1.bf16.msra.mxu1 %v997_v9 }
  0x53   : > { %766 = vmatprep.subr.bf16.mxu0 %v1004_v10  ;;  %809 = vmatprep.subr.bf16.mxu1 %v1006_v11 }
  0x56   : > { %767 = vmatpush1.bf16.msra.mxu0 %v1003_v16  ;;  %810 = vmatpush1.bf16.msra.mxu1 %v1005_v17 }
  0x57   : > { %768 = vmatprep.subr.bf16.mxu0 %v1012_v18  ;;  %811 = vmatprep.subr.bf16.mxu1 %v1014_v19 }
  0x5a   : > { %769 = vmatpush1.bf16.msra.mxu0 %v1011_v24  ;;  %812 = vmatpush1.bf16.msra.mxu1 %v1013_v25 }
  0x5b   : > { %770 = vmatprep.subr.bf16.mxu0 %v1020_v26  ;;  %813 = vmatprep.subr.bf16.mxu1 %v1022_v27 }
  0x5e   : > { %771 = vmatpush1.bf16.msra.mxu0 %v1019_v31  ;;  %814 = vmatpush1.bf16.msra.mxu1 %v1021_v32 }
  0x5f   : > { %1035 = vmatprep.subr.msk.bf16.mxu0 %vm643_vm1, %v1028_v33  ;;  %1037 = vmatprep.subr.msk.bf16.mxu1 %vm643_vm1, %v1030_v35 }
  0x62   : > { %773 = vmatpush1.bf16.msra.mxu0 %v657_v37  ;;  %816 = vmatpush1.bf16.msra.mxu1 %v663_v38 }
  0x65   : > { %787 = vmatmul.mubr.bf16.vlgmr.msra.gmra.mrb[4].mxu0 %v1179_v29  ;;  %830 = vmatmul.mubr.bf16.vlgmr.msra.gmra.mrb[4].mxu1 %v1179_v29 }
  0x87   : > { %v857_v51 = vpop.permute.xlu0 %856 }
  0x8b   : > { %v862_v4 = vpop.permute.xlu0 %861 }
 0x110   : > { %v702_v39 = vpop.f32.mrb[0].mxu0  ;;  %v745_v40 = vpop.f32.mrb[0].mxu1 }
 0x111   : > { %v704_v41 = vpop.f32.mrb[1].mxu0  ;;  %v840_v42 = vmax.f32 %v702_v39, %v745_v40  ;;  %v747_v43 = vpop.f32.mrb[1].mxu1 }
 0x112   : > { %v706_v44 = vpop.f32.mrb[2].mxu0  ;;  %v841_v45 = vmax.f32 %v704_v41, %v747_v43  ;;  %v749_v46 = vpop.f32.mrb[2].mxu1 }
 0x113   : > { %v708_v47 = vpop.f32.mrb[3].mxu0  ;;  %v842_v48 = vmax.f32 %v706_v44, %v749_v46  ;;  %v751_v49 = vpop.f32.mrb[3].mxu1 }
 0x114   : > { %v843_v50 = vmax.f32 %v708_v47, %v751_v49 }
 0x138   : > { %v788_v52 = vpop.f32.mrb[4].mxu0  ;;  %v831_v53 = vpop.f32.mrb[4].mxu1 }
 0x139   : > { %v790_v54 = vpop.f32.mrb[5].mxu0  ;;  %v844_v55 = vmax.f32 %v788_v52, %v831_v53  ;;  %v833_v56 = vpop.f32.mrb[5].mxu1 }
 0x13a   : > { %v792_v29 = vpop.f32.mrb[6].mxu0  ;;  %v845_v0 = vmax.f32 %v790_v54, %v833_v56  ;;  %v835_v57 = vpop.f32.mrb[6].mxu1 }
 0x13b   : > { %v794_v58 = vpop.f32.mrb[7].mxu0  ;;  %v848_v59 = vmax.f32 %v840_v42, %v844_v55  ;;  %v846_v60 = vmax.f32 %v792_v29, %v835_v57  ;;  %v837_v61 = vpop.f32.mrb[7].mxu1 }
 0x13c   : > { %v849_v62 = vmax.f32 %v841_v45, %v845_v0  ;;  %v847_v63 = vmax.f32 %v794_v58, %v837_v61 }
 0x13d   : > { %v864_v1 = vadd.f32 %v857_v51, %v848_v59  ;;  %v850_v2 = vmax.f32 %v842_v48, %v846_v60 }
 0x13e   : > { %v865_v3 = vadd.f32 %v857_v51, %v849_v62  ;;  %v851_v5 = vmax.f32 %v843_v50, %v847_v63 }
 0x13f   : > { %v868_v6 = vmax.f32 %v864_v1, 0.0  ;;  %v866_v7 = vadd.f32 %v862_v4, %v850_v2 }
 0x140   : > { %v869_v8 = vmax.f32 %v865_v3, 0.0  ;;  %v867_v9 = vadd.f32 %v862_v4, %v851_v5 }
 0x141   : > { %v870_v10 = vmax.f32 %v866_v7, 0.0 }
 0x142   : > { %v1044_v11 = vpack.c.bf16 %v869_v8, %v868_v6  ;;  %v871_v12 = vmax.f32 %v867_v9, 0.0 }
 0x144   : > { %884 = vst [vmem:[%s170_s29] sm:$0xff] %v1044_v11  ;;  %v1045_v13 = vpack.c.bf16 %v871_v12, %v870_v10 }
 0x146   : > { %885 = vst [vmem:[%s170_s29 + $0x8] sm:$0xff] %v1045_v13 }
 0x147 PF: > { %s13_s12 = sadd.s32 1, %s1074_s12  }
 0x148   : > { %p10_p4 = scmp.ge.s32.totalorder %s13_s12, 4  }
 0x14a   :  { %12 = sbr.rel (!%p10_p4) target bundleno = 1 (0x1), region = 62 }

// kernel: lenet_forward.5
= control target key start
LH: loop header
LB: loop body
LE: loop exit
PB: predicated region body
PF: predicated region fallthrough
CT: control target
= control target key end

     0   :  { %v559_v28 = vlaneseq  ;;  %v4174_v36 = vmov 1966171168   ;;  %s5123_s0 = inlined_call_operand.vmem [shape: bf16[2,4096], index: 0, kind: input, shape index: {}]   ;;  %s5124_s1 = inlined_call_operand.vmem [shape: bf16[4096,120], index: 1, kind: input, shape index: {}]   ;;  %s5125_s2 = inlined_call_operand.vmem [shape: f32[1,120], index: 2, kind: input, shape index: {}]   ;;  %s5126_s3 = inlined_call_operand.vmem [shape: bf16[120,84], index: 3, kind: input, shape index: {}]   ;;  %s5127_s4 = inlined_call_operand.vmem [shape: f32[1,84], index: 4, kind: input, shape index: {}]   ;;  %s5128_s5 = inlined_call_operand.vmem [shape: bf16[84,2], index: 5, kind: input, shape index: {}]   ;;  %s5129_s6 = inlined_call_operand.vmem [shape: f32[1,2], index: 6, kind: input, shape index: {}]   ;;  %s5130_s7 = inlined_call_operand.hbm [shape: f32[2,2], index: 7, kind: output, shape index: {}]  }
   0x1   :  { %v3876_v0 = vld [vmem:[%s5124_s1 + $0x40] sm:$0xff]   ;;  %v3880_v4 = vld [vmem:[%s5124_s1 + $0x48] sm:$0xff]   ;;  %v3884_v8 = vld [vmem:[%s5124_s1 + $0x50] sm:$0xff]   ;;  %v557_v37 = vunpack.c.l.s4 %v4174_v36 }
   0x2   :  { %v3877_v1 = vld [vmem:[%s5124_s1 + $0xc0] sm:$0xff]   ;;  %3468 = vmatprep.subr.bf16.mxu0 %v3876_v0  ;;  %v3881_v5 = vld [vmem:[%s5124_s1 + $0xc8] sm:$0xff]   ;;  %v3885_v9 = vld [vmem:[%s5124_s1 + $0xd0] sm:$0xff]   ;;  %v560_v33 = vshrl.u32 %v559_v28, 7 }
   0x3   :  { %v3878_v2 = vld [vmem:[%s5124_s1] sm:$0xff]   ;;  %3490 = vmatprep.subr.bf16.mxu1 %v3877_v1  ;;  %v3882_v6 = vld [vmem:[%s5124_s1 + $0x8] sm:$0xff]   ;;  %v3886_v10 = vld [vmem:[%s5124_s1 + $0x10] sm:$0xff]   ;;  %v558_v40 = vunpack.c.0.s8 %v557_v37 }
   0x4   :  { %v3879_v3 = vld [vmem:[%s5124_s1 + $0x80] sm:$0xff]   ;;  %3469 = vmatpush3.bf16.msra.mxu0 %v3878_v2  ;;  %v3883_v7 = vld [vmem:[%s5124_s1 + $0x88] sm:$0xff]   ;;  %v3887_v11 = vld [vmem:[%s5124_s1 + $0x90] sm:$0xff]  }
   0x5   :  { %3491 = vmatpush3.bf16.msra.mxu1 %v3879_v3  ;;  %3470 = vmatprep.subr.bf16.mxu0 %v3880_v4  ;;  %v3888_v12 = vld [vmem:[%s5124_s1 + $0x58] sm:$0xff]   ;;  %v3892_v16 = vld [vmem:[%s5124_s1 + $0x60] sm:$0xff]   ;;  %v3896_v20 = vld [vmem:[%s5124_s1 + $0x68] sm:$0xff]   ;;  %v4323_v41 = vsub.s32 %v558_v40, %v560_v33 }
   0x6   :  { %3492 = vmatprep.subr.bf16.mxu1 %v3881_v5  ;;  %v3889_v13 = vld [vmem:[%s5124_s1 + $0xd8] sm:$0xff]   ;;  %v3893_v17 = vld [vmem:[%s5124_s1 + $0xe0] sm:$0xff]   ;;  %v3897_v21 = vld [vmem:[%s5124_s1 + $0xe8] sm:$0xff]  }
   0x7   :  { %v3890_v14 = vld [vmem:[%s5124_s1 + $0x18] sm:$0xff]   ;;  %v3894_v18 = vld [vmem:[%s5124_s1 + $0x20] sm:$0xff]   ;;  %v3898_v22 = vld [vmem:[%s5124_s1 + $0x28] sm:$0xff]  }
   0x8   :  { %3471 = vmatpush3.bf16.msra.mxu0 %v3882_v6  ;;  %v3891_v15 = vld [vmem:[%s5124_s1 + $0x98] sm:$0xff]   ;;  %v3895_v19 = vld [vmem:[%s5124_s1 + $0xa0] sm:$0xff]   ;;  %v3899_v23 = vld [vmem:[%s5124_s1 + $0xa8] sm:$0xff]  }
   0x9   :  { %3493 = vmatpush3.bf16.msra.mxu1 %v3883_v7  ;;  %3472 = vmatprep.subr.bf16.mxu0 %v3884_v8  ;;  %v3900_v24 = vld [vmem:[%s5124_s1 + $0x70] sm:$0xff]   ;;  %v3904_v29 = vld [vmem:[%s5124_s1 + $0x78] sm:$0xff]   ;;  %v28_v34 = vld [vmem:[%s5123_s0] sm:$0xff] }
   0xa   :  { %3494 = vmatprep.subr.bf16.mxu1 %v3885_v9  ;;  %v3901_v25 = vld [vmem:[%s5124_s1 + $0xf0] sm:$0xff]   ;;  %v3905_v30 = vld [vmem:[%s5124_s1 + $0xf8] sm:$0xff]   ;;  %v3909_v35 = vld [vmem:[%s5124_s1 + $0x140] sm:$0xff]   ;;  %v555_v39 = vcombine.high %v28_v34, %v28_v34  ;;  %v562_v42 = vrot.slane %v28_v34, %v4323_v41 }
   0xb   :  { %v3902_v26 = vld [vmem:[%s5124_s1 + $0x30] sm:$0xff]   ;;  %v3906_v31 = vld [vmem:[%s5124_s1 + $0x38] sm:$0xff]   ;;  %v3910_v38 = vld [vmem:[%s5124_s1 + $0x1c0] sm:$0xff]  }
   0xc   :  { %3473 = vmatpush3.bf16.msra.mxu0 %v3886_v10  ;;  %v3903_v27 = vld [vmem:[%s5124_s1 + $0xb0] sm:$0xff]   ;;  %v3907_v32 = vld [vmem:[%s5124_s1 + $0xb8] sm:$0xff]   ;;  %v4327_v43 = vrot.slane %v555_v39, %v4323_v41  ;;  %v570_v44 = vcombine.high %v562_v42, %v562_v42  ;;  %v578_v45 = vrot.slane %v562_v42, %v4323_v41  ;;  %v3911_v47 = vld [vmem:[%s5124_s1 + $0x100] sm:$0xff]  }
   0xd   :  { %3495 = vmatpush3.bf16.msra.mxu1 %v3887_v11  ;;  %3474 = vmatprep.subr.bf16.mxu0 %v3888_v12  ;;  %v3912_v49 = vld [vmem:[%s5124_s1 + $0x180] sm:$0xff]   ;;  %v3913_v52 = vld [vmem:[%s5124_s1 + $0x148] sm:$0xff]   ;;  %v3917_v58 = vld [vmem:[%s5124_s1 + $0x150] sm:$0xff]  }
   0xe   :  { %3496 = vmatprep.subr.bf16.mxu1 %v3889_v13  ;;  %v571_v46 = vcombine.high %v4327_v43, %v4327_v43  ;;  %v592_v48 = vrot.slane %v570_v44, %v4323_v41  ;;  %v600_v51 = vcombine.high %v578_v45, %v578_v45  ;;  %v3914_v54 = vld [vmem:[%s5124_s1 + $0x1c8] sm:$0xff]   ;;  %v3918_v59 = vld [vmem:[%s5124_s1 + $0x1d0] sm:$0xff]   ;;  %v3921_v62 = vld [vmem:[%s5124_s1 + $0x158] sm:$0xff]  }
   0xf   :  { %v3915_v55 = vld [vmem:[%s5124_s1 + $0x108] sm:$0xff]   ;;  %v3919_v60 = vld [vmem:[%s5124_s1 + $0x110] sm:$0xff]   ;;  %v3922_v63 = vld [vmem:[%s5124_s1 + $0x1d8] sm:$0xff]  }
  0x10   :  { %3475 = vmatpush3.bf16.msra.mxu0 %v3890_v14  ;;  %v599_v50 = vrot.slane %v571_v46, %v4323_v41  ;;  %2351 = vmatprep.mubr.bf16.mxu0 %v592_v48  ;;  %v602_v53 = vcombine.high %v592_v48, %v592_v48  ;;  %v3916_v57 = vld [vmem:[%s5124_s1 + $0x188] sm:$0xff]   ;;  %v3920_v61 = vld [vmem:[%s5124_s1 + $0x190] sm:$0xff]   ;;  %v3923_v0 = vld [vmem:[%s5124_s1 + $0x118] sm:$0xff]  }
  0x11   :  { %3497 = vmatpush3.bf16.msra.mxu1 %v3891_v15  ;;  %3476 = vmatprep.subr.bf16.mxu0 %v3892_v16  ;;  %v3924_v1 = vld [vmem:[%s5124_s1 + $0x198] sm:$0xff]   ;;  %v3925_v2 = vld [vmem:[%s5124_s1 + $0x160] sm:$0xff]   ;;  %v3929_v6 = vld [vmem:[%s5124_s1 + $0x168] sm:$0xff]  }
  0x12   :  { %3498 = vmatprep.subr.bf16.mxu1 %v3893_v17  ;;  %v603_v56 = vcombine.high %v599_v50, %v599_v50  ;;  %2391 = vmatprep.mubr.bf16.mxu1 %v602_v53  ;;  %v3926_v3 = vld [vmem:[%s5124_s1 + $0x1e0] sm:$0xff]   ;;  %v3930_v7 = vld [vmem:[%s5124_s1 + $0x1e8] sm:$0xff]   ;;  %v3933_v10 = vld [vmem:[%s5124_s1 + $0x170] sm:$0xff]  }
  0x13   :  { %v3927_v4 = vld [vmem:[%s5124_s1 + $0x120] sm:$0xff]   ;;  %v3931_v8 = vld [vmem:[%s5124_s1 + $0x128] sm:$0xff]   ;;  %v3934_v11 = vld [vmem:[%s5124_s1 + $0x1f0] sm:$0xff]  }
  0x14   :  { %3477 = vmatpush3.bf16.msra.mxu0 %v3894_v18  ;;  %v3928_v5 = vld [vmem:[%s5124_s1 + $0x1a0] sm:$0xff]   ;;  %v3932_v9 = vld [vmem:[%s5124_s1 + $0x1a8] sm:$0xff]   ;;  %v3935_v12 = vld [vmem:[%s5124_s1 + $0x130] sm:$0xff]   ;;  %v585_v18 = vrot.slane %v4327_v43, %v4323_v41 }
  0x15   :  { %3499 = vmatpush3.bf16.msra.mxu1 %v3895_v19  ;;  %3478 = vmatprep.subr.bf16.mxu0 %v3896_v20  ;;  %v3936_v13 = vld [vmem:[%s5124_s1 + $0x1b0] sm:$0xff]   ;;  %v3937_v14 = vld [vmem:[%s5124_s1 + $0x178] sm:$0xff]   ;;  %v3941_v19 = vld [vmem:[%s5124_s1 + $0x240] sm:$0xff]  }
  0x16   :  { %3500 = vmatprep.subr.bf16.mxu1 %v3897_v21  ;;  %v3938_v15 = vld [vmem:[%s5124_s1 + $0x1f8] sm:$0xff]   ;;  %v3942_v20 = vld [vmem:[%s5124_s1 + $0x2c0] sm:$0xff]   ;;  %v3949_v28 = vld [vmem:[%s5124_s1 + $0x250] sm:$0xff]  }
  0x17   :  { %v3939_v16 = vld [vmem:[%s5124_s1 + $0x138] sm:$0xff]   ;;  %v3943_v21 = vld [vmem:[%s5124_s1 + $0x200] sm:$0xff]   ;;  %v3961_v40 = vld [vmem:[%s5124_s1 + $0x268] sm:$0xff]  }
  0x18   :  { %3479 = vmatpush3.bf16.msra.mxu0 %v3898_v22  ;;  %v3940_v17 = vld [vmem:[%s5124_s1 + $0x1b8] sm:$0xff]   ;;  %v3944_v22 = vld [vmem:[%s5124_s1 + $0x280] sm:$0xff]   ;;  %v3962_v42 = vld [vmem:[%s5124_s1 + $0x2e8] sm:$0xff]  }
  0x19   :  { %3501 = vmatpush3.bf16.msra.mxu1 %v3899_v23  ;;  %3480 = vmatprep.subr.bf16.mxu0 %v3900_v24  ;;  %v601_v23 = vcombine.high %v585_v18, %v585_v18  ;;  %v3945_v24 = vld [vmem:[%s5124_s1 + $0x248] sm:$0xff]   ;;  %v3954_v33 = vld [vmem:[%s5124_s1 + $0x2d8] sm:$0xff]   ;;  %v3957_v36 = vld [vmem:[%s5124_s1 + $0x260] sm:$0xff]  }
  0x1a   :  { %3502 = vmatprep.subr.bf16.mxu1 %v3901_v25  ;;  %v3946_v25 = vld [vmem:[%s5124_s1 + $0x2c8] sm:$0xff]   ;;  %v3955_v34 = vld [vmem:[%s5124_s1 + $0x218] sm:$0xff]   ;;  %v3958_v37 = vld [vmem:[%s5124_s1 + $0x2e0] sm:$0xff]  }
  0x1b   :  { %v3960_v39 = vld [vmem:[%s5124_s1 + $0x2a0] sm:$0xff]   ;;  %v3963_v43 = vld [vmem:[%s5124_s1 + $0x228] sm:$0xff]  }
  0x1c   :  { %3481 = vmatpush3.bf16.msra.mxu0 %v3902_v26  ;;  %v3947_v26 = vld [vmem:[%s5124_s1 + $0x208] sm:$0xff]  }
  0x1d   :  { %3503 = vmatpush3.bf16.msra.mxu1 %v3903_v27  ;;  %3482 = vmatprep.subr.bf16.mxu0 %v3904_v29  ;;  %v3948_v27 = vld [vmem:[%s5124_s1 + $0x288] sm:$0xff]   ;;  %v3950_v29 = vld [vmem:[%s5124_s1 + $0x2d0] sm:$0xff]  }
  0x1e   :  { %3504 = vmatprep.subr.bf16.mxu1 %v3905_v30  ;;  %v3951_v30 = vld [vmem:[%s5124_s1 + $0x210] sm:$0xff]   ;;  %v3964_v44 = vld [vmem:[%s5124_s1 + $0x2a8] sm:$0xff]  }
  0x1f   :  { %v29_v46 = vld [vmem:[%s5123_s0 + $0x8] sm:$0xff] }
  0x20   :  { %3483 = vmatpush3.bf16.msra.mxu0 %v3906_v31  ;;  %v3952_v31 = vld [vmem:[%s5124_s1 + $0x290] sm:$0xff]   ;;  %v611_v48 = vrot.slane %v29_v46, %v4323_v41 }
  0x21   :  { %3505 = vmatpush3.bf16.msra.mxu1 %v3907_v32  ;;  %3512 = vmatprep.subr.bf16.mxu0 %v3909_v35  ;;  %v3953_v32 = vld [vmem:[%s5124_s1 + $0x258] sm:$0xff]  }
  0x22   :  { %3534 = vmatprep.subr.bf16.mxu1 %v3910_v38  ;;  %v3956_v35 = vld [vmem:[%s5124_s1 + $0x298] sm:$0xff]   ;;  %v3959_v38 = vld [vmem:[%s5124_s1 + $0x220] sm:$0xff]  }
  0x23   :  { %2352 = vmatmul.mubr.bf16.vlgmr.msra.gmra.mrb[0].mxu0 %v578_v45  ;;  %v3965_v45 = vld [vmem:[%s5124_s1 + $0x270] sm:$0xff]  }
  0x24   :  { %3513 = vmatpush3.bf16.msra.mxu0 %v3911_v47  ;;  %2392 = vmatmul.mubr.bf16.vlgmr.msra.gmra.mrb[0].mxu1 %v600_v51  ;;  %v3966_v47 = vld [vmem:[%s5124_s1 + $0x2f0] sm:$0xff]  }
  0x25   :  { %3514 = vmatprep.subr.bf16.mxu0 %v3913_v52  ;;  %3535 = vmatpush3.bf16.msra.mxu1 %v3912_v49  ;;  %v604_v49 = vcombine.high %v29_v46, %v29_v46  ;;  %v3968_v51 = vld [vmem:[%s5124_s1 + $0x2b0] sm:$0xff]   ;;  %v619_v52 = vcombine.high %v611_v48, %v611_v48 }
  0x26   :  { %2431 = vmatprep.mubr.bf16.mxu0 %v599_v50  ;;  %3536 = vmatprep.subr.bf16.mxu1 %v3914_v54  ;;  %v3967_v50 = vld [vmem:[%s5124_s1 + $0x230] sm:$0xff]   ;;  %v3969_v54 = vld [vmem:[%s5124_s1 + $0x278] sm:$0xff]  }
  0x27   :  { %2471 = vmatprep.mubr.bf16.mxu1 %v603_v56  ;;  %v4515_v53 = vrot.slane %v604_v49, %v4323_v41  ;;  %v641_v56 = vrot.slane %v619_v52, %v4323_v41  ;;  %v4016_v46 = vld [vmem:[%s5124_s1 + $0x410] sm:$0xff]   ;;  %v4019_v49 = vld [vmem:[%s5124_s1 + $0x4d8] sm:$0xff]   ;;  %v4022_v52 = vld [vmem:[%s5124_s1 + $0x460] sm:$0xff]  }
  0x28   :  { %3515 = vmatpush3.bf16.msra.mxu0 %v3915_v55  ;;  %v3970_v55 = vld [vmem:[%s5124_s1 + $0x2f8] sm:$0xff]  }
  0x29   :  { %3516 = vmatprep.subr.bf16.mxu0 %v3917_v58  ;;  %3537 = vmatpush3.bf16.msra.mxu1 %v3916_v57  ;;  %v620_v57 = vcombine.high %v4515_v53, %v4515_v53  ;;  %v3971_v58 = vld [vmem:[%s5124_s1 + $0x238] sm:$0xff]  }
  0x2a   :  { %3538 = vmatprep.subr.bf16.mxu1 %v3918_v59  ;;  %v3972_v59 = vld [vmem:[%s5124_s1 + $0x2b8] sm:$0xff]  }
  0x2c   :  { %3517 = vmatpush3.bf16.msra.mxu0 %v3919_v60  ;;  %v651_v60 = vcombine.high %v641_v56, %v641_v56 }
  0x2d   :  { %3518 = vmatprep.subr.bf16.mxu0 %v3921_v62  ;;  %3539 = vmatpush3.bf16.msra.mxu1 %v3920_v61  ;;  %v627_v61 = vrot.slane %v611_v48, %v4323_v41  ;;  %v3973_v62 = vld [vmem:[%s5124_s1 + $0x340] sm:$0xff]   ;;  %v4018_v48 = vld [vmem:[%s5124_s1 + $0x458] sm:$0xff]  }
  0x2e   :  { %3540 = vmatprep.subr.bf16.mxu1 %v3922_v63  ;;  %v3974_v63 = vld [vmem:[%s5124_s1 + $0x3c0] sm:$0xff]  }
  0x30   :  { %3519 = vmatpush3.bf16.msra.mxu0 %v3923_v0  ;;  %v648_v0 = vrot.slane %v620_v57, %v4323_v41  ;;  %v4027_v57 = vld [vmem:[%s5124_s1 + $0x4e8] sm:$0xff]  }
  0x31   :  { %3520 = vmatprep.subr.bf16.mxu0 %v3925_v2  ;;  %3541 = vmatpush3.bf16.msra.mxu1 %v3924_v1  ;;  %v3975_v1 = vld [vmem:[%s5124_s1 + $0x300] sm:$0xff]  }
  0x32   :  { %3542 = vmatprep.subr.bf16.mxu1 %v3926_v3  ;;  %v3976_v2 = vld [vmem:[%s5124_s1 + $0x380] sm:$0xff]   ;;  %v649_v3 = vcombine.high %v627_v61, %v627_v61 }
  0x34   :  { %3521 = vmatpush3.bf16.msra.mxu0 %v3927_v4  ;;  %v3977_v4 = vld [vmem:[%s5124_s1 + $0x348] sm:$0xff]  }
  0x35   :  { %3522 = vmatprep.subr.bf16.mxu0 %v3929_v6  ;;  %3543 = vmatpush3.bf16.msra.mxu1 %v3928_v5  ;;  %v3978_v5 = vld [vmem:[%s5124_s1 + $0x3c8] sm:$0xff]   ;;  %v652_v6 = vcombine.high %v648_v0, %v648_v0 }
  0x36   :  { %3544 = vmatprep.subr.bf16.mxu1 %v3930_v7  ;;  %v3979_v7 = vld [vmem:[%s5124_s1 + $0x308] sm:$0xff]  }
  0x38   :  { %3523 = vmatpush3.bf16.msra.mxu0 %v3931_v8  ;;  %v3980_v8 = vld [vmem:[%s5124_s1 + $0x388] sm:$0xff]  }
  0x39   :  { %3524 = vmatprep.subr.bf16.mxu0 %v3933_v10  ;;  %3545 = vmatpush3.bf16.msra.mxu1 %v3932_v9  ;;  %v3981_v9 = vld [vmem:[%s5124_s1 + $0x350] sm:$0xff]  }
  0x3a   :  { %3546 = vmatprep.subr.bf16.mxu1 %v3934_v11  ;;  %v3982_v10 = vld [vmem:[%s5124_s1 + $0x3d0] sm:$0xff]  }
  0x3b   :  { %v3983_v11 = vld [vmem:[%s5124_s1 + $0x310] sm:$0xff]  }
  0x3c   :  { %3525 = vmatpush3.bf16.msra.mxu0 %v3935_v12  ;;  %v3984_v12 = vld [vmem:[%s5124_s1 + $0x390] sm:$0xff]  }
  0x3d   :  { %3526 = vmatprep.subr.bf16.mxu0 %v3937_v14  ;;  %3547 = vmatpush3.bf16.msra.mxu1 %v3936_v13  ;;  %v3985_v13 = vld [vmem:[%s5124_s1 + $0x358] sm:$0xff]  }
  0x3e   :  { %3548 = vmatprep.subr.bf16.mxu1 %v3938_v15  ;;  %v3986_v14 = vld [vmem:[%s5124_s1 + $0x3d8] sm:$0xff]  }
  0x3f   :  { %v3987_v15 = vld [vmem:[%s5124_s1 + $0x318] sm:$0xff]  }
  0x40   :  { %3527 = vmatpush3.bf16.msra.mxu0 %v3939_v16  ;;  %v3988_v16 = vld [vmem:[%s5124_s1 + $0x398] sm:$0xff]  }
  0x41   :  { %3556 = vmatprep.subr.bf16.mxu0 %v3941_v19  ;;  %3549 = vmatpush3.bf16.msra.mxu1 %v3940_v17  ;;  %v3989_v17 = vld [vmem:[%s5124_s1 + $0x360] sm:$0xff]  }
  0x42   :  { %3578 = vmatprep.subr.bf16.mxu1 %v3942_v20  ;;  %v3991_v19 = vld [vmem:[%s5124_s1 + $0x320] sm:$0xff]  }
  0x43   :  { %2432 = vmatmul.mubr.bf16.vlgmr.msra.gmra.mrb[4].mxu0 %v585_v18  ;;  %v3990_v18 = vld [vmem:[%s5124_s1 + $0x3e0] sm:$0xff]  }
  0x44   :  { %3557 = vmatpush3.bf16.msra.mxu0 %v3943_v21  ;;  %2472 = vmatmul.mubr.bf16.vlgmr.msra.gmra.mrb[4].mxu1 %v601_v23  ;;  %v3992_v20 = vld [vmem:[%s5124_s1 + $0x3a0] sm:$0xff]   ;;  %v3993_v21 = vld [vmem:[%s5124_s1 + $0x368] sm:$0xff]  }
  0x45   :  { %3558 = vmatprep.subr.bf16.mxu0 %v3945_v24  ;;  %3579 = vmatpush3.bf16.msra.mxu1 %v3944_v22  ;;  %v3994_v22 = vld [vmem:[%s5124_s1 + $0x3e8] sm:$0xff]  }
  0x46   :  { %3580 = vmatprep.subr.bf16.mxu1 %v3946_v25  ;;  %2511 = vmatprep.mubr.bf16.mxu0 %v641_v56  ;;  %v3995_v23 = vld [vmem:[%s5124_s1 + $0x328] sm:$0xff]   ;;  %v3997_v25 = vld [vmem:[%s5124_s1 + $0x370] sm:$0xff]  }
  0x47   :  { %2551 = vmatprep.mubr.bf16.mxu1 %v651_v60  ;;  %v3996_v24 = vld [vmem:[%s5124_s1 + $0x3a8] sm:$0xff]   ;;  %v4030_v60 = vld [vmem:[%s5124_s1 + $0x470] sm:$0xff]  }
  0x48   :  { %3559 = vmatpush3.bf16.msra.mxu0 %v3947_v26  ;;  %v3998_v26 = vld [vmem:[%s5124_s1 + $0x3f0] sm:$0xff]   ;;  %v4026_v56 = vld [vmem:[%s5124_s1 + $0x468] sm:$0xff]  }
  0x49   :  { %3560 = vmatprep.subr.bf16.mxu0 %v3949_v28  ;;  %3581 = vmatpush3.bf16.msra.mxu1 %v3948_v27  ;;  %v3999_v27 = vld [vmem:[%s5124_s1 + $0x330] sm:$0xff]  }
  0x4a   :  { %3582 = vmatprep.subr.bf16.mxu1 %v3950_v29  ;;  %v4000_v28 = vld [vmem:[%s5124_s1 + $0x3b0] sm:$0xff]   ;;  %v4001_v29 = vld [vmem:[%s5124_s1 + $0x378] sm:$0xff]  }
  0x4c   :  { %3561 = vmatpush3.bf16.msra.mxu0 %v3951_v30  ;;  %v4002_v30 = vld [vmem:[%s5124_s1 + $0x3f8] sm:$0xff]  }
  0x4d   :  { %3562 = vmatprep.subr.bf16.mxu0 %v3953_v32  ;;  %3583 = vmatpush3.bf16.msra.mxu1 %v3952_v31  ;;  %v4003_v31 = vld [vmem:[%s5124_s1 + $0x338] sm:$0xff]  }
  0x4e   :  { %3584 = vmatprep.subr.bf16.mxu1 %v3954_v33  ;;  %v4004_v32 = vld [vmem:[%s5124_s1 + $0x3b8] sm:$0xff]   ;;  %v634_v33 = vrot.slane %v4515_v53, %v4323_v41  ;;  %v4023_v53 = vld [vmem:[%s5124_s1 + $0x4e0] sm:$0xff]  }
  0x50   :  { %3563 = vmatpush3.bf16.msra.mxu0 %v3955_v34  ;;  %v4006_v34 = vld [vmem:[%s5124_s1 + $0x440] sm:$0xff]  }
  0x51   :  { %3564 = vmatprep.subr.bf16.mxu0 %v3957_v36  ;;  %3585 = vmatpush3.bf16.msra.mxu1 %v3956_v35  ;;  %v4007_v35 = vld [vmem:[%s5124_s1 + $0x4c0] sm:$0xff]  }
  0x52   :  { %3586 = vmatprep.subr.bf16.mxu1 %v3958_v37  ;;  %v4008_v36 = vld [vmem:[%s5124_s1 + $0x400] sm:$0xff]  }
  0x53   :  { %v4009_v37 = vld [vmem:[%s5124_s1 + $0x480] sm:$0xff]  }
  0x54   :  { %3565 = vmatpush3.bf16.msra.mxu0 %v3959_v38  ;;  %v650_v38 = vcombine.high %v634_v33, %v634_v33 }
  0x55   :  { %3566 = vmatprep.subr.bf16.mxu0 %v3961_v40  ;;  %3587 = vmatpush3.bf16.msra.mxu1 %v3960_v39  ;;  %v4010_v39 = vld [vmem:[%s5124_s1 + $0x448] sm:$0xff]  }
  0x56   :  { %3588 = vmatprep.subr.bf16.mxu1 %v3962_v42  ;;  %v4011_v40 = vld [vmem:[%s5124_s1 + $0x4c8] sm:$0xff]  }
  0x57   :  { %v4012_v42 = vld [vmem:[%s5124_s1 + $0x408] sm:$0xff]  }
  0x58   :  { %3567 = vmatpush3.bf16.msra.mxu0 %v3963_v43  ;;  %v4013_v43 = vld [vmem:[%s5124_s1 + $0x488] sm:$0xff]  }
  0x59   :  { %3568 = vmatprep.subr.bf16.mxu0 %v3965_v45  ;;  %3589 = vmatpush3.bf16.msra.mxu1 %v3964_v44  ;;  %v4014_v44 = vld [vmem:[%s5124_s1 + $0x450] sm:$0xff]  }
  0x5a   :  { %3590 = vmatprep.subr.bf16.mxu1 %v3966_v47  ;;  %v4015_v45 = vld [vmem:[%s5124_s1 + $0x4d0] sm:$0xff]  }
  0x5b   :  { %v4017_v47 = vld [vmem:[%s5124_s1 + $0x490] sm:$0xff]  }
  0x5c   :  { %3569 = vmatpush3.bf16.msra.mxu0 %v3967_v50  ;;  %v4020_v50 = vld [vmem:[%s5124_s1 + $0x418] sm:$0xff]  }
  0x5d   :  { %3570 = vmatprep.subr.bf16.mxu0 %v3969_v54  ;;  %3591 = vmatpush3.bf16.msra.mxu1 %v3968_v51  ;;  %v4021_v51 = vld [vmem:[%s5124_s1 + $0x498] sm:$0xff]   ;;  %v4024_v54 = vld [vmem:[%s5124_s1 + $0x420] sm:$0xff]  }
  0x5e   :  { %3592 = vmatprep.subr.bf16.mxu1 %v3970_v55  ;;  %v4025_v55 = vld [vmem:[%s5124_s1 + $0x4a0] sm:$0xff]  }
  0x60   :  { %3571 = vmatpush3.bf16.msra.mxu0 %v3971_v58  ;;  %v4028_v58 = vld [vmem:[%s5124_s1 + $0x428] sm:$0xff]  }
  0x61   :  { %3600 = vmatprep.subr.bf16.mxu0 %v3973_v62  ;;  %3593 = vmatpush3.bf16.msra.mxu1 %v3972_v59  ;;  %v4029_v59 = vld [vmem:[%s5124_s1 + $0x4a8] sm:$0xff]   ;;  %v4031_v62 = vld [vmem:[%s5124_s1 + $0x4f0] sm:$0xff]  }
  0x62   :  { %3622 = vmatprep.subr.bf16.mxu1 %v3974_v63 }
  0x63   :  { %2512 = vmatmul.mubr.bf16.vlgmr.msra.gmra.mrb[8].mxu0 %v627_v61  ;;  %v30_v61 = vld [vmem:[%s5123_s0 + $0x10] sm:$0xff] }
  0x64   :  { %3601 = vmatpush3.bf16.msra.mxu0 %v3975_v1  ;;  %2591 = vmatprep.mubr.bf16.mxu0 %v648_v0  ;;  %v660_v63 = vrot.slane %v30_v61, %v4323_v41  ;;  %v653_v0 = vcombine.high %v30_v61, %v30_v61  ;;  %v4032_v1 = vld [vmem:[%s5124_s1 + $0x430] sm:$0xff]  }
  0x65   :  { %2552 = vmatmul.mubr.bf16.vlgmr.msra.gmra.mrb[8].mxu1 %v649_v3  ;;  %3602 = vmatprep.subr.bf16.mxu0 %v3977_v4  ;;  %v4081_v61 = vld [vmem:[%s5124_s1 + $0x610] sm:$0xff]  }
  0x66   :  { %3623 = vmatpush3.bf16.msra.mxu1 %v3976_v2  ;;  %2631 = vmatprep.mubr.bf16.mxu1 %v652_v6  ;;  %v4033_v2 = vld [vmem:[%s5124_s1 + $0x4b0] sm:$0xff]   ;;  %v668_v3 = vcombine.high %v660_v63, %v660_v63  ;;  %v4721_v4 = vrot.slane %v653_v0, %v4323_v41  ;;  %v4035_v6 = vld [vmem:[%s5124_s1 + $0x4f8] sm:$0xff]  }
  0x67   :  { %3624 = vmatprep.subr.bf16.mxu1 %v3978_v5  ;;  %v4034_v5 = vld [vmem:[%s5124_s1 + $0x478] sm:$0xff]  }
  0x68   :  { %3603 = vmatpush3.bf16.msra.mxu0 %v3979_v7  ;;  %v690_v7 = vrot.slane %v668_v3, %v4323_v41  ;;  %v4084_v0 = vld [vmem:[%s5124_s1 + $0x6d8] sm:$0xff]   ;;  %v4087_v3 = vld [vmem:[%s5124_s1 + $0x660] sm:$0xff]  }
  0x69   :  { %3604 = vmatprep.subr.bf16.mxu0 %v3981_v9  ;;  %v4036_v9 = vld [vmem:[%s5124_s1 + $0x438] sm:$0xff]  }
  0x6a   :  { %3625 = vmatpush3.bf16.msra.mxu1 %v3980_v8  ;;  %v669_v8 = vcombine.high %v4721_v4, %v4721_v4 }
  0x6b   :  { %3626 = vmatprep.subr.bf16.mxu1 %v3982_v10  ;;  %v4037_v10 = vld [vmem:[%s5124_s1 + $0x4b8] sm:$0xff]  }
  0x6c   :  { %3605 = vmatpush3.bf16.msra.mxu0 %v3983_v11  ;;  %v700_v11 = vcombine.high %v690_v7, %v690_v7 }
  0x6d   :  { %3606 = vmatprep.subr.bf16.mxu0 %v3985_v13  ;;  %v4038_v13 = vld [vmem:[%s5124_s1 + $0x540] sm:$0xff]  }
  0x6e   :  { %3627 = vmatpush3.bf16.msra.mxu1 %v3984_v12  ;;  %v676_v12 = vrot.slane %v660_v63, %v4323_v41  ;;  %v4083_v63 = vld [vmem:[%s5124_s1 + $0x658] sm:$0xff]  }
  0x6f   :  { %3628 = vmatprep.subr.bf16.mxu1 %v3986_v14  ;;  %v4039_v14 = vld [vmem:[%s5124_s1 + $0x5c0] sm:$0xff]  }
  0x70   :  { %3607 = vmatpush3.bf16.msra.mxu0 %v3987_v15  ;;  %v697_v15 = vrot.slane %v669_v8, %v4323_v41  ;;  %v4092_v8 = vld [vmem:[%s5124_s1 + $0x6e8] sm:$0xff]  }
  0x71   :  { %3608 = vmatprep.subr.bf16.mxu0 %v3989_v17  ;;  %v4041_v17 = vld [vmem:[%s5124_s1 + $0x580] sm:$0xff]  }
  0x72   :  { %3629 = vmatpush3.bf16.msra.mxu1 %v3988_v16  ;;  %v4040_v16 = vld [vmem:[%s5124_s1 + $0x500] sm:$0xff]  }
  0x73   :  { %3630 = vmatprep.subr.bf16.mxu1 %v3990_v18  ;;  %v698_v18 = vcombine.high %v676_v12, %v676_v12 }
  0x74   :  { %3609 = vmatpush3.bf16.msra.mxu0 %v3991_v19  ;;  %v4042_v19 = vld [vmem:[%s5124_s1 + $0x548] sm:$0xff]  }
  0x75   :  { %3610 = vmatprep.subr.bf16.mxu0 %v3993_v21  ;;  %v701_v21 = vcombine.high %v697_v15, %v697_v15 }
  0x76   :  { %3631 = vmatpush3.bf16.msra.mxu1 %v3992_v20  ;;  %v4043_v20 = vld [vmem:[%s5124_s1 + $0x5c8] sm:$0xff]  }
  0x77   :  { %3632 = vmatprep.subr.bf16.mxu1 %v3994_v22  ;;  %v4044_v22 = vld [vmem:[%s5124_s1 + $0x508] sm:$0xff]  }
  0x78   :  { %3611 = vmatpush3.bf16.msra.mxu0 %v3995_v23  ;;  %v4045_v23 = vld [vmem:[%s5124_s1 + $0x588] sm:$0xff]  }
  0x79   :  { %3612 = vmatprep.subr.bf16.mxu0 %v3997_v25  ;;  %v4047_v25 = vld [vmem:[%s5124_s1 + $0x5d0] sm:$0xff]  }
  0x7a   :  { %3633 = vmatpush3.bf16.msra.mxu1 %v3996_v24  ;;  %v4046_v24 = vld [vmem:[%s5124_s1 + $0x550] sm:$0xff]  }
  0x7b   :  { %3634 = vmatprep.subr.bf16.mxu1 %v3998_v26  ;;  %v4048_v26 = vld [vmem:[%s5124_s1 + $0x510] sm:$0xff]  }
  0x7c   :  { %3613 = vmatpush3.bf16.msra.mxu0 %v3999_v27  ;;  %v4049_v27 = vld [vmem:[%s5124_s1 + $0x590] sm:$0xff]  }
  0x7d   :  { %3614 = vmatprep.subr.bf16.mxu0 %v4001_v29  ;;  %v4051_v29 = vld [vmem:[%s5124_s1 + $0x5d8] sm:$0xff]  }
  0x7e   :  { %3635 = vmatpush3.bf16.msra.mxu1 %v4000_v28  ;;  %v4050_v28 = vld [vmem:[%s5124_s1 + $0x558] sm:$0xff]  }
  0x7f   :  { %3636 = vmatprep.subr.bf16.mxu1 %v4002_v30  ;;  %v4052_v30 = vld [vmem:[%s5124_s1 + $0x518] sm:$0xff]  }
  0x80   :  { %3615 = vmatpush3.bf16.msra.mxu0 %v4003_v31  ;;  %v4053_v31 = vld [vmem:[%s5124_s1 + $0x598] sm:$0xff]  }
  0x81   :  { %3644 = vmatprep.subr.bf16.mxu0 %v4006_v34  ;;  %v4056_v34 = vld [vmem:[%s5124_s1 + $0x520] sm:$0xff]  }
  0x82   :  { %3637 = vmatpush3.bf16.msra.mxu1 %v4004_v32  ;;  %v4054_v32 = vld [vmem:[%s5124_s1 + $0x560] sm:$0xff]  }
  0x83   :  { %2592 = vmatmul.mubr.bf16.vlgmr.msra.gmra.mrb[12].mxu0 %v634_v33  ;;  %3666 = vmatprep.subr.bf16.mxu1 %v4007_v35  ;;  %v4055_v33 = vld [vmem:[%s5124_s1 + $0x5e0] sm:$0xff]  }
  0x84   :  { %3645 = vmatpush3.bf16.msra.mxu0 %v4008_v36  ;;  %2671 = vmatprep.mubr.bf16.mxu0 %v690_v7  ;;  %v4057_v35 = vld [vmem:[%s5124_s1 + $0x5a0] sm:$0xff]   ;;  %v4058_v36 = vld [vmem:[%s5124_s1 + $0x568] sm:$0xff]  }
  0x85   :  { %2632 = vmatmul.mubr.bf16.vlgmr.msra.gmra.mrb[12].mxu1 %v650_v38  ;;  %3646 = vmatprep.subr.bf16.mxu0 %v4010_v39  ;;  %v4060_v38 = vld [vmem:[%s5124_s1 + $0x528] sm:$0xff]  }
  0x86   :  { %3667 = vmatpush3.bf16.msra.mxu1 %v4009_v37  ;;  %2711 = vmatprep.mubr.bf16.mxu1 %v700_v11  ;;  %v4059_v37 = vld [vmem:[%s5124_s1 + $0x5e8] sm:$0xff]   ;;  %v4095_v11 = vld [vmem:[%s5124_s1 + $0x670] sm:$0xff]  }
  0x87   :  { %3668 = vmatprep.subr.bf16.mxu1 %v4011_v40  ;;  %v4061_v39 = vld [vmem:[%s5124_s1 + $0x5a8] sm:$0xff]   ;;  %v4062_v40 = vld [vmem:[%s5124_s1 + $0x570] sm:$0xff]  }
  0x88   :  { %3647 = vmatpush3.bf16.msra.mxu0 %v4012_v42  ;;  %v4063_v42 = vld [vmem:[%s5124_s1 + $0x5f0] sm:$0xff]   ;;  %v4091_v7 = vld [vmem:[%s5124_s1 + $0x668] sm:$0xff]  }
  0x89   :  { %3648 = vmatprep.subr.bf16.mxu0 %v4014_v44  ;;  %v4065_v44 = vld [vmem:[%s5124_s1 + $0x5b0] sm:$0xff]  }
  0x8a   :  { %3669 = vmatpush3.bf16.msra.mxu1 %v4013_v43  ;;  %v4064_v43 = vld [vmem:[%s5124_s1 + $0x530] sm:$0xff]  }
  0x8b   :  { %3670 = vmatprep.subr.bf16.mxu1 %v4015_v45  ;;  %v4066_v45 = vld [vmem:[%s5124_s1 + $0x578] sm:$0xff]  }
  0x8c   :  { %3649 = vmatpush3.bf16.msra.mxu0 %v4016_v46  ;;  %v4067_v46 = vld [vmem:[%s5124_s1 + $0x5f8] sm:$0xff]  }
  0x8d   :  { %3650 = vmatprep.subr.bf16.mxu0 %v4018_v48  ;;  %v4069_v48 = vld [vmem:[%s5124_s1 + $0x5b8] sm:$0xff]  }
  0x8e   :  { %3671 = vmatpush3.bf16.msra.mxu1 %v4017_v47  ;;  %v4068_v47 = vld [vmem:[%s5124_s1 + $0x538] sm:$0xff]  }
  0x8f   :  { %3672 = vmatprep.subr.bf16.mxu1 %v4019_v49  ;;  %v683_v49 = vrot.slane %v4721_v4, %v4323_v41  ;;  %v4088_v4 = vld [vmem:[%s5124_s1 + $0x6e0] sm:$0xff]  }
  0x90   :  { %3651 = vmatpush3.bf16.msra.mxu0 %v4020_v50  ;;  %v4071_v50 = vld [vmem:[%s5124_s1 + $0x640] sm:$0xff]  }
  0x91   :  { %3652 = vmatprep.subr.bf16.mxu0 %v4022_v52  ;;  %v4073_v52 = vld [vmem:[%s5124_s1 + $0x600] sm:$0xff]  }
  0x92   :  { %3673 = vmatpush3.bf16.msra.mxu1 %v4021_v51  ;;  %v4072_v51 = vld [vmem:[%s5124_s1 + $0x6c0] sm:$0xff]  }
  0x93   :  { %3674 = vmatprep.subr.bf16.mxu1 %v4023_v53  ;;  %v4074_v53 = vld [vmem:[%s5124_s1 + $0x680] sm:$0xff]  }
  0x94   :  { %3653 = vmatpush3.bf16.msra.mxu0 %v4024_v54  ;;  %v699_v54 = vcombine.high %v683_v49, %v683_v49 }
  0x95   :  { %3654 = vmatprep.subr.bf16.mxu0 %v4026_v56  ;;  %v4076_v56 = vld [vmem:[%s5124_s1 + $0x6c8] sm:$0xff]  }
  0x96   :  { %3675 = vmatpush3.bf16.msra.mxu1 %v4025_v55  ;;  %v4075_v55 = vld [vmem:[%s5124_s1 + $0x648] sm:$0xff]  }
  0x97   :  { %3676 = vmatprep.subr.bf16.mxu1 %v4027_v57  ;;  %v4077_v57 = vld [vmem:[%s5124_s1 + $0x608] sm:$0xff]  }
  0x98   :  { %3655 = vmatpush3.bf16.msra.mxu0 %v4028_v58  ;;  %v4078_v58 = vld [vmem:[%s5124_s1 + $0x688] sm:$0xff]  }
  0x99   :  { %3656 = vmatprep.subr.bf16.mxu0 %v4030_v60  ;;  %v4080_v60 = vld [vmem:[%s5124_s1 + $0x6d0] sm:$0xff]  }
  0x9a   :  { %3677 = vmatpush3.bf16.msra.mxu1 %v4029_v59  ;;  %v4079_v59 = vld [vmem:[%s5124_s1 + $0x650] sm:$0xff]  }
  0x9b   :  { %3678 = vmatprep.subr.bf16.mxu1 %v4031_v62  ;;  %v4082_v62 = vld [vmem:[%s5124_s1 + $0x690] sm:$0xff]  }
  0x9c   :  { %3657 = vmatpush3.bf16.msra.mxu0 %v4032_v1  ;;  %v4085_v1 = vld [vmem:[%s5124_s1 + $0x618] sm:$0xff]  }
  0x9d   :  { %3658 = vmatprep.subr.bf16.mxu0 %v4034_v5  ;;  %v4089_v5 = vld [vmem:[%s5124_s1 + $0x620] sm:$0xff]  }
  0x9e   :  { %3679 = vmatpush3.bf16.msra.mxu1 %v4033_v2  ;;  %v4086_v2 = vld [vmem:[%s5124_s1 + $0x698] sm:$0xff]  }
  0x9f   :  { %3680 = vmatprep.subr.bf16.mxu1 %v4035_v6  ;;  %v4090_v6 = vld [vmem:[%s5124_s1 + $0x6a0] sm:$0xff]  }
  0xa0   :  { %3659 = vmatpush3.bf16.msra.mxu0 %v4036_v9  ;;  %v4093_v9 = vld [vmem:[%s5124_s1 + $0x628] sm:$0xff]  }
  0xa1   :  { %3688 = vmatprep.subr.bf16.mxu0 %v4038_v13  ;;  %v4096_v13 = vld [vmem:[%s5124_s1 + $0x6f0] sm:$0xff]  }
  0xa2   :  { %3681 = vmatpush3.bf16.msra.mxu1 %v4037_v10  ;;  %v4094_v10 = vld [vmem:[%s5124_s1 + $0x6a8] sm:$0xff]  }
  0xa3   :  { %2672 = vmatmul.mubr.bf16.vlgmr.msra.gmra.mrb[16].mxu0 %v676_v12  ;;  %3710 = vmatprep.subr.bf16.mxu1 %v4039_v14  ;;  %v31_v12 = vld [vmem:[%s5123_s0 + $0x18] sm:$0xff] }
  0xa4   :  { %3689 = vmatpush3.bf16.msra.mxu0 %v4040_v16  ;;  %2751 = vmatprep.mubr.bf16.mxu0 %v697_v15  ;;  %v709_v14 = vrot.slane %v31_v12, %v4323_v41  ;;  %v702_v15 = vcombine.high %v31_v12, %v31_v12  ;;  %v4097_v16 = vld [vmem:[%s5124_s1 + $0x630] sm:$0xff]   ;;  %v4134_v12 = vld [vmem:[%s5124_s1 + $0x7b8] sm:$0xff]  }
  0xa5   :  { %2712 = vmatmul.mubr.bf16.vlgmr.msra.gmra.mrb[16].mxu1 %v698_v18  ;;  %3690 = vmatprep.subr.bf16.mxu0 %v4042_v19 }
  0xa6   :  { %3711 = vmatpush3.bf16.msra.mxu1 %v4041_v17  ;;  %2791 = vmatprep.mubr.bf16.mxu1 %v701_v21  ;;  %v4099_v17 = vld [vmem:[%s5124_s1 + $0x678] sm:$0xff]   ;;  %v717_v18 = vcombine.high %v709_v14, %v709_v14  ;;  %v4927_v19 = vrot.slane %v702_v15, %v4323_v41 }
  0xa7   :  { %3712 = vmatprep.subr.bf16.mxu1 %v4043_v20  ;;  %v4098_v20 = vld [vmem:[%s5124_s1 + $0x6b0] sm:$0xff]   ;;  %v4100_v21 = vld [vmem:[%s5124_s1 + $0x6f8] sm:$0xff]  }
  0xa8   :  { %3691 = vmatpush3.bf16.msra.mxu0 %v4044_v22  ;;  %v739_v22 = vrot.slane %v717_v18, %v4323_v41 }
  0xa9   :  { %3692 = vmatprep.subr.bf16.mxu0 %v4046_v24  ;;  %v4101_v24 = vld [vmem:[%s5124_s1 + $0x638] sm:$0xff]  }
  0xaa   :  { %3713 = vmatpush3.bf16.msra.mxu1 %v4045_v23  ;;  %v718_v23 = vcombine.high %v4927_v19, %v4927_v19 }
  0xab   :  { %3714 = vmatprep.subr.bf16.mxu1 %v4047_v25  ;;  %v749_v25 = vcombine.high %v739_v22, %v739_v22 }
  0xac   :  { %3693 = vmatpush3.bf16.msra.mxu0 %v4048_v26  ;;  %v725_v26 = vrot.slane %v709_v14, %v4323_v41 }
  0xad   :  { %3694 = vmatprep.subr.bf16.mxu0 %v4050_v28  ;;  %v4102_v28 = vld [vmem:[%s5124_s1 + $0x6b8] sm:$0xff]  }
  0xae   :  { %3715 = vmatpush3.bf16.msra.mxu1 %v4049_v27  ;;  %v4103_v27 = vld [vmem:[%s5124_s1 + $0x740] sm:$0xff]  }
  0xaf   :  { %3716 = vmatprep.subr.bf16.mxu1 %v4051_v29  ;;  %v746_v29 = vrot.slane %v718_v23, %v4323_v41 }
  0xb0   :  { %3695 = vmatpush3.bf16.msra.mxu0 %v4052_v30  ;;  %v4104_v30 = vld [vmem:[%s5124_s1 + $0x7c0] sm:$0xff]  }
  0xb1   :  { %3696 = vmatprep.subr.bf16.mxu0 %v4054_v32  ;;  %v747_v32 = vcombine.high %v725_v26, %v725_v26 }
  0xb2   :  { %3717 = vmatpush3.bf16.msra.mxu1 %v4053_v31  ;;  %v4105_v31 = vld [vmem:[%s5124_s1 + $0x700] sm:$0xff]  }
  0xb3   :  { %3718 = vmatprep.subr.bf16.mxu1 %v4055_v33  ;;  %v4107_v33 = vld [vmem:[%s5124_s1 + $0x748] sm:$0xff]  }
  0xb4   :  { %3697 = vmatpush3.bf16.msra.mxu0 %v4056_v34  ;;  %v4106_v34 = vld [vmem:[%s5124_s1 + $0x780] sm:$0xff]  }
  0xb5   :  { %3698 = vmatprep.subr.bf16.mxu0 %v4058_v36  ;;  %v4108_v36 = vld [vmem:[%s5124_s1 + $0x7c8] sm:$0xff]  }
  0xb6   :  { %3719 = vmatpush3.bf16.msra.mxu1 %v4057_v35  ;;  %v750_v35 = vcombine.high %v746_v29, %v746_v29 }
  0xb7   :  { %3720 = vmatprep.subr.bf16.mxu1 %v4059_v37  ;;  %v4109_v37 = vld [vmem:[%s5124_s1 + $0x708] sm:$0xff]  }
  0xb8   :  { %3699 = vmatpush3.bf16.msra.mxu0 %v4060_v38  ;;  %v4111_v38 = vld [vmem:[%s5124_s1 + $0x750] sm:$0xff]  }
  0xb9   :  { %3700 = vmatprep.subr.bf16.mxu0 %v4062_v40  ;;  %v4112_v40 = vld [vmem:[%s5124_s1 + $0x7d0] sm:$0xff]  }
  0xba   :  { %3721 = vmatpush3.bf16.msra.mxu1 %v4061_v39  ;;  %v4110_v39 = vld [vmem:[%s5124_s1 + $0x788] sm:$0xff]  }
  0xbb   :  { %3722 = vmatprep.subr.bf16.mxu1 %v4063_v42  ;;  %v4113_v42 = vld [vmem:[%s5124_s1 + $0x710] sm:$0xff]  }
  0xbc   :  { %3701 = vmatpush3.bf16.msra.mxu0 %v4064_v43  ;;  %v4115_v43 = vld [vmem:[%s5124_s1 + $0x758] sm:$0xff]  }
  0xbd   :  { %3702 = vmatprep.subr.bf16.mxu0 %v4066_v45  ;;  %v4116_v45 = vld [vmem:[%s5124_s1 + $0x7d8] sm:$0xff]  }
  0xbe   :  { %3723 = vmatpush3.bf16.msra.mxu1 %v4065_v44  ;;  %v4114_v44 = vld [vmem:[%s5124_s1 + $0x790] sm:$0xff]  }
  0xbf   :  { %3724 = vmatprep.subr.bf16.mxu1 %v4067_v46  ;;  %v4117_v46 = vld [vmem:[%s5124_s1 + $0x718] sm:$0xff]  }
  0xc0   :  { %3703 = vmatpush3.bf16.msra.mxu0 %v4068_v47  ;;  %v4118_v47 = vld [vmem:[%s5124_s1 + $0x798] sm:$0xff]  }
  0xc1   :  { %3732 = vmatprep.subr.bf16.mxu0 %v4071_v50  ;;  %v4121_v50 = vld [vmem:[%s5124_s1 + $0x720] sm:$0xff]  }
  0xc2   :  { %3725 = vmatpush3.bf16.msra.mxu1 %v4069_v48  ;;  %v4119_v48 = vld [vmem:[%s5124_s1 + $0x760] sm:$0xff]  }
  0xc3   :  { %2752 = vmatmul.mubr.bf16.vlgmr.msra.gmra.mrb[20].mxu0 %v683_v49  ;;  %3754 = vmatprep.subr.bf16.mxu1 %v4072_v51  ;;  %v4120_v49 = vld [vmem:[%s5124_s1 + $0x7e0] sm:$0xff]  }
  0xc4   :  { %3733 = vmatpush3.bf16.msra.mxu0 %v4073_v52  ;;  %2831 = vmatprep.mubr.bf16.mxu0 %v739_v22  ;;  %v4122_v51 = vld [vmem:[%s5124_s1 + $0x7a0] sm:$0xff]   ;;  %v4123_v52 = vld [vmem:[%s5124_s1 + $0x768] sm:$0xff]  }
  0xc5   :  { %2792 = vmatmul.mubr.bf16.vlgmr.msra.gmra.mrb[20].mxu1 %v699_v54  ;;  %3734 = vmatprep.subr.bf16.mxu0 %v4075_v55  ;;  %v4125_v54 = vld [vmem:[%s5124_s1 + $0x728] sm:$0xff]  }
  0xc6   :  { %3755 = vmatpush3.bf16.msra.mxu1 %v4074_v53  ;;  %2871 = vmatprep.mubr.bf16.mxu1 %v749_v25  ;;  %v4124_v53 = vld [vmem:[%s5124_s1 + $0x7e8] sm:$0xff]  }
  0xc7   :  { %3756 = vmatprep.subr.bf16.mxu1 %v4076_v56  ;;  %v4126_v55 = vld [vmem:[%s5124_s1 + $0x7a8] sm:$0xff]   ;;  %v4127_v56 = vld [vmem:[%s5124_s1 + $0x770] sm:$0xff]  }
  0xc8   :  { %3735 = vmatpush3.bf16.msra.mxu0 %v4077_v57  ;;  %v3193_v57 = vld [vmem:[%s5125_s2] ss:$0 sm:$0xff] }
  0xc9   :  { %3736 = vmatprep.subr.bf16.mxu0 %v4079_v59 }
  0xca   :  { %3757 = vmatpush3.bf16.msra.mxu1 %v4078_v58  ;;  %v4128_v58 = vld [vmem:[%s5124_s1 + $0x7f0] sm:$0xff]  }
  0xcb   :  { %3758 = vmatprep.subr.bf16.mxu1 %v4080_v60  ;;  %v4129_v60 = vld [vmem:[%s5124_s1 + $0x730] sm:$0xff]  }
  0xcc   :  { %3737 = vmatpush3.bf16.msra.mxu0 %v4081_v61 }
  0xcd   :  { %3738 = vmatprep.subr.bf16.mxu0 %v4083_v63 }
  0xce   :  { %3759 = vmatpush3.bf16.msra.mxu1 %v4082_v62  ;;  %v4131_v62 = vld [vmem:[%s5124_s1 + $0x778] sm:$0xff]  }
  0xcf   :  { %3760 = vmatprep.subr.bf16.mxu1 %v4084_v0 }
  0xd0   :  { %3739 = vmatpush3.bf16.msra.mxu0 %v4085_v1 }
  0xd1   :  { %3740 = vmatprep.subr.bf16.mxu0 %v4087_v3 }
  0xd2   :  { %3761 = vmatpush3.bf16.msra.mxu1 %v4086_v2  ;;  %v4130_v2 = vld [vmem:[%s5124_s1 + $0x7b0] sm:$0xff]  }
  0xd3   :  { %3762 = vmatprep.subr.bf16.mxu1 %v4088_v4 }
  0xd4   :  { %3741 = vmatpush3.bf16.msra.mxu0 %v4089_v5 }
  0xd5   :  { %3742 = vmatprep.subr.bf16.mxu0 %v4091_v7 }
  0xd6   :  { %3763 = vmatpush3.bf16.msra.mxu1 %v4090_v6 }
  0xd7   :  { %3764 = vmatprep.subr.bf16.mxu1 %v4092_v8  ;;  %v4132_v8 = vld [vmem:[%s5124_s1 + $0x7f8] sm:$0xff]  }
  0xd8   :  { %3743 = vmatpush3.bf16.msra.mxu0 %v4093_v9 }
  0xd9   :  { %3744 = vmatprep.subr.bf16.mxu0 %v4095_v11 }
  0xda   :  { %3765 = vmatpush3.bf16.msra.mxu1 %v4094_v10  ;;  %v4133_v10 = vld [vmem:[%s5124_s1 + $0x738] sm:$0xff]  }
  0xdb   :  { %3766 = vmatprep.subr.bf16.mxu1 %v4096_v13  ;;  %v732_v13 = vrot.slane %v4927_v19, %v4323_v41 }
  0xdc   :  { %3745 = vmatpush3.bf16.msra.mxu0 %v4097_v16 }
  0xdd   :  { %3746 = vmatprep.subr.bf16.mxu0 %v4099_v17  ;;  %v748_v14 = vcombine.high %v732_v13, %v732_v13 }
  0xde   :  { %3767 = vmatpush3.bf16.msra.mxu1 %v4098_v20 }
  0xdf   :  { %3768 = vmatprep.subr.bf16.mxu1 %v4100_v21 }
  0xe0   :  { %3747 = vmatpush3.bf16.msra.mxu0 %v4101_v24 }
  0xe1   :  { %3776 = vmatprep.subr.bf16.mxu0 %v4103_v27 }
  0xe2   :  { %3769 = vmatpush3.bf16.msra.mxu1 %v4102_v28 }
  0xe3   :  { %2832 = vmatmul.mubr.bf16.vlgmr.msra.gmra.mrb[24].mxu0 %v725_v26  ;;  %3798 = vmatprep.subr.bf16.mxu1 %v4104_v30 }
  0xe4   :  { %3777 = vmatpush3.bf16.msra.mxu0 %v4105_v31  ;;  %2911 = vmatprep.mubr.bf16.mxu0 %v746_v29 }
  0xe5   :  { %2872 = vmatmul.mubr.bf16.vlgmr.msra.gmra.mrb[24].mxu1 %v747_v32  ;;  %3778 = vmatprep.subr.bf16.mxu0 %v4107_v33 }
  0xe6   :  { %3799 = vmatpush3.bf16.msra.mxu1 %v4106_v34  ;;  %2951 = vmatprep.mubr.bf16.mxu1 %v750_v35 }
  0xe7   :  { %3800 = vmatprep.subr.bf16.mxu1 %v4108_v36 }
  0xe8   :  { %3779 = vmatpush3.bf16.msra.mxu0 %v4109_v37 }
  0xe9   :  { %3780 = vmatprep.subr.bf16.mxu0 %v4111_v38 }
  0xea   :  { %3801 = vmatpush3.bf16.msra.mxu1 %v4110_v39 }
  0xeb   :  { %3802 = vmatprep.subr.bf16.mxu1 %v4112_v40 }
  0xec   :  { %3781 = vmatpush3.bf16.msra.mxu0 %v4113_v42 }
  0xed   :  { %3782 = vmatprep.subr.bf16.mxu0 %v4115_v43 }
  0xee   :  { %3803 = vmatpush3.bf16.msra.mxu1 %v4114_v44 }
  0xef   :  { %3804 = vmatprep.subr.bf16.mxu1 %v4116_v45 }
  0xf0   :  { %3783 = vmatpush3.bf16.msra.mxu0 %v4117_v46 }
  0xf1   :  { %3784 = vmatprep.subr.bf16.mxu0 %v4119_v48 }
  0xf2   :  { %3805 = vmatpush3.bf16.msra.mxu1 %v4118_v47 }
  0xf3   :  { %3806 = vmatprep.subr.bf16.mxu1 %v4120_v49 }
  0xf4   :  { %3785 = vmatpush3.bf16.msra.mxu0 %v4121_v50 }
  0xf5   :  { %3786 = vmatprep.subr.bf16.mxu0 %v4123_v52 }
  0xf6   :  { %3807 = vmatpush3.bf16.msra.mxu1 %v4122_v51  ;;  %v3484_v59 = vpop.f32.mrb[0].mxu0 }
  0xf7   :  { %v3485_v61 = vpop.f32.mrb[1].mxu0  ;;  %3808 = vmatprep.subr.bf16.mxu1 %v4124_v53  ;;  %v3506_v63 = vpop.f32.mrb[0].mxu1 }
  0xf8   :  { %v3486_v0 = vadd.f32 %v3485_v61, %v3484_v59  ;;  %v3487_v1 = vpop.f32.mrb[2].mxu0  ;;  %3787 = vmatpush3.bf16.msra.mxu0 %v4125_v54  ;;  %v3507_v3 = vpop.f32.mrb[1].mxu1 }
  0xf9   :  { %v3488_v4 = vpop.f32.mrb[3].mxu0  ;;  %3788 = vmatprep.subr.bf16.mxu0 %v4127_v56  ;;  %v3508_v6 = vadd.f32 %v3507_v3, %v3506_v63  ;;  %v3509_v7 = vpop.f32.mrb[2].mxu1 }
  0xfa   :  { %v2354_v5 = vadd.f32 %v3486_v0, %v3193_v57  ;;  %3809 = vmatpush3.bf16.msra.mxu1 %v4126_v55  ;;  %v3510_v9 = vpop.f32.mrb[3].mxu1 }
  0xfb   :  { %3810 = vmatprep.subr.bf16.mxu1 %v4128_v58 }
  0xfc   :  { %v2394_v11 = vadd.f32 %v3508_v6, %v2354_v5  ;;  %3789 = vmatpush3.bf16.msra.mxu0 %v4129_v60 }
  0xfd   :  { %3790 = vmatprep.subr.bf16.mxu0 %v4131_v62 }
  0xfe   :  { %3811 = vmatpush3.bf16.msra.mxu1 %v4130_v2 }
  0xff   :  { %3812 = vmatprep.subr.bf16.mxu1 %v4132_v8 }
 0x100   :  { %3791 = vmatpush3.bf16.msra.mxu0 %v4133_v10 }
 0x101   :  { %12 = vsyncpa [#allocation3], 0  ;;  %v4136_v38 = vld [vmem:[%s5126_s3] sm:$0xff]   ;;  %v4175_v39 = vmov 0.0   ;;  %v4137_v40 = vld [vmem:[%s5126_s3 + $0x8] sm:$0xff]   ;;  %vm3032_vm0 = vcmask 1043456  }
 0x102   :  { %3813 = vmatpush3.bf16.msra.mxu1 %v4134_v12  ;;  %3836 = vmatprep.subr.bf16.mxu0 %v4175_v39  ;;  %v4138_v42 = vld [vmem:[%s5126_s3 + $0x10] sm:$0xff]   ;;  %v4139_v43 = vld [vmem:[%s5126_s3 + $0x18] sm:$0xff]   ;;  %v4140_v44 = vld [vmem:[%s5126_s3 + $0x20] sm:$0xff]   ;;  %vm4176_vm1 = vmmov 0   ;;  %vm3028_vm2 = vcmask 982016   ;;  %vm3133_vm3 = vcmask 1041408  }
 0x103   :  { %2912 = vmatmul.mubr.bf16.vlgmr.msra.gmra.mrb[28].mxu0 %v732_v13  ;;  %3856 = vmatprep.subr.bf16.mxu1 %v4175_v39  ;;  %v4141_v47 = vld [vmem:[%s5126_s3 + $0x28] sm:$0xff]   ;;  %v4142_v57 = vld [vmem:[%s5126_s3 + $0x30] sm:$0xff]   ;;  %v4143_v59 = vld [vmem:[%s5126_s3 + $0x38] ss:$0 sps:$4 sm:$0xff]   ;;  %vm3129_vm4 = vcmask 687104   ;;  %vm3177_vm5 = vcmask 9216  }
 0x104   :  { %3837 = vmatpush3.bf16.msra.mxu0 %v4136_v38  ;;  %v3034_v60 = vsel %vm3032_vm0, %v4143_v59, 0  ;;  %3852 = vmatprep.mubr.msk.bf16.mxu0 %vm4176_vm1, %v4175_v39  ;;  %v4144_v61 = vld [vmem:[%s5128_s5] sm:$0xff]   ;;  %v4145_v62 = vld [vmem:[%s5128_s5 + $0x8] sm:$0xff]   ;;  %v4146_v63 = vld [vmem:[%s5128_s5 + $0x10] sm:$0xff]  }
 0x105   :  { %2952 = vmatmul.mubr.bf16.vlgmr.msra.gmra.mrb[28].mxu1 %v748_v14  ;;  %3838 = vmatprep.subr.bf16.mxu0 %v4175_v39  ;;  %v4147_v0 = vld [vmem:[%s5128_s5 + $0x18] sm:$0xff]  }
 0x106   :  { %3868 = vmatprep.mubr.msk.bf16.mxu1 %vm4176_vm1, %v4175_v39  ;;  %3857 = vmatpush3.bf16.msra.mxu1 %v4144_v61 }
 0x107   :  { %3858 = vmatprep.subr.bf16.mxu1 %v4175_v39 }
 0x108   :  { %3839 = vmatpush3.bf16.msra.mxu0 %v4137_v40 }
 0x109   :  { %3840 = vmatprep.subr.bf16.mxu0 %v4175_v39 }
 0x10a   :  { %3859 = vmatpush3.bf16.msra.mxu1 %v4145_v62 }
 0x10b   :  { %3860 = vmatprep.subr.bf16.mxu1 %v4175_v39 }
 0x10c   :  { %3841 = vmatpush3.bf16.msra.mxu0 %v4138_v42 }
 0x10d   :  { %3842 = vmatprep.subr.bf16.mxu0 %v4175_v39 }
 0x10e   :  { %3861 = vmatpush3.bf16.msra.mxu1 %v4146_v63 }
 0x10f   :  { %3862 = vmatprep.subr.bf16.mxu1 %v4175_v39 }
 0x110   :  { %3843 = vmatpush3.bf16.msra.mxu0 %v4139_v43 }
 0x111   :  { %3844 = vmatprep.subr.bf16.mxu0 %v4175_v39 }
 0x112   :  { %3863 = vmatpush3.bf16.msra.mxu1 %v4147_v0 }
 0x113   :  { %3864 = vmatprep.subr.bf16.mxu1 %v4175_v39 }
 0x114   :  { %3845 = vmatpush3.bf16.msra.mxu0 %v4140_v44 }
 0x115   :  { %3846 = vmatprep.subr.bf16.mxu0 %v4175_v39 }
 0x116   :  { %v3528_v15 = vpop.f32.mrb[4].mxu0 }
 0x117   :  { %v3529_v16 = vpop.f32.mrb[5].mxu0  ;;  %v3550_v17 = vpop.f32.mrb[4].mxu1 }
 0x118   :  { %v3530_v18 = vadd.f32 %v3529_v16, %v3528_v15  ;;  %v3531_v20 = vpop.f32.mrb[6].mxu0  ;;  %v3551_v21 = vpop.f32.mrb[5].mxu1  ;;  %3847 = vmatpush3.bf16.msra.mxu0 %v4141_v47 }
 0x119   :  { %v3532_v22 = vpop.f32.mrb[7].mxu0  ;;  %v3552_v24 = vadd.f32 %v3551_v21, %v3550_v17  ;;  %v3553_v25 = vpop.f32.mrb[6].mxu1  ;;  %3848 = vmatprep.subr.bf16.mxu0 %v4175_v39 }
 0x11a   :  { %v2434_v23 = vadd.f32 %v3530_v18, %v2394_v11  ;;  %v3554_v26 = vpop.f32.mrb[7].mxu1 }
 0x11c   :  { %v2474_v41 = vadd.f32 %v3552_v24, %v2434_v23  ;;  %3849 = vmatpush3.bf16.msra.mxu0 %v4142_v57 }
 0x11d   :  { %3850 = vmatprep.subr.bf16.mxu0 %v4175_v39 }
 0x120   :  { %3851 = vmatpush3.bf16.msra.mxu0 %v3034_v60 }
 0x136   :  { %v3572_v19 = vpop.f32.mrb[8].mxu0 }
 0x137   :  { %v3573_v27 = vpop.f32.mrb[9].mxu0 }
 0x138   :  { %v3594_v28 = vpop.f32.mrb[8].mxu1  ;;  %v3574_v29 = vadd.f32 %v3573_v27, %v3572_v19  ;;  %v3575_v30 = vpop.f32.mrb[10].mxu0 }
 0x139   :  { %v3595_v31 = vpop.f32.mrb[9].mxu1  ;;  %v3576_v32 = vpop.f32.mrb[11].mxu0 }
 0x13a   :  { %v2514_v33 = vadd.f32 %v3574_v29, %v2474_v41  ;;  %v3596_v34 = vadd.f32 %v3595_v31, %v3594_v28  ;;  %v3597_v35 = vpop.f32.mrb[10].mxu1 }
 0x13b   :  { %v3598_v36 = vpop.f32.mrb[11].mxu1 }
 0x13c   :  { %v2554_v37 = vadd.f32 %v3596_v34, %v2514_v33 }
 0x156   :  { %v3616_v45 = vpop.f32.mrb[12].mxu0 }
 0x157   :  { %v3617_v46 = vpop.f32.mrb[13].mxu0 }
 0x158   :  { %v3638_v48 = vpop.f32.mrb[12].mxu1  ;;  %v3618_v49 = vadd.f32 %v3617_v46, %v3616_v45  ;;  %v3619_v50 = vpop.f32.mrb[14].mxu0 }
 0x159   :  { %v3639_v51 = vpop.f32.mrb[13].mxu1  ;;  %v3620_v52 = vpop.f32.mrb[15].mxu0 }
 0x15a   :  { %v2594_v53 = vadd.f32 %v3618_v49, %v2554_v37  ;;  %v3640_v54 = vadd.f32 %v3639_v51, %v3638_v48  ;;  %v3641_v55 = vpop.f32.mrb[14].mxu1  ;;  %v4148_v52 = vld [vmem:[%s5128_s5 + $0x20] sm:$0xff]  }
 0x15b   :  { %v3642_v56 = vpop.f32.mrb[15].mxu1  ;;  %3865 = vmatpush3.bf16.msra.mxu1 %v4148_v52  ;;  %v3450_v55 = vld [vmem:[%s5127_s4] ss:$0 sm:$0xff] }
 0x15c   :  { %v2634_v58 = vadd.f32 %v3640_v54, %v2594_v53  ;;  %3866 = vmatprep.subr.bf16.mxu1 %v4175_v39  ;;  %v4149_v53 = vld [vmem:[%s5128_s5 + $0x28] ss:$0 sps:$4 sm:$0x33]   ;;  %v3460_v39 = vld [vmem:[%s5129_s6] ss:$0 sm:$0xff]  ;;  %s4177_s5 = smov [#allocation2]  }
 0x15d   :  { %v3135_v54 = vsel %vm3133_vm3, %v4149_v53, 0  ;;  %s3185_s16 = sshll.u32 %s4177_s5, 4  ;;  %s3186_s16 = int_to_ptr.vmem [resolvable:$true] %s3185_s16 }
 0x15e   :  { %s4150_s4 = scalar_lea.vmem %s3186_s16, 32  ;;  %p4155_p1 = scmp.lt.s32.totalorder %s3186_s16, %s3186_s16 }
 0x15f   :  { %3867 = vmatpush3.bf16.msra.mxu1 %v3135_v54  ;;  %p4151_p0 = scmp.ne.s32.totalorder %s3186_s16, %s4150_s4  ;;  %p4156_p2 = scmp.lt.s32.totalorder %s4150_s4, %s4150_s4 }
 0x161   :  { %p4157_p3 = por %p4156_p2, %p4155_p1 }
 0x163   :  { %p4158_p4 = pnand %p4157_p3, %p4151_p0 }
 0x176   :  { %v3660_v1 = vpop.f32.mrb[16].mxu0 }
 0x177   :  { %v3661_v2 = vpop.f32.mrb[17].mxu0 }
 0x178   :  { %v3682_v3 = vpop.f32.mrb[16].mxu1  ;;  %v3662_v4 = vadd.f32 %v3661_v2, %v3660_v1  ;;  %v3663_v5 = vpop.f32.mrb[18].mxu0 }
 0x179   :  { %v3683_v6 = vpop.f32.mrb[17].mxu1  ;;  %v3664_v7 = vpop.f32.mrb[19].mxu0 }
 0x17a   :  { %v2674_v8 = vadd.f32 %v3662_v4, %v2634_v58  ;;  %v3684_v9 = vadd.f32 %v3683_v6, %v3682_v3  ;;  %v3685_v10 = vpop.f32.mrb[18].mxu1 }
 0x17b   :  { %v3686_v11 = vpop.f32.mrb[19].mxu1 }
 0x17c   :  { %v2714_v12 = vadd.f32 %v3684_v9, %v2674_v8 }
 0x196   :  { %v3704_v13 = vpop.f32.mrb[20].mxu0 }
 0x197   :  { %v3705_v14 = vpop.f32.mrb[21].mxu0 }
 0x198   :  { %v3726_v15 = vpop.f32.mrb[20].mxu1  ;;  %v3706_v16 = vadd.f32 %v3705_v14, %v3704_v13  ;;  %v3707_v17 = vpop.f32.mrb[22].mxu0 }
 0x199   :  { %v3727_v18 = vpop.f32.mrb[21].mxu1  ;;  %v3708_v20 = vpop.f32.mrb[23].mxu0 }
 0x19a   :  { %v2754_v21 = vadd.f32 %v3706_v16, %v2714_v12  ;;  %v3728_v22 = vadd.f32 %v3727_v18, %v3726_v15  ;;  %v3729_v23 = vpop.f32.mrb[22].mxu1 }
 0x19b   :  { %v3730_v24 = vpop.f32.mrb[23].mxu1 }
 0x19c   :  { %v2794_v25 = vadd.f32 %v3728_v22, %v2754_v21 }
 0x1b6   :  { %v3748_v26 = vpop.f32.mrb[24].mxu0 }
 0x1b7   :  { %v3749_v41 = vpop.f32.mrb[25].mxu0 }
 0x1b8   :  { %v3770_v19 = vpop.f32.mrb[24].mxu1  ;;  %v3750_v27 = vadd.f32 %v3749_v41, %v3748_v26  ;;  %v3751_v28 = vpop.f32.mrb[26].mxu0 }
 0x1b9   :  { %v3771_v29 = vpop.f32.mrb[25].mxu1  ;;  %v3752_v30 = vpop.f32.mrb[27].mxu0 }
 0x1ba   :  { %v2834_v31 = vadd.f32 %v3750_v27, %v2794_v25  ;;  %v3772_v32 = vadd.f32 %v3771_v29, %v3770_v19  ;;  %v3773_v33 = vpop.f32.mrb[26].mxu1 }
 0x1bb   :  { %v3774_v34 = vpop.f32.mrb[27].mxu1 }
 0x1bc   :  { %v2874_v35 = vadd.f32 %v3772_v32, %v2834_v31 }
 0x1d6   :  { %v3792_v36 = vpop.f32.mrb[28].mxu0 }
 0x1d7   :  { %v3793_v37 = vpop.f32.mrb[29].mxu0 }
 0x1d8   :  { %v3814_v38 = vpop.f32.mrb[28].mxu1  ;;  %v3794_v40 = vadd.f32 %v3793_v37, %v3792_v36  ;;  %v3795_v42 = vpop.f32.mrb[30].mxu0 }
 0x1d9   :  { %v3815_v43 = vpop.f32.mrb[29].mxu1  ;;  %v3796_v44 = vpop.f32.mrb[31].mxu0 }
 0x1da   :  { %v2914_v45 = vadd.f32 %v3794_v40, %v2874_v35  ;;  %v3816_v46 = vadd.f32 %v3815_v43, %v3814_v38  ;;  %v3817_v47 = vpop.f32.mrb[30].mxu1 }
 0x1db   :  { %v3818_v48 = vpop.f32.mrb[31].mxu1 }
 0x1dc   :  { %v2954_v49 = vadd.f32 %v3816_v46, %v2914_v45 }
 0x1de   :  { %v2959_v50 = vmax.f32 %v2954_v49, 0.0 }
 0x1e0   :  { %v2960_v51 = vpack.c.bf16 %v2959_v50, %v2959_v50 }
 0x1e2   :  { %3853 = vmatmul.mubr.msk.bf16.vlgmr.msra.gmra.mrb[32].mxu0 %vm3028_vm2, %v2960_v51 }
 0x2b5   :  { %v3070_v56 = vpop.f32.mrb[32].mxu0 }
 0x2b6   :  { %v3071_v57 = vadd.f32 %v3450_v55, %v3070_v56  ;;  %v3854_v58 = vpop.f32.mrb[33].mxu0 }
 0x2b7   :  { %v3073_v59 = vpop.f32.mrb[34].mxu0 }
 0x2b8   :  { %v3076_v60 = vmax.f32 %v3071_v57, 0.0  ;;  %v3855_v61 = vpop.f32.mrb[35].mxu0 }
 0x2ba   :  { %v3077_v62 = vpack.c.bf16 %v3076_v60, %v3076_v60 }
 0x2bc   :  { %3869 = vmatmul.mubr.msk.bf16.vlgmr.msra.gmra.mrb[32].mxu1 %vm3129_vm4, %v3077_v62 }
 0x38f   :  { %v3171_v63 = vpop.f32.mrb[32].mxu1 }
 0x390   :  { %v3172_v0 = vadd.f32 %v3460_v39, %v3171_v63  ;;  %v3870_v1 = vpop.f32.mrb[33].mxu1 }
 0x391   :  { %v3174_v2 = vpop.f32.mrb[34].mxu1 }
 0x392   :  { %v3871_v3 = vpop.f32.mrb[35].mxu1  ;;  %3178 = vst.msk [vmem:[#allocation2] sm:$0x3] %vm3177_vm5, %v3172_v0 }
 0x393   :  { %4161 = shalt.err (!%p4158_p4)
}
 0x394   :  { %s4162_s6 = scalar_lea.hbm %s5130_s7, 32 }
 0x395   :  { %p4163_p5 = scmp.ne.s32.totalorder %s5130_s7, %s4162_s6  ;;  %p4166_p6 = scmp.lt.u32.totalorder %s4162_s6, %s5130_s7 }
 0x397   :  { %p4168_p7 = pnand %p4166_p6, %p4163_p5 }
 0x399   :  { %4171 = shalt.err (!%p4168_p7)
}
 0x39a   :  { %3188 = dma.vmem_to_hbm [thread:$0]  %s3186_s16, 32, %s5130_s7, [#allocation3]  }
 0x39b   :  { %4172 = dma.done.wait [#allocation3], 32  }
 0x39c   :  { %4173 = vsyncadd [#allocation3], 4294967264 }
 0x39d   :  { %3192 = vsyncpa [#allocation3], 1 }

</bundles_post_ra>
